<compile_context>
chip_gen: v7x
topology: tpu7x:2x2x1
jax: 0.10.0
libtpu: 0.0.40
codegen_flags: <defaults>
</compile_context>

<pallas_src>
import functools

import jax
import jax.numpy as jnp
from jax.experimental import pallas as pl
from jax.experimental.pallas import tpu as pltpu


def _round_up(x, m):
    return ((x + m - 1) // m) * m


# ---------------------------------------------------------------------------
# Pallas kernels
# ---------------------------------------------------------------------------
def _conv_bnstats_kernel(x_ref, w_ref, o_ref, stat_ref, *,
                         toh, owp, stride, kh, kw, oh, ow, need_mask):
    """Fused im2col-free conv tile + BatchNorm batch statistics.

    x_ref   : (Hp, Wp, Cin) bf16 — whole padded image of one batch element
              (VMEM-resident across the co / oy grid axes).
    w_ref   : (kh, kw, Cin, tn) bf16 weight slab (resident when tn == Cout_pad).
    o_ref   : (toh*owp, tn) bf16 conv-output tile (written once, no revisit).
    stat_ref: (8, tn) f32; sublane 0 = per-channel sum, sublane 1 = sum(x^2).
    """
    oy = pl.program_id(2)
    rows = toh * owp
    tn = o_ref.shape[1]
    bh = toh * stride
    hbase = pl.multiple_of(oy * bh, bh)

    acc = jnp.zeros((rows, tn), jnp.float32)
    for ki in range(kh):
        for kj in range(kw):
            if stride == 1:
                win = x_ref[pl.ds(hbase + ki, toh), pl.ds(kj, owp), :]
            else:
                win = x_ref[pl.ds(hbase + ki, toh, stride),
                            pl.ds(kj, owp, stride), :]
            acc = acc + jnp.dot(win.reshape(rows, win.shape[-1]),
                                w_ref[ki, kj],
                                preferred_element_type=jnp.float32)

    if need_mask:
        # Padded output rows/cols (OH_pad > OH or OW_pad > OW) can overlap real
        # data; zero them so the BN statistics stay exact.
        r = jax.lax.broadcasted_iota(jnp.int32, (rows, tn), 0)
        t_rel = r // owp
        x_rel = r % owp
        valid = ((oy * toh + t_rel) < oh) & (x_rel < ow)
        acc = jnp.where(valid, acc, 0.0)

    o_ref[...] = acc.astype(o_ref.dtype)                      # bf16 intermediate
    s = jnp.sum(acc, axis=0, keepdims=True)                   # (1, tn) f32
    sq = jnp.sum(acc * acc, axis=0, keepdims=True)            # (1, tn) f32
    sub = jax.lax.broadcasted_iota(jnp.int32, stat_ref.shape, 0)
    stat_ref[...] = jnp.where(sub == 0, s, jnp.where(sub == 1, sq, 0.0))


def _bn_lrelu_kernel(x_ref, scale_ref, shift_ref, o_ref, *, slope):
    """y = bf16(x) * scale + shift (f32 math); LeakyReLU(slope)."""
    y = x_ref[...].astype(jnp.float32) * scale_ref[...] + shift_ref[...]
    o_ref[...] = jnp.where(y > 0, y, slope * y)


# ---------------------------------------------------------------------------
# pallas_call wrappers
# ---------------------------------------------------------------------------
def _conv_bn_stats(xpad, wmat, *, toh, owp, stride, oh, ow, oh_p, tn, need_mask):
    n, hp2, wp2, cin = xpad.shape
    kh, kw, _, cout_pad = wmat.shape
    num_oh = oh_p // toh
    num_co = cout_pad // tn
    rows = toh * owp
    m_pad = n * num_oh * rows

    kern = functools.partial(_conv_bnstats_kernel, toh=toh, owp=owp,
                             stride=stride, kh=kh, kw=kw, oh=oh, ow=ow,
                             need_mask=need_mask)
    return pl.pallas_call(
        kern,
        out_shape=(
            jax.ShapeDtypeStruct((m_pad, cout_pad), jnp.bfloat16),
            jax.ShapeDtypeStruct((n * num_oh * 8, cout_pad), jnp.float32),
        ),
        grid_spec=pltpu.PrefetchScalarGridSpec(
            num_scalar_prefetch=0,
            # Grid order (batch, cout-tiles, oh-tiles): the image block index
            # only depends on b, the weight block only on co -> both stay
            # resident across the inner axes (fetched once / once-per-co).
            grid=(n, num_co, num_oh),
            in_specs=[
                pl.BlockSpec((None, hp2, wp2, cin),
                             lambda b, co, oy: (b, 0, 0, 0)),
                pl.BlockSpec((kh, kw, cin, tn),
                             lambda b, co, oy: (0, 0, 0, co)),
            ],
            out_specs=[
                pl.BlockSpec((rows, tn),
                             lambda b, co, oy: (b * num_oh + oy, co)),
                pl.BlockSpec((8, tn),
                             lambda b, co, oy: (b * num_oh + oy, co)),
            ],
        ),
        compiler_params=pltpu.CompilerParams(
            # All axes are independent (no reduction axis): eligible for
            # megacore sharding on v7x.
            # TODO(synk): if profiling shows a single-TC hot loop on v7x, force
            # pltpu.CORE_PARALLEL on the leading axis.
            dimension_semantics=("parallel", "parallel", "parallel"),
            vmem_limit_bytes=48 * 1024 * 1024,   # safe under v7x's 64 MiB VMEM
        ),
    )(xpad, wmat)


def _pick_row_block(rows, n_tiles, bn, max_rows=2048, max_bytes=16 * 2**20):
    """Largest multiple of `rows` that divides rows*n_tiles and fits budget."""
    for r in range(n_tiles, 0, -1):
        if n_tiles % r:
            continue
        bm = rows * r
        if bm <= max_rows and bm * bn * 12 <= max_bytes:
            return bm
    return rows


def _bn_lrelu_apply(conv2d, scale, shift, *, bm, bn, slope):
    m_pad, cout_pad = conv2d.shape
    kern = functools.partial(_bn_lrelu_kernel, slope=slope)
    return pl.pallas_call(
        kern,
        out_shape=jax.ShapeDtypeStruct((m_pad, cout_pad), jnp.float32),
        grid_spec=pltpu.PrefetchScalarGridSpec(
            num_scalar_prefetch=0,
            grid=(m_pad // bm, cout_pad // bn),
            in_specs=[
                pl.BlockSpec((bm, bn), lambda i, j: (i, j)),
                pl.BlockSpec((1, bn), lambda i, j: (0, j)),
                pl.BlockSpec((1, bn), lambda i, j: (0, j)),
            ],
            out_specs=pl.BlockSpec((bm, bn), lambda i, j: (i, j)),
        ),
        compiler_params=pltpu.CompilerParams(
            dimension_semantics=("parallel", "parallel"),
            vmem_limit_bytes=48 * 1024 * 1024,
        ),
    )(conv2d, scale.reshape(1, cout_pad), shift.reshape(1, cout_pad))


# ---------------------------------------------------------------------------
# ConvLayer forward
# ---------------------------------------------------------------------------
def conv_layer_forward(x_nchw, weight, gamma, beta, stride, pad,
                       eps=1e-5, slope=0.1):
    """Conv2d(no bias) -> BatchNorm2d(batch stats, affine) -> LeakyReLU(0.1).

    x_nchw: (N, Cin, H, W), weight: (Cout, Cin, KH, KW)  (PyTorch layouts).
    Returns (N, Cout, OH, OW) float32.
    """
    n, cin, h, w = x_nchw.shape
    cout, cin_w, kh, kw = weight.shape
    assert cin == cin_w

    oh = (h + 2 * pad - kh) // stride + 1
    ow = (w + 2 * pad - kw) // stride + 1

    # ---- tile / padding selection (budgeted against v7x's 64 MiB VMEM) ----
    ow_p = _round_up(ow, 8)                       # keeps flattened rows 8-aligned
    toh = max(1, min(oh, 1024 // ow_p))           # ~512-1024 output rows / tile
    cout_pad = _round_up(cout, 256) if cout >= 256 else _round_up(cout, 128)
    w_full_bytes = kh * kw * cin * cout_pad * 2
    tn = cout_pad if w_full_bytes <= 4 * 2**20 else (
        256 if cout_pad % 256 == 0 else 128)      # weights resident when small

    wp2 = max(w + 2 * pad, (ow_p - 1) * stride + kw)
    img_bytes = (h + 2 * pad) * wp2 * cin * 2

    def _vmem_est(toh_):
        rows_ = toh_ * ow_p
        return (2 * img_bytes + 2 * kh * kw * cin * tn * 2
                + 2 * rows_ * tn * 2 + rows_ * tn * 4 + 2 * 8 * tn * 4)

    while toh > 1 and _vmem_est(toh) > 40 * 2**20:
        toh //= 2
    # TODO(synk): for very large feature maps (resident image > ~24 MiB) fall
    # back to H-tiled halo windows via memory_space=pl.ANY + make_async_copy.

    oh_p = _round_up(oh, toh)
    hp2 = max(h + 2 * pad, (oh_p - 1) * stride + kh)
    need_mask = (oh_p > oh) or (ow_p > ow)

    # ---- layout prep (single cheap pass, no im2col materialization) ----
    x_nhwc = jnp.transpose(x_nchw, (0, 2, 3, 1)).astype(jnp.bfloat16)
    xpad = jnp.pad(x_nhwc, ((0, 0), (pad, hp2 - h - pad),
                            (pad, wp2 - w - pad), (0, 0)))
    wmat = jnp.transpose(weight, (2, 3, 1, 0)).astype(jnp.bfloat16)   # (KH,KW,Cin,Cout)
    wmat = jnp.pad(wmat, ((0, 0), (0, 0), (0, 0), (0, cout_pad - cout)))

    # ---- fused conv + BN statistics ----
    conv2d, stats = _conv_bn_stats(xpad, wmat, toh=toh, owp=ow_p, stride=stride,
                                   oh=oh, ow=ow, oh_p=oh_p, tn=tn,
                                   need_mask=need_mask)

    # ---- finalize biased batch statistics (tiny (Cout_pad,) math) ----
    sums = stats[0::8, :].sum(axis=0)
    sqs = stats[1::8, :].sum(axis=0)
    inv_m = 1.0 / float(n * oh * ow)              # padded rows contribute zero
    mean = sums * inv_m
    var = jnp.maximum(sqs * inv_m - mean * mean, 0.0)
    # TODO(synk): Welford/two-pass finalize if BN-stat precision at huge M matters.
    gamma_p = jnp.pad(gamma.astype(jnp.float32), (0, cout_pad - cout))
    beta_p = jnp.pad(beta.astype(jnp.float32), (0, cout_pad - cout))
    scale = gamma_p * jax.lax.rsqrt(var + eps)
    shift = beta_p - mean * scale

    # ---- BN apply + LeakyReLU (bf16 in, f32 math/out, large streaming tiles) ----
    rows = toh * ow_p
    bm = _pick_row_block(rows, conv2d.shape[0] // rows, tn)
    y2 = _bn_lrelu_apply(conv2d, scale, shift, bm=bm, bn=tn, slope=slope)

    y = y2.reshape(n, oh_p, ow_p, cout_pad)[:, :oh, :ow, :cout]
    # TODO(synk): if the consumer is another ConvLayer, keep NHWC end-to-end and
    # skip this NHWC->NCHW transpose (it is one extra HBM pass over the output).
    return jnp.transpose(y, (0, 3, 1, 2))


# ---------------------------------------------------------------------------
# Example run
# ---------------------------------------------------------------------------
if __name__ == "__main__":
    key = jax.random.PRNGKey(0)
    kx, kw_, kg, kb = jax.random.split(key, 4)

    # ConvLayer(in_channels=4, out_channels=8, kernel_size=3, stride=1, pad=1)
    N, Cin, H, W = 2, 4, 16, 16
    Cout, KH, KW = 8, 3, 3
    stride, pad = 1, 1

    x = jax.random.normal(kx, (N, Cin, H, W), dtype=jnp.float32)
    weight = jax.random.normal(kw_, (Cout, Cin, KH, KW), dtype=jnp.float32) * 0.1
    gamma = 1.0 + 0.1 * jax.random.normal(kg, (Cout,), dtype=jnp.float32)
    beta = 0.1 * jax.random.normal(kb, (Cout,), dtype=jnp.float32)

    out = conv_layer_forward(x, weight, gamma, beta, stride, pad)
    out = jax.block_until_ready(out)

    assert out.shape == (N, Cout, H, W), out.shape
    assert bool(jnp.isfinite(out).all())

    # f32 XLA reference (Conv2d -> BatchNorm2d training batch stats -> LeakyReLU).
    conv_ref = jax.lax.conv_general_dilated(
        x, weight, (stride, stride), [(pad, pad), (pad, pad)],
        dimension_numbers=("NCHW", "OIHW", "NCHW"),
        precision=jax.lax.Precision.HIGHEST)
    mu = conv_ref.mean(axis=(0, 2, 3), keepdims=True)
    var = conv_ref.var(axis=(0, 2, 3), keepdims=True)
    y_ref = (conv_ref - mu) * jax.lax.rsqrt(var + 1e-5)
    y_ref = y_ref * gamma.reshape(1, -1, 1, 1) + beta.reshape(1, -1, 1, 1)
    y_ref = jnp.where(y_ref > 0, y_ref, 0.1 * y_ref)
    err = float(jnp.max(jnp.abs(out - y_ref)))
    assert err < 5e-2, f"max abs err vs f32 reference: {err}"

    print("KERNEL_OK")
</pallas_src>

<mosaic_0001>
module attributes {stable_mosaic.version = 11 : i64} {
  func.func @_conv_bnstats_kernel(%arg0: i32, %arg1: i32, %arg2: i32, %arg3: memref<1x18x18x4xbf16, #tpu.memory_space<vmem>>, %arg4: memref<3x3x4x128xbf16, #tpu.memory_space<vmem>>, %arg5: memref<256x128xbf16, #tpu.memory_space<vmem>>, %arg6: memref<8x128xf32, #tpu.memory_space<vmem>>) attributes {dimension_semantics = [#tpu.dimension_semantics<parallel>, #tpu.dimension_semantics<parallel>, #tpu.dimension_semantics<parallel>], iteration_bounds = array<i64: 2, 1, 1>, scalar_prefetch = 0 : i64, scratch_operands = 0 : i64, tpu.core_type = #tpu.core_type<tc>, window_params = [{transform_indices = @transform_0, window_bounds = array<i64: 1, 18, 18, 4>}, {transform_indices = @transform_1, window_bounds = array<i64: 3, 3, 4, 128>}, {transform_indices = @transform_2, window_bounds = array<i64: 256, 128>}, {transform_indices = @transform_3, window_bounds = array<i64: 8, 128>}]} {
    %c16_i32 = arith.constant 16 : i32
    %0 = arith.muli %arg2, %c16_i32 : i32
    %1 = tpu.assume_multiple %0, 16 : i32
    %cst = arith.constant 0.000000e+00 : f32
    %2 = vector.broadcast %cst : f32 to vector<256x128xf32>
    %c0_i32 = arith.constant 0 : i32
    %3 = arith.addi %1, %c0_i32 : i32
    %c0 = arith.constant 0 : index
    %4 = arith.index_cast %3 : i32 to index
    %c0_0 = arith.constant 0 : index
    %c0_1 = arith.constant 0 : index
    %5 = vector.load %arg3[%c0, %4, %c0_0, %c0_1] : memref<1x18x18x4xbf16, #tpu.memory_space<vmem>>, vector<1x16x16x4xbf16>
    %6 = vector.shape_cast %5 : vector<1x16x16x4xbf16> to vector<16x16x4xbf16>
    %7 = vector.shape_cast %6 : vector<16x16x4xbf16> to vector<256x4xbf16>
    %c0_2 = arith.constant 0 : index
    %c0_3 = arith.constant 0 : index
    %c0_4 = arith.constant 0 : index
    %c0_5 = arith.constant 0 : index
    %8 = vector.load %arg4[%c0_2, %c0_3, %c0_4, %c0_5] : memref<3x3x4x128xbf16, #tpu.memory_space<vmem>>, vector<1x1x4x128xbf16>
    %9 = vector.shape_cast %8 : vector<1x1x4x128xbf16> to vector<4x128xbf16>
    %cst_6 = arith.constant dense<0.000000e+00> : vector<256x128xf32>
    %10 = tpu.matmul %7, %9, %cst_6 {dimension_numbers = #tpu.dot_dimension_numbers<[1], [0], [0], [1], [0, 0, 1, 1], [], []>} : vector<256x4xbf16>, vector<4x128xbf16>, vector<256x128xf32> -> vector<256x128xf32>
    %11 = arith.addf %2, %10 : vector<256x128xf32>
    %c0_i32_7 = arith.constant 0 : i32
    %12 = arith.addi %1, %c0_i32_7 : i32
    %c0_8 = arith.constant 0 : index
    %13 = arith.index_cast %12 : i32 to index
    %c1 = arith.constant 1 : index
    %c0_9 = arith.constant 0 : index
    %14 = vector.load %arg3[%c0_8, %13, %c1, %c0_9] : memref<1x18x18x4xbf16, #tpu.memory_space<vmem>>, vector<1x16x16x4xbf16>
    %15 = vector.shape_cast %14 : vector<1x16x16x4xbf16> to vector<16x16x4xbf16>
    %16 = vector.shape_cast %15 : vector<16x16x4xbf16> to vector<256x4xbf16>
    %c0_10 = arith.constant 0 : index
    %c1_11 = arith.constant 1 : index
    %c0_12 = arith.constant 0 : index
    %c0_13 = arith.constant 0 : index
    %17 = vector.load %arg4[%c0_10, %c1_11, %c0_12, %c0_13] : memref<3x3x4x128xbf16, #tpu.memory_space<vmem>>, vector<1x1x4x128xbf16>
    %18 = vector.shape_cast %17 : vector<1x1x4x128xbf16> to vector<4x128xbf16>
    %cst_14 = arith.constant dense<0.000000e+00> : vector<256x128xf32>
    %19 = tpu.matmul %16, %18, %cst_14 {dimension_numbers = #tpu.dot_dimension_numbers<[1], [0], [0], [1], [0, 0, 1, 1], [], []>} : vector<256x4xbf16>, vector<4x128xbf16>, vector<256x128xf32> -> vector<256x128xf32>
    %20 = arith.addf %11, %19 : vector<256x128xf32>
    %c0_i32_15 = arith.constant 0 : i32
    %21 = arith.addi %1, %c0_i32_15 : i32
    %c0_16 = arith.constant 0 : index
    %22 = arith.index_cast %21 : i32 to index
    %c2 = arith.constant 2 : index
    %c0_17 = arith.constant 0 : index
    %23 = vector.load %arg3[%c0_16, %22, %c2, %c0_17] : memref<1x18x18x4xbf16, #tpu.memory_space<vmem>>, vector<1x16x16x4xbf16>
    %24 = vector.shape_cast %23 : vector<1x16x16x4xbf16> to vector<16x16x4xbf16>
    %25 = vector.shape_cast %24 : vector<16x16x4xbf16> to vector<256x4xbf16>
    %c0_18 = arith.constant 0 : index
    %c2_19 = arith.constant 2 : index
    %c0_20 = arith.constant 0 : index
    %c0_21 = arith.constant 0 : index
    %26 = vector.load %arg4[%c0_18, %c2_19, %c0_20, %c0_21] : memref<3x3x4x128xbf16, #tpu.memory_space<vmem>>, vector<1x1x4x128xbf16>
    %27 = vector.shape_cast %26 : vector<1x1x4x128xbf16> to vector<4x128xbf16>
    %cst_22 = arith.constant dense<0.000000e+00> : vector<256x128xf32>
    %28 = tpu.matmul %25, %27, %cst_22 {dimension_numbers = #tpu.dot_dimension_numbers<[1], [0], [0], [1], [0, 0, 1, 1], [], []>} : vector<256x4xbf16>, vector<4x128xbf16>, vector<256x128xf32> -> vector<256x128xf32>
    %29 = arith.addf %20, %28 : vector<256x128xf32>
    %c1_i32 = arith.constant 1 : i32
    %30 = arith.addi %1, %c1_i32 : i32
    %c0_23 = arith.constant 0 : index
    %31 = arith.index_cast %30 : i32 to index
    %c0_24 = arith.constant 0 : index
    %c0_25 = arith.constant 0 : index
    %32 = vector.load %arg3[%c0_23, %31, %c0_24, %c0_25] : memref<1x18x18x4xbf16, #tpu.memory_space<vmem>>, vector<1x16x16x4xbf16>
    %33 = vector.shape_cast %32 : vector<1x16x16x4xbf16> to vector<16x16x4xbf16>
    %34 = vector.shape_cast %33 : vector<16x16x4xbf16> to vector<256x4xbf16>
    %c1_26 = arith.constant 1 : index
    %c0_27 = arith.constant 0 : index
    %c0_28 = arith.constant 0 : index
    %c0_29 = arith.constant 0 : index
    %35 = vector.load %arg4[%c1_26, %c0_27, %c0_28, %c0_29] : memref<3x3x4x128xbf16, #tpu.memory_space<vmem>>, vector<1x1x4x128xbf16>
    %36 = vector.shape_cast %35 : vector<1x1x4x128xbf16> to vector<4x128xbf16>
    %cst_30 = arith.constant dense<0.000000e+00> : vector<256x128xf32>
    %37 = tpu.matmul %34, %36, %cst_30 {dimension_numbers = #tpu.dot_dimension_numbers<[1], [0], [0], [1], [0, 0, 1, 1], [], []>} : vector<256x4xbf16>, vector<4x128xbf16>, vector<256x128xf32> -> vector<256x128xf32>
    %38 = arith.addf %29, %37 : vector<256x128xf32>
    %c1_i32_31 = arith.constant 1 : i32
    %39 = arith.addi %1, %c1_i32_31 : i32
    %c0_32 = arith.constant 0 : index
    %40 = arith.index_cast %39 : i32 to index
    %c1_33 = arith.constant 1 : index
    %c0_34 = arith.constant 0 : index
    %41 = vector.load %arg3[%c0_32, %40, %c1_33, %c0_34] : memref<1x18x18x4xbf16, #tpu.memory_space<vmem>>, vector<1x16x16x4xbf16>
    %42 = vector.shape_cast %41 : vector<1x16x16x4xbf16> to vector<16x16x4xbf16>
    %43 = vector.shape_cast %42 : vector<16x16x4xbf16> to vector<256x4xbf16>
    %c1_35 = arith.constant 1 : index
    %c1_36 = arith.constant 1 : index
    %c0_37 = arith.constant 0 : index
    %c0_38 = arith.constant 0 : index
    %44 = vector.load %arg4[%c1_35, %c1_36, %c0_37, %c0_38] : memref<3x3x4x128xbf16, #tpu.memory_space<vmem>>, vector<1x1x4x128xbf16>
    %45 = vector.shape_cast %44 : vector<1x1x4x128xbf16> to vector<4x128xbf16>
    %cst_39 = arith.constant dense<0.000000e+00> : vector<256x128xf32>
    %46 = tpu.matmul %43, %45, %cst_39 {dimension_numbers = #tpu.dot_dimension_numbers<[1], [0], [0], [1], [0, 0, 1, 1], [], []>} : vector<256x4xbf16>, vector<4x128xbf16>, vector<256x128xf32> -> vector<256x128xf32>
    %47 = arith.addf %38, %46 : vector<256x128xf32>
    %c1_i32_40 = arith.constant 1 : i32
    %48 = arith.addi %1, %c1_i32_40 : i32
    %c0_41 = arith.constant 0 : index
    %49 = arith.index_cast %48 : i32 to index
    %c2_42 = arith.constant 2 : index
    %c0_43 = arith.constant 0 : index
    %50 = vector.load %arg3[%c0_41, %49, %c2_42, %c0_43] : memref<1x18x18x4xbf16, #tpu.memory_space<vmem>>, vector<1x16x16x4xbf16>
    %51 = vector.shape_cast %50 : vector<1x16x16x4xbf16> to vector<16x16x4xbf16>
    %52 = vector.shape_cast %51 : vector<16x16x4xbf16> to vector<256x4xbf16>
    %c1_44 = arith.constant 1 : index
    %c2_45 = arith.constant 2 : index
    %c0_46 = arith.constant 0 : index
    %c0_47 = arith.constant 0 : index
    %53 = vector.load %arg4[%c1_44, %c2_45, %c0_46, %c0_47] : memref<3x3x4x128xbf16, #tpu.memory_space<vmem>>, vector<1x1x4x128xbf16>
    %54 = vector.shape_cast %53 : vector<1x1x4x128xbf16> to vector<4x128xbf16>
    %cst_48 = arith.constant dense<0.000000e+00> : vector<256x128xf32>
    %55 = tpu.matmul %52, %54, %cst_48 {dimension_numbers = #tpu.dot_dimension_numbers<[1], [0], [0], [1], [0, 0, 1, 1], [], []>} : vector<256x4xbf16>, vector<4x128xbf16>, vector<256x128xf32> -> vector<256x128xf32>
    %56 = arith.addf %47, %55 : vector<256x128xf32>
    %c2_i32 = arith.constant 2 : i32
    %57 = arith.addi %1, %c2_i32 : i32
    %c0_49 = arith.constant 0 : index
    %58 = arith.index_cast %57 : i32 to index
    %c0_50 = arith.constant 0 : index
    %c0_51 = arith.constant 0 : index
    %59 = vector.load %arg3[%c0_49, %58, %c0_50, %c0_51] : memref<1x18x18x4xbf16, #tpu.memory_space<vmem>>, vector<1x16x16x4xbf16>
    %60 = vector.shape_cast %59 : vector<1x16x16x4xbf16> to vector<16x16x4xbf16>
    %61 = vector.shape_cast %60 : vector<16x16x4xbf16> to vector<256x4xbf16>
    %c2_52 = arith.constant 2 : index
    %c0_53 = arith.constant 0 : index
    %c0_54 = arith.constant 0 : index
    %c0_55 = arith.constant 0 : index
    %62 = vector.load %arg4[%c2_52, %c0_53, %c0_54, %c0_55] : memref<3x3x4x128xbf16, #tpu.memory_space<vmem>>, vector<1x1x4x128xbf16>
    %63 = vector.shape_cast %62 : vector<1x1x4x128xbf16> to vector<4x128xbf16>
    %cst_56 = arith.constant dense<0.000000e+00> : vector<256x128xf32>
    %64 = tpu.matmul %61, %63, %cst_56 {dimension_numbers = #tpu.dot_dimension_numbers<[1], [0], [0], [1], [0, 0, 1, 1], [], []>} : vector<256x4xbf16>, vector<4x128xbf16>, vector<256x128xf32> -> vector<256x128xf32>
    %65 = arith.addf %56, %64 : vector<256x128xf32>
    %c2_i32_57 = arith.constant 2 : i32
    %66 = arith.addi %1, %c2_i32_57 : i32
    %c0_58 = arith.constant 0 : index
    %67 = arith.index_cast %66 : i32 to index
    %c1_59 = arith.constant 1 : index
    %c0_60 = arith.constant 0 : index
    %68 = vector.load %arg3[%c0_58, %67, %c1_59, %c0_60] : memref<1x18x18x4xbf16, #tpu.memory_space<vmem>>, vector<1x16x16x4xbf16>
    %69 = vector.shape_cast %68 : vector<1x16x16x4xbf16> to vector<16x16x4xbf16>
    %70 = vector.shape_cast %69 : vector<16x16x4xbf16> to vector<256x4xbf16>
    %c2_61 = arith.constant 2 : index
    %c1_62 = arith.constant 1 : index
    %c0_63 = arith.constant 0 : index
    %c0_64 = arith.constant 0 : index
    %71 = vector.load %arg4[%c2_61, %c1_62, %c0_63, %c0_64] : memref<3x3x4x128xbf16, #tpu.memory_space<vmem>>, vector<1x1x4x128xbf16>
    %72 = vector.shape_cast %71 : vector<1x1x4x128xbf16> to vector<4x128xbf16>
    %cst_65 = arith.constant dense<0.000000e+00> : vector<256x128xf32>
    %73 = tpu.matmul %70, %72, %cst_65 {dimension_numbers = #tpu.dot_dimension_numbers<[1], [0], [0], [1], [0, 0, 1, 1], [], []>} : vector<256x4xbf16>, vector<4x128xbf16>, vector<256x128xf32> -> vector<256x128xf32>
    %74 = arith.addf %65, %73 : vector<256x128xf32>
    %c2_i32_66 = arith.constant 2 : i32
    %75 = arith.addi %1, %c2_i32_66 : i32
    %c0_67 = arith.constant 0 : index
    %76 = arith.index_cast %75 : i32 to index
    %c2_68 = arith.constant 2 : index
    %c0_69 = arith.constant 0 : index
    %77 = vector.load %arg3[%c0_67, %76, %c2_68, %c0_69] : memref<1x18x18x4xbf16, #tpu.memory_space<vmem>>, vector<1x16x16x4xbf16>
    %78 = vector.shape_cast %77 : vector<1x16x16x4xbf16> to vector<16x16x4xbf16>
    %79 = vector.shape_cast %78 : vector<16x16x4xbf16> to vector<256x4xbf16>
    %c2_70 = arith.constant 2 : index
    %c2_71 = arith.constant 2 : index
    %c0_72 = arith.constant 0 : index
    %c0_73 = arith.constant 0 : index
    %80 = vector.load %arg4[%c2_70, %c2_71, %c0_72, %c0_73] : memref<3x3x4x128xbf16, #tpu.memory_space<vmem>>, vector<1x1x4x128xbf16>
    %81 = vector.shape_cast %80 : vector<1x1x4x128xbf16> to vector<4x128xbf16>
    %cst_74 = arith.constant dense<0.000000e+00> : vector<256x128xf32>
    %82 = tpu.matmul %79, %81, %cst_74 {dimension_numbers = #tpu.dot_dimension_numbers<[1], [0], [0], [1], [0, 0, 1, 1], [], []>} : vector<256x4xbf16>, vector<4x128xbf16>, vector<256x128xf32> -> vector<256x128xf32>
    %83 = arith.addf %74, %82 : vector<256x128xf32>
    %84 = arith.truncf %83 : vector<256x128xf32> to vector<256x128xbf16>
    %c0_75 = arith.constant 0 : index
    %c0_76 = arith.constant 0 : index
    %85 = vector.load %arg5[%c0_75, %c0_76] : memref<256x128xbf16, #tpu.memory_space<vmem>>, vector<256x128xbf16>
    tpu.vector_store %arg5[%c0_75, %c0_76], %84 {strides = array<i32>} : memref<256x128xbf16, #tpu.memory_space<vmem>>, vector<256x128xbf16>,
    %cst_77 = arith.constant dense<0.000000e+00> : vector<128xf32>
    %86 = vector.multi_reduction <add>, %83, %cst_77 [0] : vector<256x128xf32> to vector<128xf32>
    %87 = vector.shape_cast %86 : vector<128xf32> to vector<1x128xf32>
    %88 = arith.mulf %83, %83 : vector<256x128xf32>
    %cst_78 = arith.constant dense<0.000000e+00> : vector<128xf32>
    %89 = vector.multi_reduction <add>, %88, %cst_78 [0] : vector<256x128xf32> to vector<128xf32>
    %90 = vector.shape_cast %89 : vector<128xf32> to vector<1x128xf32>
    %91 = tpu.iota {dimensions = array<i32: 0>} : vector<8x128xi32>
    %c0_i32_79 = arith.constant 0 : i32
    %92 = vector.broadcast %c0_i32_79 : i32 to vector<8x128xi32>
    %93 = arith.cmpi eq, %91, %92 : vector<8x128xi32>
    %c1_i32_80 = arith.constant 1 : i32
    %94 = vector.broadcast %c1_i32_80 : i32 to vector<8x128xi32>
    %95 = arith.cmpi eq, %91, %94 : vector<8x128xi32>
    %cst_81 = arith.constant 0.000000e+00 : f32
    %96 = vector.shape_cast %90 : vector<1x128xf32> to vector<1x128xf32>
    %97 = vector.broadcast %96 : vector<1x128xf32> to vector<8x128xf32>
    %98 = vector.broadcast %cst_81 : f32 to vector<8x128xf32>
    %99 = arith.select %95, %97, %98 : vector<8x128xi1>, vector<8x128xf32>
    %100 = vector.shape_cast %87 : vector<1x128xf32> to vector<1x128xf32>
    %101 = vector.broadcast %100 : vector<1x128xf32> to vector<8x128xf32>
    %102 = arith.select %93, %101, %99 : vector<8x128xi1>, vector<8x128xf32>
    %c0_82 = arith.constant 0 : index
    %c0_83 = arith.constant 0 : index
    %103 = vector.load %arg6[%c0_82, %c0_83] : memref<8x128xf32, #tpu.memory_space<vmem>>, vector<8x128xf32>
    tpu.vector_store %arg6[%c0_82, %c0_83], %102 {strides = array<i32>} : memref<8x128xf32, #tpu.memory_space<vmem>>, vector<8x128xf32>,
    return
  }
  func.func @transform_0(%arg0: i32, %arg1: i32, %arg2: i32) -> (i32, i32, i32, i32) {
    %c0_i32 = arith.constant 0 : i32
    %c0_i32_0 = arith.constant 0 : i32
    %c0_i32_1 = arith.constant 0 : i32
    %c0_i32_2 = arith.constant 0 : i32
    return %arg0, %c0_i32, %c0_i32_0, %c0_i32_1 : i32, i32, i32, i32
  }
  func.func @transform_1(%arg0: i32, %arg1: i32, %arg2: i32) -> (i32, i32, i32, i32) {
    %c0_i32 = arith.constant 0 : i32
    %c0_i32_0 = arith.constant 0 : i32
    %c0_i32_1 = arith.constant 0 : i32
    %c0_i32_2 = arith.constant 0 : i32
    return %c0_i32, %c0_i32_0, %c0_i32_1, %arg1 : i32, i32, i32, i32
  }
  func.func @transform_2(%arg0: i32, %arg1: i32, %arg2: i32) -> (i32, i32) {
    %c1_i32 = arith.constant 1 : i32
    %0 = arith.muli %arg0, %c1_i32 : i32
    %1 = arith.addi %0, %arg2 : i32
    %c0_i32 = arith.constant 0 : i32
    return %1, %arg1 : i32, i32
  }
  func.func @transform_3(%arg0: i32, %arg1: i32, %arg2: i32) -> (i32, i32) {
    %c1_i32 = arith.constant 1 : i32
    %0 = arith.muli %arg0, %c1_i32 : i32
    %1 = arith.addi %0, %arg2 : i32
    %c0_i32 = arith.constant 0 : i32
    return %1, %arg1 : i32, i32
  }
}

</mosaic_0001>

<bundles_post_ra>
// kernel: tpu_custom_call.1
= control target key start
LH: loop header
LB: loop body
LE: loop exit
PB: predicated region body
PF: predicated region fallthrough
CT: control target
= control target key end

     0   :  { %9 = vsyncpa [#allocation3], 0  ;;  %s8864_s0 = inlined_call_operand.vmem [shape: bf16[2,18,18,4], index: 0, kind: input, shape index: {}]   ;;  %s8865_s1 = inlined_call_operand.vmem [shape: bf16[3,3,4,128], index: 1, kind: input, shape index: {}]   ;;  %s8866_s2 = inlined_call_operand.hbm [shape: bf16[512,128], index: 2, kind: output, shape index: {0}]   ;;  %s8867_s3 = inlined_call_operand.hbm [shape: f32[16,128], index: 3, kind: output, shape index: {1}]  }
   0x1   :  { %11 = vsyncpa [#allocation3 + $0x1], 0 }
   0x2   :  { %12 = vsyncpa [#allocation5], 0 }
   0x3   :  { %14 = vsyncpa [#allocation5 + $0x1], 0  ;;  %s6984_s12 = smov 0   ;;  %s6986_s13 = smov 0  }
   0x4   :  { %s6988_s14 = smov 0   ;;  %s6990_s15 = smov 0  }
   0x5   :  { %s6992_s16 = smov 0   ;;  %s6994_s17 = smov 0  }
   0x6 LB: > { %s5241_s18 = sadd.s32 4294967295, %s6958_s17   ;;  %s5242_s19 = sadd.s32 4294967294, %s6958_s17   ;;  %s6958_s17 = sphi %s6994_s17, %s20_s17   ;;  %s6954_s16 = sphi %s6992_s16, %s8941_s16   ;;  %s6950_s15 = sphi %s6990_s15, %s8940_s15   ;;  %s6946_s14 = sphi %s6988_s14, %s8939_s14   ;;  %s6942_s13 = sphi %s6986_s13, %s8938_s13   ;;  %s6938_s12 = sphi %s6984_s12, %s8937_s12  }
   0x7   : > { %s39_s20 = sadd.s32 1, %s6954_s16  ;;  %s102_s21 = sadd.s32 1, %s6946_s14 }
   0x8   : > { %p41_p0 = scmp.ge.s32.totalorder %s39_s20, 2  ;;  %p112_p1 = scmp.ne.s32.totalorder %s6946_s14, %s6942_s13 }
   0x9   : > { %p113_p2 = scmp.eq.s32.totalorder %s5241_s18, 1  ;;  %p118_p3 = scmp.ne.s32.totalorder %s6942_s13, %s6938_s12 }
   0xa   : > { %s8943_s20 = smov (%p41_p0, %s39_s20), 0  ;;  %p119_p5 = scmp.eq.s32.totalorder %s5242_s19, 1 }
   0xb   : > { %p7024_p4 = por %p113_p2, %p112_p1  ;;  %s97_s23 = ssub.s32 %s6954_s16, %s8943_s20 }
   0xc   : > { %p5246_p6 = scmp.ge.s32.totalorder %s6958_s17, 1  ;;  %p100_p7 = scmp.eq.s32.totalorder %s97_s23, 0 }
   0xd   : > { %p7031_p8 = por %p119_p5, %p118_p3  ;;  %p182_p9 = scmp.lt.s32.totalorder %s6958_s17, 3 }
   0xe   : > { %s7037_s25 = scalar_select %p100_p7, %s6946_s14, %s102_s21  }
   0xf   : > { %p183_p10 = pnand %p5246_p6, %p182_p9 }
  0x11   : > { %186 = sbr.rel (%p183_p10) target bundleno = 641 (0x281), region = 28 }
  0x18   : > { %v5250_v0 = vld [vmem:[%s8865_s1 + $0x2] sm:$0x3]  ;;  %vm767_vm0 = vcmask 1041408   ;;  %v5477_v1 = vld [vmem:[%s8865_s1 + $0x8] sm:$0x3]  ;;  %p215_p11 = scmp.lt.s32.totalorder %s6950_s15, 1 }
  0x19   : > { %6670 = vmatprep.subr.msk.bf16.mxu1 %vm767_vm0, %v5250_v0  ;;  %6674 = vmatprep.subr.msk.bf16.mxu0 %vm767_vm0, %v5477_v1  ;;  %v769_v2 = vsel %vm767_vm0, %v5250_v0, 0  ;;  %v7050_v3 = vsel %vm767_vm0, %v5477_v1, 0  ;;  %v264_v4 = vld [vmem:[%s8865_s1] sm:$0x3]  ;;  %v5542_v5 = vld [vmem:[%s8865_s1 + $0xa] sm:$0x3] }
  0x1a   : > { %8883 = vst [vmem:[#allocation8_spill] sm:$0xff] %v7050_v3  ;;  %6107 = vmatpush3.bf16.msra.mxu1 %v769_v2  ;;  %6243 = vmatpush3.bf16.msra.mxu0 %v7050_v3  ;;  %s216_s30 = scalar_select %p215_p11, %s6950_s15, 1  ;;  %vm281_vm1 = vsmask.f32 3328  ;;  %vm282_vm2 = vsmask.f32 7440 }
  0x1b   : > { %6671 = vmatprep.subr.msk.bf16.mxu1 %vm767_vm0, %v264_v4  ;;  %6676 = vmatprep.subr.msk.bf16.mxu0 %vm767_vm0, %v5542_v5  ;;  %vm718_vm3 = vcmask 31744   ;;  %v7078_v17 = vsel %vm767_vm0, %v264_v4, 0  ;;  %v7084_v26 = vld [vmem:[%s8865_s1 + $0xc] sm:$0x3]  ;;  %vm7091_vm4 = vmor %vm281_vm1, %vm282_vm2  ;;  %v7097_v37 = vsel %vm767_vm0, %v5542_v5, 0  ;;  %vm1272_vm5 = vcmask 1042432  }
  0x1c   : > { %s6680_s8 = smul.u32 216, %s216_s30  ;;  %v7101_v41 = vsel %vm767_vm0, %v7084_v26, 0  ;;  %vm1273_vm6 = vcmask 1046532   ;;  %s8752_s9 = sand.u32 1, %s6942_s13  }
  0x1d   : > { %vm7317_vm7 = vmor %vm1272_vm5, %vm1273_vm6  ;;  %s5247_s10 = sshll.u32 %s8752_s9, 7  ;;  %s5857_s18 = sshll.u32 %s6950_s15, 11 }
  0x1e   : > { %s7065_s11 = scalar_lea.vmem %s8864_s0, %s6680_s8  ;;  %s8781_s26 = scalar_lea.hbm %s8866_s2, %s5857_s18 }
  0x1f   : > { %v232_v6 = vld [vmem:[%s7065_s11] sm:$0xf]  ;;  %v233_v7 = vld [vmem:[%s7065_s11 + $0x4] sm:$0xf]  ;;  %v265_v8 = vld [vmem:[%s7065_s11 + $0x8] sm:$0x1] }
  0x20   : > { %v285_v9 = vshrl.u32 %v232_v6, 16  ;;  %v288_v10 = vshll.u32 %v232_v6, 16  ;;  %v294_v11 = vshll.u32 %v233_v7, 16  ;;  %v298_v12 = vshrl.u32 %v233_v7, 16  ;;  %v5429_v13 = vld [vmem:[%s7065_s11 + $0xc] sm:$0xf] }
  0x21   : > { %v304_v14 = vshll.u32 %v265_v8, 16  ;;  %v7072_v15 = vld [vmem:[%s7065_s11 + $0x10] sm:$0xf]  ;;  %v7075_v16 = vld [vmem:[%s7065_s11 + $0x14] sm:$0x1]  ;;  %v2092_v23 = vshrl.u32 %v5429_v13, 16 }
  0x22   : > { %v287_v18 = vrot.slane %v285_v9, 4  ;;  %v290_v19 = vrot.slane %v288_v10, 5  ;;  %v296_v20 = vrot.slane %v294_v11, 5  ;;  %v300_v21 = vrot.slane %v298_v12, 4  ;;  %v234_v31 = vld [vmem:[%s7065_s11 + $0xc] sm:$0xf] }
  0x23   : > { %v306_v22 = vrot.slane %v304_v14, 5  ;;  %v2095_v24 = vshll.u32 %v5429_v13, 16  ;;  %v2101_v25 = vshll.u32 %v7072_v15, 16  ;;  %v2105_v29 = vshrl.u32 %v7072_v15, 16  ;;  %v235_v36 = vld [vmem:[%s7065_s11 + $0x10] sm:$0xf] }
  0x24   : > { %v291_v27 = vor.u32 %v290_v19, %v287_v18  ;;  %v301_v28 = vor.u32 %v300_v21, %v296_v20  ;;  %v2111_v30 = vshll.u32 %v7075_v16, 16  ;;  %v2094_v33 = vrot.slane %v2092_v23, 4  ;;  %v266_v44 = vld [vmem:[%s7065_s11 + $0x14] sm:$0x1]  ;;  %v5432_v55 = vld [vmem:[%s7065_s11 + $0x18] sm:$0xf] }
  0x25   : > { %v2097_v34 = vrot.slane %v2095_v24, 5  ;;  %v2103_v35 = vrot.slane %v2101_v25, 5  ;;  %v2107_v40 = vrot.slane %v2105_v29, 4  ;;  %v309_v45 = vshrl.u32 %v234_v31, 16  ;;  %v7110_v60 = vld [vmem:[%s7065_s11 + $0x1c] sm:$0xf] }
  0x26   : > { %v292_v38 = vrot.slane %v291_v27, 4  ;;  %v302_v39 = vrot.slane %v301_v28, 4  ;;  %v2113_v43 = vrot.slane %v2111_v30, 5  ;;  %v312_v46 = vshll.u32 %v234_v31, 16  ;;  %v7118_v1 = vld [vmem:[%s7065_s11 + $0x20] sm:$0x1] }
  0x27   : > { %v2098_v42 = vor.u32 %v2097_v34, %v2094_v33  ;;  %v2108_v49 = vor.u32 %v2107_v40, %v2103_v35  ;;  %v318_v50 = vshll.u32 %v235_v36, 16  ;;  %v311_v53 = vrot.slane %v309_v45, 4  ;;  %v236_v18 = vld [vmem:[%s7065_s11 + $0x18] sm:$0xf]  ;;  %v237_v23 = vld [vmem:[%s7065_s11 + $0x1c] sm:$0xf] }
  0x28   : > { %v297_v47 = vsel %vm7091_vm4, %v292_v38, %v296_v20  ;;  %v307_v48 = vsel %vm7091_vm4, %v302_v39, %v306_v22  ;;  %v314_v54 = vrot.slane %v312_v46, 5  ;;  %v322_v58 = vshrl.u32 %v235_v36, 16  ;;  %v267_v31 = vld [vmem:[%s7065_s11 + $0x20] sm:$0x1]  ;;  %v5435_v40 = vld [vmem:[%s7065_s11 + $0x24] sm:$0xf] }
  0x29   : > { %v5251_v51 = vcombine.low %v297_v47, %v307_v48  ;;  %v2099_v52 = vrot.slane %v2098_v42, 4  ;;  %v2109_v56 = vrot.slane %v2108_v49, 4  ;;  %v320_v57 = vrot.slane %v318_v50, 5  ;;  %v7141_v46 = vld [vmem:[%s7065_s11 + $0x28] sm:$0xf]  ;;  %s5071_s27 = scalar_lea.sflag [#allocation3], %s8752_s9 }
  0x2a   : > { %v328_v59 = vshll.u32 %v266_v44, 16  ;;  %v2835_v62 = vrot.slane %v7072_v15, 5  ;;  %v2838_v63 = vrot.slane %v7075_v16, 5  ;;  %v315_v0 = vor.u32 %v314_v54, %v311_v53  ;;  %v7150_v54 = vld [vmem:[%s7065_s11 + $0x2c] sm:$0x1]  ;;  %s6960_s29 = smov [#allocation2]  }
  0x2b   : > { %6108 = vmatprep.mubr.msk.bf16.mxu1 %vm718_vm3, %v5251_v51  ;;  %v2104_v61 = vsel %vm7091_vm4, %v2099_v52, %v2103_v35  ;;  %v2114_v2 = vsel %vm7091_vm4, %v2109_v56, %v2113_v43  ;;  %v324_v4 = vrot.slane %v322_v58, 4  ;;  %v2116_v6 = vshrl.u32 %v5432_v55, 16  ;;  %v5331_v51 = vld [vmem:[%s8865_s1 + $0x4] sm:$0x3]  ;;  %v7350_v16 = vld [vmem:[%s7065_s11 + $0x7c] sm:$0xf] }
  0x2c   : > { %v330_v5 = vrot.slane %v328_v59, 5  ;;  %v5478_v7 = vcombine.low %v2104_v61, %v2114_v2  ;;  %v316_v8 = vrot.slane %v315_v0, 4  ;;  %v2119_v9 = vshll.u32 %v5432_v55, 16  ;;  %v238_v0 = vld [vmem:[%s7065_s11 + $0x24] sm:$0xf]  ;;  %s6852_s30 = sshll.u32 %s6960_s29, 4  ;;  %s6853_s30 = int_to_ptr.vmem [resolvable:$false] %s6852_s30 }
  0x2d   : > { %v2125_v10 = vshll.u32 %v7110_v60, 16  ;;  %v325_v11 = vor.u32 %v324_v4, %v320_v57  ;;  %v2118_v12 = vrot.slane %v2116_v6, 4  ;;  %v2129_v13 = vshrl.u32 %v7110_v60, 16  ;;  %s6854_s4 = scalar_lea.vmem %s6853_s30, 4096 }
  0x2e   : > { %v2135_v14 = vshll.u32 %v7118_v1, 16  ;;  %6244 = vmatprep.mubr.msk.bf16.mxu0 %vm718_vm3, %v5478_v7  ;;  %v321_v19 = vsel %vm7091_vm4, %v316_v8, %v320_v57  ;;  %v2121_v20 = vrot.slane %v2119_v9, 5  ;;  %v2842_v22 = vrot.slane %v7110_v60, 5  ;;  %v239_v7 = vld [vmem:[%s7065_s11 + $0x28] sm:$0xf] }
  0x2f   : > { %v2127_v21 = vrot.slane %v2125_v10, 5  ;;  %v326_v24 = vrot.slane %v325_v11, 4  ;;  %v2131_v25 = vrot.slane %v2129_v13, 4  ;;  %v2845_v28 = vrot.slane %v7118_v1, 5  ;;  %v268_v13 = vld [vmem:[%s7065_s11 + $0x2c] sm:$0x1] }
  0x30   : > { %v2137_v27 = vrot.slane %v2135_v14, 5  ;;  %v2122_v29 = vor.u32 %v2121_v20, %v2118_v12  ;;  %v7134_v30 = vrot.slane %v2842_v22, 4  ;;  %v333_v33 = vshrl.u32 %v236_v18, 16 }
  0x31   : > { %v336_v34 = vshll.u32 %v236_v18, 16  ;;  %v331_v35 = vsel %vm7091_vm4, %v326_v24, %v330_v5  ;;  %v2132_v36 = vor.u32 %v2131_v25, %v2127_v21  ;;  %v342_v38 = vshll.u32 %v237_v23, 16  ;;  %v5438_v24 = vld [vmem:[%s7065_s11 + $0x30] sm:$0xf] }
  0x32   : > { %v346_v39 = vshrl.u32 %v237_v23, 16  ;;  %v5252_v42 = vcombine.low %v321_v19, %v331_v35  ;;  %v2123_v43 = vrot.slane %v2122_v29, 4  ;;  %v335_v44 = vrot.slane %v333_v33, 4  ;;  %v7170_v33 = vld [vmem:[%s7065_s11 + $0x34] sm:$0xf] }
  0x33   : > { %v338_v45 = vrot.slane %v336_v34, 5  ;;  %v2133_v47 = vrot.slane %v2132_v36, 4  ;;  %v344_v48 = vrot.slane %v342_v38, 5  ;;  %v352_v50 = vshll.u32 %v267_v31, 16 }
  0x34   : > { %v348_v49 = vrot.slane %v346_v39, 4  ;;  %6109 = vmatmul.mubr.msk.bf16.vlgmr.msra.gmra.mrb[0].mxu1 %vm718_vm3, %v5252_v42  ;;  %v2128_v52 = vsel %vm7091_vm4, %v2123_v43, %v2127_v21  ;;  %v2140_v55 = vshrl.u32 %v5435_v40, 16  ;;  %v2143_v56 = vshll.u32 %v5435_v40, 16  ;;  %v7178_v40 = vld [vmem:[%s7065_s11 + $0x38] sm:$0x1] }
  0x35   : > { %v339_v53 = vor.u32 %v338_v45, %v335_v44  ;;  %6141 = vmatpush3.bf16.msra.mxu1 %v7078_v17  ;;  %v2138_v57 = vsel %vm7091_vm4, %v2133_v47, %v2137_v27  ;;  %v354_v59 = vrot.slane %v352_v50, 5  ;;  %v2149_v61 = vshll.u32 %v7141_v46, 16 }
  0x36   : > { %v349_v58 = vor.u32 %v348_v49, %v344_v48  ;;  %v5479_v2 = vcombine.low %v2128_v52, %v2138_v57  ;;  %v2142_v5 = vrot.slane %v2140_v55, 4  ;;  %v2145_v6 = vrot.slane %v2143_v56, 5  ;;  %6672 = vmatprep.subr.msk.bf16.mxu1 %vm767_vm0, %v5331_v51  ;;  %v240_v52 = vld [vmem:[%s7065_s11 + $0x30] sm:$0xf] }
  0x37   : > { %v340_v4 = vrot.slane %v339_v53, 4  ;;  %v2151_v9 = vrot.slane %v2149_v61, 5  ;;  %v2153_v17 = vshrl.u32 %v7141_v46, 16  ;;  %v2159_v10 = vshll.u32 %v7150_v54, 16 }
  0x38   : > { %v350_v8 = vrot.slane %v349_v58, 4  ;;  %6245 = vmatmul.mubr.msk.bf16.vlgmr.msra.gmra.mrb[0].mxu0 %vm718_vm3, %v5479_v2  ;;  %v2146_v12 = vor.u32 %v2145_v6, %v2142_v5  ;;  %v357_v14 = vshrl.u32 %v238_v0, 16  ;;  %v360_v18 = vshll.u32 %v238_v0, 16  ;;  %v241_v58 = vld [vmem:[%s7065_s11 + $0x34] sm:$0xf] }
  0x39   : > { %v345_v11 = vsel %vm7091_vm4, %v340_v4, %v344_v48  ;;  %6277 = vmatpush3.bf16.msra.mxu0 %v7097_v37  ;;  %v2155_v20 = vrot.slane %v2153_v17, 4  ;;  %v2161_v21 = vrot.slane %v2159_v10, 5  ;;  %v366_v23 = vshll.u32 %v239_v7, 16  ;;  %v269_v4 = vld [vmem:[%s7065_s11 + $0x38] sm:$0x1] }
  0x3a   : > { %v355_v19 = vsel %vm7091_vm4, %v350_v8, %v354_v59  ;;  %v2147_v27 = vrot.slane %v2146_v12, 4  ;;  %v359_v29 = vrot.slane %v357_v14, 4  ;;  %v362_v31 = vrot.slane %v360_v18, 5  ;;  %6677 = vmatprep.subr.msk.bf16.mxu0 %vm767_vm0, %v7084_v26  ;;  %v5441_v12 = vld [vmem:[%s7065_s11 + $0x3c] sm:$0xf] }
  0x3b   : > { %v5253_v25 = vcombine.low %v345_v11, %v355_v19  ;;  %v2156_v34 = vor.u32 %v2155_v20, %v2151_v9  ;;  %v368_v35 = vrot.slane %v366_v23, 5  ;;  %v370_v37 = vshrl.u32 %v239_v7, 16  ;;  %v7195_v20 = vld [vmem:[%s7065_s11 + $0x40] sm:$0xf] }
  0x3c   : > { %v376_v36 = vshll.u32 %v268_v13, 16  ;;  %v2152_v38 = vsel %vm7091_vm4, %v2147_v27, %v2151_v9  ;;  %v363_v39 = vor.u32 %v362_v31, %v359_v29  ;;  %v2164_v42 = vshrl.u32 %v5438_v24, 16 }
  0x3d   : > { %6112 = vmatprep.mubr.msk.bf16.mxu1 %vm718_vm3, %v5253_v25  ;;  %v2167_v43 = vshll.u32 %v5438_v24, 16  ;;  %v2157_v44 = vrot.slane %v2156_v34, 4  ;;  %v372_v45 = vrot.slane %v370_v37, 4  ;;  %v2173_v26 = vshll.u32 %v7170_v33, 16  ;;  %v7200_v34 = vld [vmem:[%s7065_s11 + $0x44] sm:$0x1] }
  0x3e   : > { %v378_v47 = vrot.slane %v376_v36, 5  ;;  %v364_v48 = vrot.slane %v363_v39, 4  ;;  %v2166_v49 = vrot.slane %v2164_v42, 4  ;;  %v2177_v51 = vshrl.u32 %v7170_v33, 16  ;;  %v242_v42 = vld [vmem:[%s7065_s11 + $0x3c] sm:$0xf] }
  0x3f   : > { %v2169_v50 = vrot.slane %v2167_v43, 5  ;;  %v2162_v53 = vsel %vm7091_vm4, %v2157_v44, %v2161_v21  ;;  %v373_v55 = vor.u32 %v372_v45, %v368_v35  ;;  %v2175_v56 = vrot.slane %v2173_v26, 5  ;;  %v243_v26 = vld [vmem:[%s7065_s11 + $0x40] sm:$0xf] }
  0x40   : > { %v2183_v57 = vshll.u32 %v7178_v40, 16  ;;  %v5480_v59 = vcombine.low %v2152_v38, %v2162_v53  ;;  %v369_v61 = vsel %vm7091_vm4, %v364_v48, %v368_v35  ;;  %v2179_v2 = vrot.slane %v2177_v51, 4 }
  0x41   : > { %v2170_v0 = vor.u32 %v2169_v50, %v2166_v49  ;;  %v374_v5 = vrot.slane %v373_v55, 4  ;;  %v381_v7 = vshrl.u32 %v240_v52, 16  ;;  %v384_v8 = vshll.u32 %v240_v52, 16 }
  0x42   : > { %v2185_v6 = vrot.slane %v2183_v57, 5  ;;  %6248 = vmatprep.mubr.msk.bf16.mxu0 %vm718_vm3, %v5480_v59  ;;  %v2180_v17 = vor.u32 %v2179_v2, %v2175_v56  ;;  %v390_v10 = vshll.u32 %v241_v58, 16  ;;  %v394_v11 = vshrl.u32 %v241_v58, 16  ;;  %v5444_v2 = vld [vmem:[%s7065_s11 + $0x48] sm:$0xf] }
  0x43   : > { %v2171_v9 = vrot.slane %v2170_v0, 4  ;;  %v379_v13 = vsel %vm7091_vm4, %v374_v5, %v378_v47  ;;  %v383_v14 = vrot.slane %v381_v7, 4  ;;  %v386_v18 = vrot.slane %v384_v8, 5  ;;  %v7218_v8 = vld [vmem:[%s7065_s11 + $0x4c] sm:$0xf] }
  0x44   : > { %v400_v19 = vshll.u32 %v269_v4, 16  ;;  %v5254_v21 = vcombine.low %v369_v61, %v379_v13  ;;  %v2181_v24 = vrot.slane %v2180_v17, 4  ;;  %v392_v25 = vrot.slane %v390_v10, 5  ;;  %v270_v61 = vld [vmem:[%s7065_s11 + $0x44] sm:$0x1] }
  0x45   : > { %v2176_v23 = vsel %vm7091_vm4, %v2171_v9, %v2175_v56  ;;  %v387_v27 = vor.u32 %v386_v18, %v383_v14  ;;  %v396_v29 = vrot.slane %v394_v11, 4  ;;  %v2188_v35 = vshrl.u32 %v5441_v12, 16 }
  0x46   : > { %v402_v31 = vrot.slane %v400_v19, 5  ;;  %6113 = vmatmul.mubr.msk.bf16.gmra.mrb[4].mxu1 %vm718_vm3, %v5254_v21  ;;  %v2186_v37 = vsel %vm7091_vm4, %v2181_v24, %v2185_v6  ;;  %v2191_v36 = vshll.u32 %v5441_v12, 16  ;;  %v2197_v38 = vshll.u32 %v7195_v20, 16 }
  0x47   : > { %v2201_v39 = vshrl.u32 %v7195_v20, 16  ;;  %v5481_v43 = vcombine.low %v2176_v23, %v2186_v37  ;;  %v388_v44 = vrot.slane %v387_v27, 4  ;;  %v397_v45 = vor.u32 %v396_v29, %v392_v25  ;;  %v7226_v23 = vld [vmem:[%s7065_s11 + $0x50] sm:$0x1]  ;;  %v7230_v27 = vld [vmem:[%s7065_s11 + $0x48] sm:$0xf] }
  0x48   : > { %v2190_v47 = vrot.slane %v2188_v35, 4  ;;  %v2193_v48 = vrot.slane %v2191_v36, 5  ;;  %v2199_v49 = vrot.slane %v2197_v38, 5  ;;  %v2207_v51 = vshll.u32 %v7200_v34, 16  ;;  %v7233_v36 = vld [vmem:[%s7065_s11 + $0x4c] sm:$0xf] }
  0x49   : > { %v2203_v50 = vrot.slane %v2201_v39, 4  ;;  %6249 = vmatmul.mubr.msk.bf16.gmra.mrb[4].mxu0 %vm718_vm3, %v5481_v43  ;;  %v393_v52 = vsel %vm7091_vm4, %v388_v44, %v392_v25  ;;  %v398_v53 = vrot.slane %v397_v45, 4  ;;  %v405_v55 = vshrl.u32 %v242_v42, 16 }
  0x4a   : > { %v408_v56 = vshll.u32 %v242_v42, 16  ;;  %v2194_v57 = vor.u32 %v2193_v48, %v2190_v47  ;;  %v2209_v59 = vrot.slane %v2207_v51, 5  ;;  %v414_v0 = vshll.u32 %v243_v26, 16 }
  0x4b   : > { %v2204_v58 = vor.u32 %v2203_v50, %v2199_v49  ;;  %v403_v4 = vsel %vm7091_vm4, %v398_v53, %v402_v31  ;;  %v407_v5 = vrot.slane %v405_v55, 4  ;;  %v418_v7 = vshrl.u32 %v243_v26, 16  ;;  %v271_v26 = vld [vmem:[%s7065_s11 + $0x50] sm:$0x1]  ;;  %v5447_v53 = vld [vmem:[%s7065_s11 + $0x54] sm:$0xf] }
  0x4c   : > { %v410_v6 = vrot.slane %v408_v56, 5  ;;  %v5255_v9 = vcombine.low %v393_v52, %v403_v4  ;;  %v2195_v17 = vrot.slane %v2194_v57, 4  ;;  %v416_v11 = vrot.slane %v414_v0, 5  ;;  %v7249_v4 = vld [vmem:[%s7065_s11 + $0x58] sm:$0xf] }
  0x4d   : > { %v2205_v10 = vrot.slane %v2204_v58, 4  ;;  %v420_v13 = vrot.slane %v418_v7, 4  ;;  %v424_v14 = vshll.u32 %v270_v61, 16  ;;  %v2212_v18 = vshrl.u32 %v5444_v2, 16 }
  0x4e   : > { %v411_v12 = vor.u32 %v410_v6, %v407_v5  ;;  %6116 = vmatprep.mubr.msk.bf16.mxu1 %vm718_vm3, %v5255_v9  ;;  %v2200_v19 = vsel %vm7091_vm4, %v2195_v17, %v2199_v49  ;;  %v2215_v24 = vshll.u32 %v5444_v2, 16  ;;  %v2221_v25 = vshll.u32 %v7218_v8, 16 }
  0x4f   : > { %v2210_v21 = vsel %vm7091_vm4, %v2205_v10, %v2209_v59  ;;  %v421_v35 = vor.u32 %v420_v13, %v416_v11  ;;  %v426_v37 = vrot.slane %v424_v14, 5  ;;  %v2214_v38 = vrot.slane %v2212_v18, 4 }
  0x50   : > { %v5482_v29 = vcombine.low %v2200_v19, %v2210_v21  ;;  %v412_v31 = vrot.slane %v411_v12, 4  ;;  %v2217_v39 = vrot.slane %v2215_v24, 5  ;;  %v2223_v42 = vrot.slane %v2221_v25, 5  ;;  %v7255_v12 = vld [vmem:[%s7065_s11 + $0x5c] sm:$0x1] }
  0x51   : > { %v2225_v43 = vshrl.u32 %v7218_v8, 16  ;;  %v422_v45 = vrot.slane %v421_v35, 4  ;;  %v2231_v47 = vshll.u32 %v7226_v23, 16  ;;  %v429_v48 = vshrl.u32 %v7230_v27, 16  ;;  %v7259_v24 = vld [vmem:[%s7065_s11 + $0x54] sm:$0xf] }
  0x52   : > { %6252 = vmatprep.mubr.msk.bf16.mxu0 %vm718_vm3, %v5482_v29  ;;  %v417_v44 = vsel %vm7091_vm4, %v412_v31, %v416_v11  ;;  %v2218_v49 = vor.u32 %v2217_v39, %v2214_v38  ;;  %v432_v51 = vshll.u32 %v7230_v27, 16  ;;  %v438_v52 = vshll.u32 %v7233_v36, 16 }
  0x53   : > { %v2227_v50 = vrot.slane %v2225_v43, 4  ;;  %v427_v55 = vsel %vm7091_vm4, %v422_v45, %v426_v37  ;;  %v2233_v56 = vrot.slane %v2231_v47, 5  ;;  %v431_v57 = vrot.slane %v429_v48, 4  ;;  %v7265_v37 = vld [vmem:[%s7065_s11 + $0x58] sm:$0xf] }
  0x54   : > { %v442_v58 = vshrl.u32 %v7233_v36, 16  ;;  %v5256_v59 = vcombine.low %v417_v44, %v427_v55  ;;  %v2219_v61 = vrot.slane %v2218_v49, 4  ;;  %v434_v2 = vrot.slane %v432_v51, 5 }
  0x55   : > { %v2228_v0 = vor.u32 %v2227_v50, %v2223_v42  ;;  %v440_v5 = vrot.slane %v438_v52, 5  ;;  %v448_v7 = vshll.u32 %v271_v26, 16  ;;  %v2236_v9 = vshrl.u32 %v5447_v53, 16  ;;  %v272_v26 = vld [vmem:[%s7065_s11 + $0x5c] sm:$0x1] }
  0x56   : > { %v444_v6 = vrot.slane %v442_v58, 4  ;;  %6117 = vmatmul.mubr.msk.bf16.gmra.mrb[8].mxu1 %vm718_vm3, %v5256_v59  ;;  %v2224_v17 = vsel %vm7091_vm4, %v2219_v61, %v2223_v42  ;;  %v435_v11 = vor.u32 %v434_v2, %v431_v57  ;;  %v2239_v13 = vshll.u32 %v5447_v53, 16  ;;  %v5450_v53 = vld [vmem:[%s7065_s11 + $0x60] sm:$0xf]  ;;  %v7279_v59 = vld [vmem:[%s7065_s11 + $0x64] sm:$0xf] }
  0x57   : > { %v2229_v10 = vrot.slane %v2228_v0, 4  ;;  %v450_v18 = vrot.slane %v448_v7, 5  ;;  %v2238_v19 = vrot.slane %v2236_v9, 4  ;;  %v2245_v21 = vshll.u32 %v7249_v4, 16  ;;  %v7286_v9 = vld [vmem:[%s7065_s11 + $0x68] sm:$0x1] }
  0x58   : > { %v445_v14 = vor.u32 %v444_v6, %v440_v5  ;;  %v436_v29 = vrot.slane %v435_v11, 4  ;;  %v2241_v31 = vrot.slane %v2239_v13, 5  ;;  %v2249_v35 = vshrl.u32 %v7249_v4, 16 }
  0x59   : > { %v2234_v25 = vsel %vm7091_vm4, %v2229_v10, %v2233_v56  ;;  %v2247_v42 = vrot.slane %v2245_v21, 5  ;;  %v2255_v43 = vshll.u32 %v7255_v12, 16  ;;  %v453_v48 = vshrl.u32 %v7259_v24, 16 }
  0x5a   : > { %v5483_v38 = vcombine.low %v2224_v17, %v2234_v25  ;;  %v446_v39 = vrot.slane %v445_v14, 4  ;;  %v441_v44 = vsel %vm7091_vm4, %v436_v29, %v440_v5  ;;  %v2242_v45 = vor.u32 %v2241_v31, %v2238_v19  ;;  %v7290_v19 = vld [vmem:[%s7065_s11 + $0x60] sm:$0xf] }
  0x5b   : > { %v2251_v47 = vrot.slane %v2249_v35, 4  ;;  %v2257_v50 = vrot.slane %v2255_v43, 5  ;;  %v456_v51 = vshll.u32 %v7259_v24, 16  ;;  %v462_v52 = vshll.u32 %v7265_v37, 16  ;;  %v7296_v35 = vld [vmem:[%s7065_s11 + $0x64] sm:$0xf] }
  0x5c   : > { %6253 = vmatmul.mubr.msk.bf16.gmra.mrb[8].mxu0 %vm718_vm3, %v5483_v38  ;;  %v451_v49 = vsel %vm7091_vm4, %v446_v39, %v450_v18  ;;  %v2243_v56 = vrot.slane %v2242_v45, 4  ;;  %v455_v58 = vrot.slane %v453_v48, 4  ;;  %v466_v2 = vshrl.u32 %v7265_v37, 16 }
  0x5d   : > { %v5257_v55 = vcombine.low %v441_v44, %v451_v49  ;;  %v2252_v57 = vor.u32 %v2251_v47, %v2247_v42  ;;  %v458_v61 = vrot.slane %v456_v51, 5  ;;  %v464_v0 = vrot.slane %v462_v52, 5 }
  0x5e   : > { %v472_v5 = vshll.u32 %v272_v26, 16  ;;  %v2248_v6 = vsel %vm7091_vm4, %v2243_v56, %v2247_v42  ;;  %v2260_v17 = vshrl.u32 %v5450_v53, 16  ;;  %v2263_v10 = vshll.u32 %v5450_v53, 16 }
  0x5f   : > { %6120 = vmatprep.mubr.msk.bf16.mxu1 %vm718_vm3, %v5257_v55  ;;  %v2253_v7 = vrot.slane %v2252_v57, 4  ;;  %v459_v11 = vor.u32 %v458_v61, %v455_v58  ;;  %v468_v13 = vrot.slane %v466_v2, 4  ;;  %v2269_v18 = vshll.u32 %v7279_v59, 16  ;;  %v5510_v58 = vld [vmem:[%s7065_s11 + $0xc] sm:$0xe] }
  0x60   : > { %v474_v14 = vrot.slane %v472_v5, 5  ;;  %v2262_v25 = vrot.slane %v2260_v17, 4  ;;  %v2265_v29 = vrot.slane %v2263_v10, 5  ;;  %v2273_v31 = vshrl.u32 %v7279_v59, 16 }
  0x61   : > { %v2258_v21 = vsel %vm7091_vm4, %v2253_v7, %v2257_v50  ;;  %v460_v39 = vrot.slane %v459_v11, 4  ;;  %v469_v42 = vor.u32 %v468_v13, %v464_v0  ;;  %v2271_v43 = vrot.slane %v2269_v18, 5  ;;  %v273_v50 = vld [vmem:[%s7065_s11 + $0x68] sm:$0x1] }
  0x62   : > { %v5484_v38 = vcombine.low %v2248_v6, %v2258_v21  ;;  %v2266_v44 = vor.u32 %v2265_v29, %v2262_v25  ;;  %v2275_v45 = vrot.slane %v2273_v31, 4  ;;  %v2279_v47 = vshll.u32 %v7286_v9, 16  ;;  %v7324_v29 = vld [vmem:[%s7065_s11 + $0x70] sm:$0xf] }
  0x63   : > { %v477_v26 = vshrl.u32 %v7290_v19, 16  ;;  %v465_v48 = vsel %vm7091_vm4, %v460_v39, %v464_v0  ;;  %v470_v49 = vrot.slane %v469_v42, 4  ;;  %v480_v51 = vshll.u32 %v7290_v19, 16  ;;  %v7311_v0 = vld [vmem:[%s7065_s11 + $0x6c] sm:$0xf] }
  0x64   : > { %6256 = vmatprep.mubr.msk.bf16.mxu0 %vm718_vm3, %v5484_v38  ;;  %v486_v52 = vshll.u32 %v7296_v35, 16  ;;  %v2267_v53 = vrot.slane %v2266_v44, 4  ;;  %v2276_v55 = vor.u32 %v2275_v45, %v2271_v43  ;;  %v2281_v56 = vrot.slane %v2279_v47, 5 }
  0x65   : > { %v479_v57 = vrot.slane %v477_v26, 4  ;;  %v475_v61 = vsel %vm7091_vm4, %v470_v49, %v474_v14  ;;  %v482_v2 = vrot.slane %v480_v51, 5  ;;  %v490_v6 = vshrl.u32 %v7296_v35, 16  ;;  %v274_v26 = vld [vmem:[%s7065_s11 + $0x74] sm:$0x1] }
  0x66   : > { %v488_v5 = vrot.slane %v486_v52, 5  ;;  %v5258_v7 = vcombine.low %v465_v48, %v475_v61  ;;  %v2272_v17 = vsel %vm7091_vm4, %v2267_v53, %v2271_v43  ;;  %v2277_v10 = vrot.slane %v2276_v55, 4  ;;  %v5511_v48 = vld [vmem:[%s7065_s11 + $0x18] sm:$0xe] }
  0x67   : > { %v496_v11 = vshll.u32 %v273_v50, 16  ;;  %v483_v14 = vor.u32 %v482_v2, %v479_v57  ;;  %v492_v18 = vrot.slane %v490_v6, 4  ;;  %v5526_v21 = vrot.slane %v5510_v58, 9  ;;  %v7343_v53 = vld [vmem:[%s7065_s11 + $0x78] sm:$0xf] }
  0x68   : > { %v2837_v25 = vrot.slane %v2835_v62, 4  ;;  %6121 = vmatmul.mubr.msk.bf16.gmra.mrb[12].mxu1 %vm718_vm3, %v5258_v7  ;;  %v2282_v31 = vsel %vm7091_vm4, %v2277_v10, %v2281_v56  ;;  %v501_v39 = vshrl.u32 %v7311_v0, 16  ;;  %v504_v42 = vshll.u32 %v7311_v0, 16  ;;  %v275_v57 = vld [vmem:[%s7065_s11 + $0x80] sm:$0x1] }
  0x69   : > { %v498_v38 = vrot.slane %v496_v11, 5  ;;  %v5485_v43 = vcombine.low %v2272_v17, %v2282_v31  ;;  %v484_v44 = vrot.slane %v483_v14, 4  ;;  %v493_v45 = vor.u32 %v492_v18, %v488_v5  ;;  %v5512_v10 = vld [vmem:[%s7065_s11 + $0x24] sm:$0xe] }
  0x6a   : > { %v2836_v47 = vsel %vm7317_vm7, %v5526_v21, %v2835_v62  ;;  %v2839_v49 = vsel %vm7317_vm7, %v2837_v25, %v2838_v63  ;;  %v503_v50 = vrot.slane %v501_v39, 4  ;;  %v506_v51 = vrot.slane %v504_v42, 5  ;;  %v7369_v39 = vld [vmem:[%s7065_s11 + $0x84] sm:$0xf] }
  0x6b   : > { %v510_v52 = vshll.u32 %v7324_v29, 16  ;;  %6257 = vmatmul.mubr.msk.bf16.gmra.mrb[12].mxu0 %vm718_vm3, %v5485_v43  ;;  %v489_v15 = vsel %vm7091_vm4, %v484_v44, %v488_v5  ;;  %v494_v62 = vrot.slane %v493_v45, 4  ;;  %v5543_v55 = vcombine.low %v2836_v47, %v2839_v49  ;;  %v7377_v43 = vld [vmem:[%s7065_s11 + $0x88] sm:$0xf] }
  0x6c   : > { %v514_v56 = vshrl.u32 %v7324_v29, 16  ;;  %v507_v63 = vor.u32 %v506_v51, %v503_v50  ;;  %v520_v61 = vshll.u32 %v274_v26, 16  ;;  %v5527_v2 = vrot.slane %v5511_v48, 9 }
  0x6d   : > { %v512_v58 = vrot.slane %v510_v52, 5  ;;  %v499_v6 = vsel %vm7091_vm4, %v494_v62, %v498_v38  ;;  %6278 = vmatprep.mubr.msk.bf16.mxu0 %vm718_vm3, %v5543_v55  ;;  %v2846_v5 = vsel %vm7317_vm7, %v7134_v30, %v2845_v28  ;;  %v525_v17 = vshrl.u32 %v7343_v53, 16  ;;  %v276_v52 = vld [vmem:[%s7065_s11 + $0x8c] sm:$0x1] }
  0x6e   : > { %v516_v7 = vrot.slane %v514_v56, 4  ;;  %v5259_v11 = vcombine.low %v489_v15, %v499_v6  ;;  %v508_v14 = vrot.slane %v507_v63, 4  ;;  %v522_v18 = vrot.slane %v520_v61, 5 }
  0x6f   : > { %v2843_v21 = vsel %vm7317_vm7, %v5527_v2, %v2842_v22  ;;  %v527_v38 = vrot.slane %v525_v17, 4  ;;  %v528_v1 = vshll.u32 %v7343_v53, 16  ;;  %v534_v30 = vshll.u32 %v7350_v16, 16  ;;  %v7382_v22 = vld [vmem:[%s8865_s1 + $0xe] sm:$0x3] }
  0x70   : > { %v517_v25 = vor.u32 %v516_v7, %v512_v58  ;;  %v5544_v31 = vcombine.low %v2843_v21, %v2846_v5  ;;  %6124 = vmatprep.mubr.msk.bf16.mxu1 %vm718_vm3, %v5259_v11  ;;  %v513_v28 = vsel %vm7091_vm4, %v508_v14, %v512_v58  ;;  %v538_v60 = vshrl.u32 %v7350_v16, 16  ;;  %v7401_v5 = vld [vmem:[%s7065_s11 + $0x90] sm:$0xf] }
  0x71   : > { %v544_v42 = vshll.u32 %v275_v57, 16  ;;  %v530_v45 = vrot.slane %v528_v1, 5  ;;  %v5528_v47 = vrot.slane %v5512_v10, 9  ;;  %v2849_v26 = vrot.slane %v7141_v46, 5  ;;  %v5513_v57 = vld [vmem:[%s7065_s11 + $0x30] sm:$0xe] }
  0x72   : > { %v518_v44 = vrot.slane %v517_v25, 4  ;;  %v536_v48 = vrot.slane %v534_v30, 5  ;;  %v540_v49 = vrot.slane %v538_v60, 4  ;;  %v2852_v51 = vrot.slane %v7150_v54, 5  ;;  %v7413_v30 = vld [vmem:[%s7065_s11 + $0x94] sm:$0xf] }
  0x73   : > { %v546_v50 = vrot.slane %v544_v42, 5  ;;  %6279 = vmatmul.mubr.msk.bf16.vlgmr.msra.gmra.mrb[0].mxu0 %vm718_vm3, %v5544_v31  ;;  %v531_v62 = vor.u32 %v530_v45, %v527_v38  ;;  %v2850_v55 = vsel %vm7317_vm7, %v5528_v47, %v2849_v26  ;;  %v2851_v56 = vrot.slane %v2849_v26, 4  ;;  %v277_v60 = vld [vmem:[%s7065_s11 + $0x98] sm:$0x1]  ;;  %v5514_v26 = vld [vmem:[%s7065_s11 + $0x3c] sm:$0xe] }
  0x74   : > { %v523_v15 = vsel %vm7091_vm4, %v518_v44, %v522_v18  ;;  %6311 = vmatpush3.bf16.msra.mxu0 %v7101_v41  ;;  %v541_v46 = vor.u32 %v540_v49, %v536_v48  ;;  %v549_v58 = vshrl.u32 %v7369_v39, 16  ;;  %v552_v54 = vshll.u32 %v7369_v39, 16 }
  0x75   : > { %v5260_v63 = vcombine.low %v513_v28, %v523_v15  ;;  %v532_v61 = vrot.slane %v531_v62, 4  ;;  %v2853_v2 = vsel %vm7317_vm7, %v2851_v56, %v2852_v51  ;;  %v558_v6 = vshll.u32 %v7377_v43, 16  ;;  %6678 = vmatprep.subr.msk.bf16.mxu0 %vm767_vm0, %v7382_v22 }
  0x76   : > { %v562_v7 = vshrl.u32 %v7377_v43, 16  ;;  %v542_v41 = vrot.slane %v541_v46, 4  ;;  %v5545_v17 = vcombine.low %v2850_v55, %v2853_v2  ;;  %v551_v10 = vrot.slane %v549_v58, 4  ;;  %v7433_v46 = vld [vmem:[%s7065_s11 + $0xa0] sm:$0xf] }
  0x77   : > { %6125 = vmatmul.mubr.msk.bf16.gmra.mrb[16].mxu1 %vm718_vm3, %v5260_v63  ;;  %v554_v11 = vrot.slane %v552_v54, 5  ;;  %v537_v14 = vsel %vm7091_vm4, %v532_v61, %v536_v48  ;;  %v560_v18 = vrot.slane %v558_v6, 5  ;;  %v568_v25 = vshll.u32 %v276_v52, 16  ;;  %v7422_v52 = vld [vmem:[%s7065_s11 + $0x9c] sm:$0xf] }
  0x78   : > { %v564_v21 = vrot.slane %v562_v7, 4  ;;  %v547_v31 = vsel %vm7091_vm4, %v542_v41, %v546_v50  ;;  %6282 = vmatprep.mubr.msk.bf16.mxu0 %vm718_vm3, %v5545_v17  ;;  %v5529_v1 = vrot.slane %v5513_v57, 9  ;;  %v2856_v28 = vrot.slane %v7170_v33, 5 }
  0x79   : > { %v555_v38 = vor.u32 %v554_v11, %v551_v10  ;;  %v5261_v42 = vcombine.low %v537_v14, %v547_v31  ;;  %v570_v45 = vrot.slane %v568_v25, 5  ;;  %v2859_v47 = vrot.slane %v7178_v40, 5  ;;  %v278_v10 = vld [vmem:[%s7065_s11 + $0xa4] sm:$0x1]  ;;  %v5515_v11 = vld [vmem:[%s7065_s11 + $0x48] sm:$0xe] }
  0x7a   : > { %v565_v44 = vor.u32 %v564_v21, %v560_v18  ;;  %v2857_v49 = vsel %vm7317_vm7, %v5529_v1, %v2856_v28  ;;  %v2858_v50 = vrot.slane %v2856_v28, 4  ;;  %v573_v51 = vshrl.u32 %v7401_v5, 16 }
  0x7b   : > { %v556_v48 = vrot.slane %v555_v38, 4  ;;  %6128 = vmatprep.mubr.msk.bf16.mxu1 %vm718_vm3, %v5261_v42  ;;  %v576_v15 = vshll.u32 %v7401_v5, 16  ;;  %v582_v62 = vshll.u32 %v7413_v30, 16  ;;  %v586_v40 = vshrl.u32 %v7413_v30, 16 }
  0x7c   : > { %v566_v33 = vrot.slane %v565_v44, 4  ;;  %v2860_v56 = vsel %vm7317_vm7, %v2858_v50, %v2859_v47  ;;  %v575_v57 = vrot.slane %v573_v51, 4  ;;  %v592_v63 = vshll.u32 %v277_v60, 16 }
  0x7d   : > { %v561_v55 = vsel %vm7091_vm4, %v556_v48, %v560_v18  ;;  %v5546_v54 = vcombine.low %v2857_v49, %v2860_v56  ;;  %v578_v61 = vrot.slane %v576_v15, 5  ;;  %v584_v2 = vrot.slane %v582_v62, 5  ;;  %v7459_v56 = vld [vmem:[%s7065_s11 + $0xac] sm:$0xf] }
  0x7e   : > { %v571_v58 = vsel %vm7091_vm4, %v566_v33, %v570_v45  ;;  %v588_v7 = vrot.slane %v586_v40, 4  ;;  %v594_v41 = vrot.slane %v592_v63, 5  ;;  %v5530_v17 = vrot.slane %v5514_v26, 9  ;;  %v7454_v33 = vld [vmem:[%s7065_s11 + $0xa8] sm:$0xf] }
  0x7f   : > { %v5262_v6 = vcombine.low %v561_v55, %v571_v58  ;;  %6283 = vmatmul.mubr.msk.bf16.gmra.mrb[4].mxu0 %vm718_vm3, %v5546_v54  ;;  %v579_v14 = vor.u32 %v578_v61, %v575_v57  ;;  %v2863_v18 = vrot.slane %v7195_v20, 5  ;;  %v2866_v21 = vrot.slane %v7200_v34, 5  ;;  %v279_v61 = vld [vmem:[%s7065_s11 + $0xb0] sm:$0x1] }
  0x80   : > { %v597_v25 = vshrl.u32 %v7422_v52, 16  ;;  %v589_v31 = vor.u32 %v588_v7, %v584_v2  ;;  %v600_v38 = vshll.u32 %v7422_v52, 16  ;;  %v606_v1 = vshll.u32 %v7433_v46, 16 }
  0x81   : > { %6129 = vmatmul.mubr.msk.bf16.gmra.mrb[20].mxu1 %vm718_vm3, %v5262_v6  ;;  %v610_v28 = vshrl.u32 %v7433_v46, 16  ;;  %v580_v60 = vrot.slane %v579_v14, 4  ;;  %v2864_v42 = vsel %vm7317_vm7, %v5530_v17, %v2863_v18  ;;  %v2865_v20 = vrot.slane %v2863_v18, 4  ;;  %v7474_v14 = vld [vmem:[%s7065_s11 + $0xb4] sm:$0xf] }
  0x82   : > { %v599_v44 = vrot.slane %v597_v25, 4  ;;  %v590_v34 = vrot.slane %v589_v31, 4  ;;  %v602_v45 = vrot.slane %v600_v38, 5  ;;  %v608_v47 = vrot.slane %v606_v1, 5 }
  0x83   : > { %v612_v26 = vrot.slane %v610_v28, 4  ;;  %v585_v48 = vsel %vm7091_vm4, %v580_v60, %v584_v2  ;;  %v2867_v49 = vsel %vm7317_vm7, %v2865_v20, %v2866_v21  ;;  %v616_v50 = vshll.u32 %v278_v10, 16  ;;  %v5516_v2 = vld [vmem:[%s7065_s11 + $0x54] sm:$0xe] }
  0x84   : > { %v5531_v51 = vrot.slane %v5515_v11, 9  ;;  %v595_v15 = vsel %vm7091_vm4, %v590_v34, %v594_v41  ;;  %v5547_v62 = vcombine.low %v2864_v42, %v2867_v49  ;;  %v603_v40 = vor.u32 %v602_v45, %v599_v44  ;;  %v7483_v42 = vld [vmem:[%s7065_s11 + $0xb8] sm:$0xf]  ;;  %v280_v49 = vld [vmem:[%s7065_s11 + $0xbc] sm:$0x1] }
  0x85   : > { %v613_v55 = vor.u32 %v612_v26, %v608_v47  ;;  %v5263_v57 = vcombine.low %v585_v48, %v595_v15  ;;  %v618_v63 = vrot.slane %v616_v50, 5  ;;  %v2870_v58 = vrot.slane %v7218_v8, 5 }
  0x86   : > { %v2873_v54 = vrot.slane %v7226_v23, 5  ;;  %6286 = vmatprep.mubr.msk.bf16.mxu0 %vm718_vm3, %v5547_v62  ;;  %v604_v6 = vrot.slane %v603_v40, 4  ;;  %v621_v41 = vshrl.u32 %v7454_v33, 16  ;;  %v624_v17 = vshll.u32 %v7454_v33, 16 }
  0x87   : > { %v614_v7 = vrot.slane %v613_v55, 4  ;;  %6132 = vmatprep.mubr.msk.bf16.mxu1 %vm718_vm3, %v5263_v57  ;;  %v2871_v10 = vsel %vm7317_vm7, %v5531_v51, %v2870_v58  ;;  %v2872_v11 = vrot.slane %v2870_v58, 4  ;;  %v630_v8 = vshll.u32 %v7459_v56, 16  ;;  %v5517_v55 = vld [vmem:[%s7065_s11 + $0x60] sm:$0xe] }
  0x88   : > { %v634_v23 = vshrl.u32 %v7459_v56, 16  ;;  %v609_v18 = vsel %vm7091_vm4, %v604_v6, %v608_v47  ;;  %v623_v25 = vrot.slane %v621_v41, 4  ;;  %v626_v31 = vrot.slane %v624_v17, 5  ;;  %v5518_v6 = vld [vmem:[%s7065_s11 + $0x6c] sm:$0xe] }
  0x89   : > { %v619_v21 = vsel %vm7091_vm4, %v614_v7, %v618_v63  ;;  %v2874_v1 = vsel %vm7317_vm7, %v2872_v11, %v2873_v54  ;;  %v632_v28 = vrot.slane %v630_v8, 5  ;;  %v640_v34 = vshll.u32 %v279_v61, 16  ;;  %v5454_v11 = vld [vmem:[%s7065_s11 + $0x70] sm:$0xf]  ;;  %v5455_v8 = vld [vmem:[%s7065_s11 + $0x74] sm:$0x1] }
  0x8a   : > { %v5264_v38 = vcombine.low %v609_v18, %v619_v21  ;;  %v636_v60 = vrot.slane %v634_v23, 4  ;;  %v5548_v20 = vcombine.low %v2871_v10, %v2874_v1  ;;  %v627_v44 = vor.u32 %v626_v31, %v623_v25 }
  0x8b   : > { %v5532_v45 = vrot.slane %v5516_v2, 9  ;;  %v2877_v26 = vrot.slane %v7249_v4, 5  ;;  %v2880_v48 = vrot.slane %v7255_v12, 5  ;;  %v645_v50 = vshrl.u32 %v7474_v14, 16 }
  0x8c   : > { %6133 = vmatmul.mubr.msk.bf16.gmra.mrb[24].mxu1 %vm718_vm3, %v5264_v38  ;;  %v637_v47 = vor.u32 %v636_v60, %v632_v28  ;;  %6287 = vmatmul.mubr.msk.bf16.gmra.mrb[8].mxu0 %vm718_vm3, %v5548_v20  ;;  %v628_v51 = vrot.slane %v627_v44, 4  ;;  %v642_v15 = vrot.slane %v640_v34, 5  ;;  %v648_v62 = vshll.u32 %v7474_v14, 16 }
  0x8d   : > { %v654_v40 = vshll.u32 %v7483_v42, 16  ;;  %v2878_v4 = vsel %vm7317_vm7, %v5532_v45, %v2877_v26  ;;  %v2879_v12 = vrot.slane %v2877_v26, 4  ;;  %v647_v63 = vrot.slane %v645_v50, 4 }
  0x8e   : > { %v638_v57 = vrot.slane %v637_v47, 4  ;;  %v633_v58 = vsel %vm7091_vm4, %v628_v51, %v632_v28  ;;  %v650_v54 = vrot.slane %v648_v62, 5  ;;  %v658_v2 = vshrl.u32 %v7483_v42, 16  ;;  %v5519_v47 = vld [vmem:[%s7065_s11 + $0x78] sm:$0xe] }
  0x8f   : > { %v656_v61 = vrot.slane %v654_v40, 5  ;;  %v2881_v41 = vsel %vm7317_vm7, %v2879_v12, %v2880_v48  ;;  %v664_v17 = vshll.u32 %v280_v49, 16  ;;  %v5533_v10 = vrot.slane %v5517_v55, 9  ;;  %v6791_v51 = vld [vmem:[%s7065_s11] sm:$0xf] }
  0x90   : > { %v643_v7 = vsel %vm7091_vm4, %v638_v57, %v642_v15  ;;  %v5549_v18 = vcombine.low %v2878_v4, %v2881_v41  ;;  %v651_v21 = vor.u32 %v650_v54, %v647_v63  ;;  %v660_v25 = vrot.slane %v658_v2, 4  ;;  %v7521_v15 = vld [vmem:[%s7065_s11 + $0x4] sm:$0xf]  ;;  %v7525_v40 = vld [vmem:[%s7065_s11 + $0x7c] sm:$0xf] }
  0x91   : > { %v5265_v23 = vcombine.low %v633_v58, %v643_v7  ;;  %v666_v31 = vrot.slane %v664_v17, 5  ;;  %v2884_v38 = vrot.slane %v7279_v59, 5  ;;  %v2887_v1 = vrot.slane %v7286_v9, 5  ;;  %v7528_v55 = vld [vmem:[%s7065_s11 + $0x80] sm:$0x1] }
  0x92   : > { %v5534_v28 = vrot.slane %v5518_v6, 9  ;;  %6290 = vmatprep.mubr.msk.bf16.mxu0 %vm718_vm3, %v5549_v18  ;;  %v652_v60 = vrot.slane %v651_v21, 4  ;;  %v661_v20 = vor.u32 %v660_v25, %v656_v61  ;;  %v2891_v44 = vrot.slane %v5454_v11, 5  ;;  %v5460_v57 = vld [vmem:[%s7065_s11 + $0x88] sm:$0xf] }
  0x93   : > { %6136 = vmatprep.mubr.msk.bf16.mxu1 %vm718_vm3, %v5265_v23  ;;  %v2894_v34 = vrot.slane %v5455_v8, 5  ;;  %v2885_v45 = vsel %vm7317_vm7, %v5533_v10, %v2884_v38  ;;  %v2886_v59 = vrot.slane %v2884_v38, 4  ;;  %v5283_v62 = vcombine.low %v6791_v51, %v7521_v15  ;;  %v5461_v54 = vld [vmem:[%s7065_s11 + $0x8c] sm:$0x1]  ;;  %v5463_v17 = vld [vmem:[%s7065_s11 + $0x94] sm:$0xf] }
  0x94   : > { %v657_v9 = vsel %vm7091_vm4, %v652_v60, %v656_v61  ;;  %v662_v26 = vrot.slane %v661_v20, 4  ;;  %v2892_v48 = vsel %vm7317_vm7, %v5534_v28, %v2891_v44  ;;  %v2893_v49 = vrot.slane %v2891_v44, 4  ;;  %v5520_v61 = vld [vmem:[%s7065_s11 + $0x84] sm:$0xe]  ;;  %v5521_v23 = vld [vmem:[%s7065_s11 + $0x90] sm:$0xe] }
  0x95   : > { %v2888_v50 = vsel %vm7317_vm7, %v2886_v59, %v2887_v1  ;;  %v5535_v58 = vrot.slane %v5519_v47, 9  ;;  %v2898_v7 = vrot.slane %v7525_v40, 5  ;;  %v2901_v41 = vrot.slane %v7528_v55, 5  ;;  %v5464_v25 = vld [vmem:[%s7065_s11 + $0x98] sm:$0x1] }
  0x96   : > { %v667_v4 = vsel %vm7091_vm4, %v662_v26, %v666_v31  ;;  %v5550_v12 = vcombine.low %v2885_v45, %v2888_v50  ;;  %v2895_v63 = vsel %vm7317_vm7, %v2893_v49, %v2894_v34  ;;  %v5536_v10 = vrot.slane %v5520_v61, 9  ;;  %v5466_v31 = vld [vmem:[%s7065_s11 + $0xa0] sm:$0xf]  ;;  %v5467_v60 = vld [vmem:[%s7065_s11 + $0xa4] sm:$0x1] }
  0x97   : > { %v5266_v2 = vcombine.low %v657_v9, %v667_v4  ;;  %v5551_v6 = vcombine.low %v2892_v48, %v2895_v63  ;;  %v2905_v11 = vrot.slane %v5460_v57, 5  ;;  %v2908_v8 = vrot.slane %v5461_v54, 5  ;;  %v5522_v20 = vld [vmem:[%s7065_s11 + $0x9c] sm:$0xe]  ;;  %v6793_v44 = vld [vmem:[%s7065_s11 + $0xc] sm:$0xf] }
  0x98   : > { %6291 = vmatmul.mubr.msk.bf16.gmra.mrb[12].mxu0 %vm718_vm3, %v5550_v12  ;;  %v2899_v18 = vsel %vm7317_vm7, %v5535_v58, %v2898_v7  ;;  %v2900_v21 = vrot.slane %v2898_v7, 4  ;;  %v2912_v28 = vrot.slane %v5463_v17, 5  ;;  %v7555_v34 = vld [vmem:[%s7065_s11 + $0x10] sm:$0xf]  ;;  %v6795_v47 = vld [vmem:[%s7065_s11 + $0x18] sm:$0xf] }
  0x99   : > { %6137 = vmatmul.mubr.msk.bf16.gmra.mrb[28].mxu1 %vm718_vm3, %v5266_v2  ;;  %6294 = vmatprep.mubr.msk.bf16.mxu0 %vm718_vm3, %v5551_v6  ;;  %v2906_v38 = vsel %vm7317_vm7, %v5536_v10, %v2905_v11  ;;  %v2907_v1 = vrot.slane %v2905_v11, 4  ;;  %v5284_v45 = vcombine.low %v6793_v44, %v7555_v34  ;;  %v7562_v9 = vld [vmem:[%s7065_s11 + $0x1c] sm:$0xf]  ;;  %v5537_v48 = vrot.slane %v5521_v23, 9  ;;  %v5469_v57 = vld [vmem:[%s7065_s11 + $0xac] sm:$0xf] }
  0x9a   : > { %6142 = vmatprep.mubr.msk.bf16.mxu1 %vm718_vm3, %v5283_v62  ;;  %v2902_v59 = vsel %vm7317_vm7, %v2900_v21, %v2901_v41  ;;  %v5285_v26 = vcombine.low %v6795_v47, %v7562_v9  ;;  %v2914_v51 = vrot.slane %v2912_v28, 4  ;;  %v2915_v62 = vrot.slane %v5464_v25, 5  ;;  %v6797_v54 = vld [vmem:[%s8865_s1 + $0x4] sm:$0x3]  ;;  %v5472_v2 = vld [vmem:[%s7065_s11 + $0xb8] sm:$0xf] }
  0x9b   : > { %v5552_v49 = vcombine.low %v2899_v18, %v2902_v59  ;;  %v2909_v50 = vsel %vm7317_vm7, %v2907_v1, %v2908_v8  ;;  %v5538_v12 = vrot.slane %v5522_v20, 9  ;;  %v2919_v63 = vrot.slane %v5466_v31, 5  ;;  %v7577_v7 = vld [vmem:[%s8865_s1 + $0x6] sm:$0x3]  ;;  %v5470_v10 = vld [vmem:[%s7065_s11 + $0xb0] sm:$0x1] }
  0x9c   : > { %v5553_v4 = vcombine.low %v2906_v38, %v2909_v50  ;;  %v2922_v58 = vrot.slane %v5467_v60, 5  ;;  %v1486_v61 = vsel %vm767_vm0, %v6797_v54, 0  ;;  %v2913_v41 = vsel %vm7317_vm7, %v5537_v48, %v2912_v28  ;;  %v5523_v11 = vld [vmem:[%s7065_s11 + $0xa8] sm:$0xe]  ;;  %v5473_v25 = vld [vmem:[%s7065_s11 + $0xbc] sm:$0x1] }
  0x9d   : > { %v2921_v6 = vrot.slane %v2919_v63, 4  ;;  %v2916_v17 = vsel %vm7317_vm7, %v2914_v51, %v2915_v62  ;;  %v2926_v8 = vrot.slane %v5469_v57, 5  ;;  %v2920_v23 = vsel %vm7317_vm7, %v5538_v12, %v2919_v63  ;;  %v5524_v31 = vld [vmem:[%s7065_s11 + $0xb4] sm:$0xe]  ;;  %v6798_v38 = vld [vmem:[%s7065_s11 + $0x24] sm:$0xf] }
  0x9e   : > { %v2933_v21 = vrot.slane %v5472_v2, 5  ;;  %v7598_v1 = vld [vmem:[%s7065_s11 + $0x28] sm:$0xf]  ;;  %v5554_v60 = vcombine.low %v2913_v41, %v2916_v17  ;;  %v5539_v44 = vrot.slane %v5523_v11, 9  ;;  %v2929_v59 = vrot.slane %v5470_v10, 5 }
  0x9f   : > { %v2923_v18 = vsel %vm7317_vm7, %v2921_v6, %v2922_v58  ;;  %v5286_v28 = vcombine.low %v6798_v38, %v7598_v1  ;;  %v6800_v47 = vld [vmem:[%s7065_s11 + $0x30] sm:$0xf]  ;;  %v2936_v51 = vrot.slane %v5473_v25, 5  ;;  %v5475_v62 = vld [vmem:[%s7065_s11 + $0xc4] sm:$0xf]  ;;  %v2321_v25 = vshrl.u32 %v7525_v40, 16 }
  0xa0   : > { %6295 = vmatmul.mubr.msk.bf16.gmra.mrb[16].mxu0 %vm718_vm3, %v5552_v49  ;;  %v5555_v20 = vcombine.low %v2920_v23, %v2923_v18  ;;  %v5540_v49 = vrot.slane %v5524_v31, 9  ;;  %v2935_v50 = vrot.slane %v2933_v21, 4  ;;  %v2927_v57 = vsel %vm7317_vm7, %v5539_v44, %v2926_v8  ;;  %v5525_v12 = vld [vmem:[%s7065_s11 + $0xc0] sm:$0xe]  ;;  %v6802_v41 = vld [vmem:[%s7065_s11 + $0x3c] sm:$0xf] }
  0xa1   : > { %6143 = vmatmul.mubr.msk.bf16.vlgmr.msra.gmra.mrb[0].mxu1 %vm718_vm3, %v5284_v45  ;;  %6298 = vmatprep.mubr.msk.bf16.mxu0 %vm718_vm3, %v5553_v4  ;;  %v2928_v45 = vrot.slane %v2926_v8, 4  ;;  %v2940_v63 = vrot.slane %v5475_v62, 5  ;;  %v5541_v6 = vrot.slane %v5525_v12, 9  ;;  %v7623_v17 = vld [vmem:[%s7065_s11 + $0x40] sm:$0xf]  ;;  %v5289_v18 = vcombine.low %v7230_v27, %v7233_v36  ;;  %v6754_v62 = vld [vmem:[%s7065_s11 + $0x24] sm:$0xff]  }
  0xa2   : > { %6175 = vmatpush3.bf16.msra.mxu1 %v1486_v61  ;;  %6146 = vmatprep.mubr.msk.bf16.mxu1 %vm718_vm3, %v5285_v26  ;;  %v7603_v26 = vld [vmem:[%s7065_s11 + $0x34] sm:$0xf]  ;;  %v2934_v58 = vsel %vm7317_vm7, %v5540_v49, %v2933_v21  ;;  %v2937_v54 = vsel %vm7317_vm7, %v2935_v50, %v2936_v51  ;;  %v5476_v61 = vld [vmem:[%s7065_s11 + $0xc8] sm:$0x1]  ;;  %v5288_v10 = vcombine.low %v6802_v41, %v7623_v17  ;;  %v2317_v21 = vshll.u32 %v7525_v40, 16 }
  0xa3   : > { %6673 = vmatprep.subr.msk.bf16.mxu1 %vm767_vm0, %v7577_v7  ;;  %v5287_v48 = vcombine.low %v6800_v47, %v7603_v26  ;;  %v2930_v4 = vsel %vm7317_vm7, %v2928_v45, %v2929_v59  ;;  %v5557_v11 = vcombine.low %v2934_v58, %v2937_v54  ;;  %v2942_v8 = vrot.slane %v2940_v63, 4  ;;  %v1224_v45 = vld [vmem:[%s7065_s11] sm:$0xe]  ;;  %v1225_v59 = vld [vmem:[%s7065_s11 + $0xc] sm:$0xe] }
  0xa4   : > { %v5556_v2 = vcombine.low %v2927_v57, %v2930_v4  ;;  %v2943_v23 = vrot.slane %v5476_v61, 5  ;;  %v2941_v31 = vsel %vm7317_vm7, %v5541_v6, %v2940_v63  ;;  %v7638_v27 = vrot.slane %v2317_v21, 5  ;;  %v1228_v41 = vld [vmem:[%s7065_s11 + $0x30] sm:$0xe] }
  0xa5   : > { %v2323_v36 = vrot.slane %v2321_v25, 4  ;;  %v5291_v44 = vcombine.low %v7290_v19, %v7296_v35  ;;  %v2327_v47 = vshll.u32 %v7528_v55, 16  ;;  %v5315_v19 = vrot.slane %v1224_v45, 9 }
  0xa6   : > { %v2944_v38 = vsel %vm7317_vm7, %v2942_v8, %v2943_v23  ;;  %8888 = vst [vmem:[#allocation9_spill] sm:$0xff] %v7638_v27  ;;  %v5316_v35 = vrot.slane %v1225_v59, 9  ;;  %v1291_v4 = vrot.slane %v7562_v9, 5  ;;  %v1298_v12 = vrot.slane %v7598_v1, 5  ;;  %v1229_v8 = vld [vmem:[%s7065_s11 + $0x3c] sm:$0xe] }
  0xa7   : > { %v5558_v40 = vcombine.low %v2941_v31, %v2944_v38  ;;  %v2324_v49 = vor.u32 %v2323_v36, %v7638_v27  ;;  %v7658_v51 = vrot.slane %v2327_v47, 5  ;;  %v5292_v58 = vcombine.low %v7311_v0, %v7324_v29  ;;  %v1230_v31 = vld [vmem:[%s7065_s11 + $0x48] sm:$0xe]  ;;  %v6808_v59 = vld [vmem:[%s7065_s11 + $0x38] sm:$0x1] }
  0xa8   : > { %6299 = vmatmul.mubr.msk.bf16.gmra.mrb[20].mxu0 %vm718_vm3, %v5554_v60  ;;  %v5290_v60 = vcombine.low %v7259_v24, %v7265_v37  ;;  %v6805_v24 = vld [vmem:[%s7065_s11 + $0x14] sm:$0x1]  ;;  %v4132_v54 = vsel %vm767_vm0, %v7382_v22, 0  ;;  %v5293_v61 = vcombine.low %v7343_v53, %v7350_v16  ;;  %v5294_v6 = vcombine.low %v7369_v39, %v7377_v43  ;;  %v6806_v16 = vld [vmem:[%s7065_s11 + $0x20] sm:$0x1] }
  0xa9   : > { %6147 = vmatmul.mubr.msk.bf16.gmra.mrb[4].mxu1 %vm718_vm3, %v5286_v28  ;;  %6302 = vmatprep.mubr.msk.bf16.mxu0 %vm718_vm3, %v5555_v20  ;;  %v1284_v28 = vrot.slane %v7555_v34, 5  ;;  %v6752_v20 = vld [vmem:[%s7065_s11 + $0x18] sm:$0xff]   ;;  %v6804_v34 = vld [vmem:[%s7065_s11 + $0x8] sm:$0x1]  ;;  %v1287_v37 = vrot.slane %v6805_v24, 5  ;;  %8889 = vst [vmem:[#allocation10_spill] sm:$0xff] %v7658_v51  ;;  %v5295_v9 = vcombine.low %v7401_v5, %v7413_v30 }
  0xaa   : > { %6150 = vmatprep.mubr.msk.bf16.mxu1 %vm718_vm3, %v5287_v48  ;;  %v1277_v48 = vrot.slane %v7521_v15, 5  ;;  %v1280_v50 = vrot.slane %v6804_v34, 5  ;;  %v1226_v15 = vld [vmem:[%s7065_s11 + $0x18] sm:$0xe]  ;;  %v7663_v63 = vrot.slane %v2324_v49, 4  ;;  %v1294_v22 = vrot.slane %v6806_v16, 5 }
  0xab   : > { %v1286_v55 = vrot.slane %v1284_v28, 4  ;;  %v5317_v1 = vrot.slane %v1226_v15, 9  ;;  %v7685_v29 = vsel %vm7317_vm7, %v5316_v35, %v1284_v28  ;;  %v1300_v25 = vrot.slane %v1298_v12, 4  ;;  %v5640_v24 = vld [vmem:[%s7065_s11 + $0x18] sm:$0xf] }
  0xac   : > { %v1279_v57 = vrot.slane %v1277_v48, 4  ;;  %8890 = vst [vmem:[#allocation11_spill] sm:$0xff] %v7663_v63  ;;  %v7681_v0 = vsel %vm7317_vm7, %v5315_v19, %v1277_v48  ;;  %v1308_v47 = vrot.slane %v6808_v59, 5  ;;  %v7722_v49 = vsel %vm767_vm0, %v7577_v7, 0  ;;  %v5641_v7 = vld [vmem:[%s7065_s11 + $0x1c] sm:$0xf] }
  0xad   : > { %v7689_v53 = vsel %vm7317_vm7, %v1286_v55, %v1287_v37  ;;  %v7726_v34 = vsel %vm7317_vm7, %v5317_v1, %v1291_v4  ;;  %v6758_v37 = vld [vmem:[%s7065_s11 + $0x3c] sm:$0xff]   ;;  %v5320_v35 = vrot.slane %v1229_v8, 9  ;;  %v6809_v55 = vld [vmem:[%s7065_s11 + $0x44] sm:$0x1]  ;;  %v3653_v8 = vshll.u32 %v5640_v24, 16 }
  0xae   : > { %v7700_v23 = vsel %vm7317_vm7, %v1279_v57, %v1280_v50  ;;  %v1231_v50 = vld [vmem:[%s7065_s11 + $0x54] sm:$0xe]  ;;  %v1315_v15 = vrot.slane %v6809_v55, 5  ;;  %v5644_v39 = vld [vmem:[%s7065_s11 + $0x28] sm:$0xf] }
  0xaf   : > { %v6816_v5 = vld [vmem:[%s7065_s11 + $0x70] sm:$0xf] }
  0xb0   : > { %6303 = vmatmul.mubr.msk.bf16.gmra.mrb[24].mxu0 %vm718_vm3, %v5556_v2  ;;  %v1227_v2 = vld [vmem:[%s7065_s11 + $0x24] sm:$0xe]  ;;  %v1340_v30 = vrot.slane %v6816_v5, 5 }
  0xb1   : > { %6151 = vmatmul.mubr.msk.bf16.gmra.mrb[8].mxu1 %vm718_vm3, %v5288_v10  ;;  %6306 = vmatprep.mubr.msk.bf16.mxu0 %vm718_vm3, %v5557_v11  ;;  %v1305_v10 = vrot.slane %v7603_v26, 5  ;;  %v6756_v11 = vld [vmem:[%s7065_s11 + $0x30] sm:$0xff]   ;;  %v5318_v21 = vrot.slane %v1227_v2, 9 }
  0xb2   : > { %6154 = vmatprep.mubr.msk.bf16.mxu1 %vm718_vm3, %v5289_v18  ;;  %v7696_v26 = vld [vmem:[%s8865_s1 + $0x10] sm:$0x3]  ;;  %v1293_v18 = vrot.slane %v1291_v4, 4  ;;  %v1342_v48 = vrot.slane %v1340_v30, 4 }
  0xb3   : > { %v1307_v45 = vrot.slane %v1305_v10, 4  ;;  %v7733_v19 = vsel %vm7317_vm7, %v5318_v21, %v1298_v12  ;;  %v3663_v21 = vshrl.u32 %v5641_v7, 16 }
  0xb4   : > { %v7742_v4 = vsel %vm7317_vm7, %v1293_v18, %v1294_v22  ;;  %v3650_v22 = vshrl.u32 %v5640_v24, 16  ;;  %v3659_v18 = vshll.u32 %v5641_v7, 16  ;;  %v5643_v24 = vld [vmem:[%s7065_s11 + $0x24] sm:$0xf] }
  0xb5   : > { %v7755_v1 = vsel %vm7317_vm7, %v1307_v45, %v1308_v47 }
  0xb6   : > { %v3652_v43 = vrot.slane %v3650_v22, 4  ;;  %v7797_v7 = vrot.slane %v3659_v18, 5  ;;  %v3677_v22 = vshll.u32 %v5643_v24, 16  ;;  %v3687_v18 = vshrl.u32 %v5644_v39, 16 }
  0xb8   : > { %6307 = vmatmul.mubr.msk.bf16.gmra.mrb[28].mxu0 %vm718_vm3, %v5558_v40  ;;  %v6807_v40 = vld [vmem:[%s7065_s11 + $0x2c] sm:$0x1]  ;;  %v3679_v27 = vrot.slane %v3677_v22, 5 }
  0xb9   : > { %6155 = vmatmul.mubr.msk.bf16.gmra.mrb[12].mxu1 %vm718_vm3, %v5290_v60  ;;  %6312 = vmatprep.mubr.msk.bf16.mxu0 %vm718_vm3, %v6752_v20  ;;  %v1301_v28 = vrot.slane %v6807_v40, 5  ;;  %v1312_v60 = vrot.slane %v7623_v17, 5  ;;  %v6812_v40 = vld [vmem:[%s7065_s11 + $0x50] sm:$0x1]  ;;  %v6817_v17 = vld [vmem:[%s7065_s11 + $0x74] sm:$0x1] }
  0xba   : > { %6158 = vmatprep.mubr.msk.bf16.mxu1 %vm718_vm3, %v5291_v44  ;;  %v5319_v44 = vrot.slane %v1228_v41, 9  ;;  %v5322_v41 = vrot.slane %v1231_v50, 9  ;;  %v1232_v50 = vld [vmem:[%s7065_s11 + $0x60] sm:$0xe]  ;;  %v5645_v20 = vld [vmem:[%s7065_s11 + $0x2c] sm:$0x1] }
  0xbb   : > { %v1314_v12 = vrot.slane %v1312_v60, 4  ;;  %v7768_v45 = vsel %vm7317_vm7, %v5320_v35, %v1312_v60  ;;  %v6813_v35 = vld [vmem:[%s7065_s11 + $0x5c] sm:$0x1] }
  0xbc   : > { %v7751_v2 = vsel %vm7317_vm7, %v5319_v44, %v1305_v10  ;;  %v1329_v55 = vrot.slane %v6813_v35, 5  ;;  %v1233_v35 = vld [vmem:[%s7065_s11 + $0x6c] sm:$0xe] }
  0xbd   : > { %v7772_v59 = vsel %vm7317_vm7, %v1314_v12, %v1315_v15  ;;  %v6814_v15 = vld [vmem:[%s7065_s11 + $0x64] sm:$0xf]  ;;  %v3665_v12 = vrot.slane %v3663_v21, 4  ;;  %v5324_v5 = vrot.slane %v1233_v35, 9 }
  0xbe   : > { %v6764_v21 = vld [vmem:[%s7065_s11 + $0x60] sm:$0xff]  }
  0xc0   : > { %6313 = vmatmul.mubr.msk.bf16.vlgmr.msra.gmra.mrb[0].mxu0 %vm718_vm3, %v6754_v62  ;;  %v6810_v62 = vld [vmem:[%s7065_s11 + $0x4c] sm:$0xf] }
  0xc1   : > { %6159 = vmatmul.mubr.msk.bf16.gmra.mrb[16].mxu1 %vm718_vm3, %v5292_v58  ;;  %6345 = vmatpush3.bf16.msra.mxu0 %v4132_v54  ;;  %v1319_v57 = vrot.slane %v6810_v62, 5  ;;  %v7746_v58 = vsel %vm7317_vm7, %v1300_v25, %v1301_v28  ;;  %v5321_v54 = vrot.slane %v1230_v31, 9  ;;  %v1322_v28 = vrot.slane %v6812_v40, 5 }
  0xc2   : > { %6162 = vmatprep.mubr.msk.bf16.mxu1 %vm718_vm3, %v5293_v61  ;;  %6316 = vmatprep.mubr.msk.bf16.mxu0 %vm718_vm3, %v6756_v11  ;;  %v6760_v61 = vld [vmem:[%s7065_s11 + $0x48] sm:$0xff]   ;;  %v6811_v11 = vld [vmem:[%s7065_s11 + $0x58] sm:$0xf]  ;;  %v1333_v62 = vrot.slane %v6814_v15, 5  ;;  %v5647_v15 = vld [vmem:[%s7065_s11 + $0x34] sm:$0xf] }
  0xc3   : > { %6679 = vmatprep.subr.msk.bf16.mxu0 %vm767_vm0, %v7696_v26  ;;  %v1326_v16 = vrot.slane %v6811_v11, 5  ;;  %v1321_v31 = vrot.slane %v1319_v57, 4  ;;  %v7776_v47 = vsel %vm7317_vm7, %v5321_v54, %v1319_v57  ;;  %v5642_v57 = vld [vmem:[%s7065_s11 + $0x20] sm:$0x1]  ;;  %v5646_v54 = vld [vmem:[%s7065_s11 + $0x30] sm:$0xf] }
  0xc4   : > { %v5323_v11 = vrot.slane %v1232_v50, 9  ;;  %v3701_v50 = vshll.u32 %v5646_v54, 16  ;;  %v3669_v25 = vshll.u32 %v5642_v57, 16  ;;  %v3707_v36 = vshll.u32 %v5647_v15, 16 }
  0xc5   : > { %v7787_v60 = vsel %vm7317_vm7, %v5322_v41, %v1326_v16  ;;  %v7803_v41 = vsel %vm7317_vm7, %v1321_v31, %v1322_v28  ;;  %v1335_v31 = vrot.slane %v1333_v62, 4  ;;  %v3698_v28 = vshrl.u32 %v5646_v54, 16 }
  0xc6   : > { %v7845_v35 = vrot.slane %v3707_v36, 5 }
  0xc8   : > { %6317 = vmatmul.mubr.msk.bf16.gmra.mrb[4].mxu0 %vm718_vm3, %v6758_v37  ;;  %v1328_v37 = vrot.slane %v1326_v16, 4  ;;  %v6815_v16 = vld [vmem:[%s7065_s11 + $0x68] sm:$0x1] }
  0xc9   : > { %6163 = vmatmul.mubr.msk.bf16.gmra.mrb[20].mxu1 %vm718_vm3, %v5294_v6  ;;  %6320 = vmatprep.mubr.msk.bf16.mxu0 %vm718_vm3, %v6760_v61  ;;  %v3655_v6 = vrot.slane %v3653_v8, 5  ;;  %v6762_v61 = vld [vmem:[%s7065_s11 + $0x54] sm:$0xff]   ;;  %v1336_v40 = vrot.slane %v6815_v16, 5  ;;  %v3683_v8 = vshll.u32 %v5644_v39, 16  ;;  %v3666_v16 = vor.u32 %v3665_v12, %v7797_v7 }
  0xca   : > { %6166 = vmatprep.mubr.msk.bf16.mxu1 %vm718_vm3, %v5295_v9  ;;  %v3674_v9 = vshrl.u32 %v5643_v24, 16  ;;  %v7812_v44 = vsel %vm7317_vm7, %v1328_v37, %v1329_v55  ;;  %v1343_v24 = vrot.slane %v6817_v17, 5  ;;  %v3711_v39 = vshrl.u32 %v5647_v15, 16 }
  0xcb   : > { %v3656_v10 = vor.u32 %v3655_v6, %v3652_v43  ;;  %v7818_v37 = vrot.slane %v3683_v8, 5  ;;  %v3689_v55 = vrot.slane %v3687_v18, 4  ;;  %v8891_v43 = vcombine.low %v7422_v52, %v7433_v46  ;;  %v6818_v8 = vld [vmem:[%s7065_s11 + $0x7c] sm:$0xf]  ;;  %v7854_v18 = vld [vmem:[%s7065_s11 + $0x38] sm:$0x1] }
  0xcc   : > { %v3676_v38 = vrot.slane %v3674_v9, 4  ;;  %v7827_v17 = vsel %vm7317_vm7, %v5323_v11, %v1333_v62  ;;  %v7831_v57 = vsel %vm7317_vm7, %v1335_v31, %v1336_v40  ;;  %v3700_v6 = vrot.slane %v3698_v28, 4  ;;  %8893 = vst [vmem:[#allocation12_spill] sm:$0xff] %v7854_v18 }
  0xcd   : > { %v3703_v12 = vrot.slane %v3701_v50, 5  ;;  %v8892_v52 = vcombine.low %v7454_v33, %v7459_v56  ;;  %v3657_v46 = vrot.slane %v3656_v10, 4  ;;  %v3667_v54 = vrot.slane %v3666_v16, 4  ;;  %v6766_v33 = vld [vmem:[%s7065_s11 + $0x6c] sm:$0xff]   ;;  %v1235_v16 = vld [vmem:[%s7065_s11 + $0x84] sm:$0xe] }
  0xce   : > { %v3693_v62 = vshll.u32 %v5645_v20, 16  ;;  %v7839_v11 = vsel %vm7317_vm7, %v5324_v5, %v1340_v30  ;;  %v7843_v40 = vsel %vm7317_vm7, %v1342_v48, %v1343_v24  ;;  %v3713_v9 = vrot.slane %v3711_v39, 4  ;;  %v6767_v48 = vld [vmem:[%s7065_s11 + $0x78] sm:$0xff]  }
  0xcf   : > { %v3680_v10 = vor.u32 %v3679_v27, %v3676_v38  ;;  %v3690_v20 = vor.u32 %v3689_v55, %v7818_v37  ;;  %v1347_v30 = vrot.slane %v6818_v8, 5  ;;  %v3704_v38 = vor.u32 %v3703_v12, %v3700_v6  ;;  %v5649_v5 = vld [vmem:[%s7065_s11 + $0x3c] sm:$0xf] }
  0xd0   : > { %6321 = vmatmul.mubr.msk.bf16.gmra.mrb[8].mxu0 %vm718_vm3, %v6762_v61  ;;  %v3671_v61 = vrot.slane %v3669_v25, 5  ;;  %v1234_v25 = vld [vmem:[%s7065_s11 + $0x78] sm:$0xe]  ;;  %v7870_v50 = vrot.slane %v3693_v62, 5  ;;  %v3714_v39 = vor.u32 %v3713_v9, %v7845_v35  ;;  %v3717_v55 = vshll.u32 %v7854_v18, 16 }
  0xd1   : > { %6167 = vmatmul.mubr.msk.bf16.gmra.mrb[24].mxu1 %vm718_vm3, %v8891_v43  ;;  %6324 = vmatprep.mubr.msk.bf16.mxu0 %vm718_vm3, %v6764_v21  ;;  %v3662_v21 = vsel %vm7091_vm4, %v3657_v46, %v7797_v7  ;;  %v5325_v24 = vrot.slane %v1234_v25, 9  ;;  %v6819_v43 = vld [vmem:[%s7065_s11 + $0x88] sm:$0xf]  ;;  %v7878_v7 = vld [vmem:[%s7065_s11 + $0x40] sm:$0xf]  ;;  %v3681_v12 = vrot.slane %v3680_v10, 4  ;;  %v8895_v62 = vcombine.low %v7474_v14, %v7483_v42 }
  0xd2   : > { %6170 = vmatprep.mubr.msk.bf16.mxu1 %vm718_vm3, %v8892_v52  ;;  %v3672_v31 = vsel %vm7091_vm4, %v3667_v54, %v3671_v61  ;;  %v1354_v6 = vrot.slane %v6819_v43, 5  ;;  %8894 = vst [vmem:[#allocation13_spill] sm:$0xff] %v7878_v7  ;;  %v3691_v52 = vrot.slane %v3690_v20, 4  ;;  %v1349_v46 = vrot.slane %v1347_v30, 4  ;;  %v6820_v54 = vld [vmem:[%s7065_s11 + $0x80] sm:$0x1] }
  0xd3   : > { %v1350_v61 = vrot.slane %v6820_v54, 5  ;;  %v3705_v9 = vrot.slane %v3704_v38, 4  ;;  %v5326_v25 = vrot.slane %v1235_v16, 9  ;;  %v3722_v8 = vshrl.u32 %v5649_v5, 16  ;;  %v6768_v10 = vld [vmem:[%s7065_s11 + $0x84] sm:$0xff]  }
  0xd4   : > { %v3725_v43 = vshll.u32 %v5649_v5, 16  ;;  %v7892_v20 = vcombine.low %v3662_v21, %v3672_v31  ;;  %v7896_v14 = vsel %vm767_vm0, %v7696_v26, 0  ;;  %v3735_v38 = vshrl.u32 %v7878_v7, 16  ;;  %v6769_v21 = vld [vmem:[%s7065_s11 + $0x90] sm:$0xff]   ;;  %v6825_v18 = vld [vmem:[%s7065_s11 + $0xa0] sm:$0xf] }
  0xd5   : > { %v3715_v16 = vrot.slane %v3714_v39, 4  ;;  %v3719_v5 = vrot.slane %v3717_v55, 5  ;;  %v1356_v54 = vrot.slane %v1354_v6, 4  ;;  %v3686_v31 = vsel %vm7091_vm4, %v3681_v12, %v7818_v37 }
  0xd6   : > { %v3696_v26 = vsel %vm7091_vm4, %v3691_v52, %v7870_v50  ;;  %v7911_v39 = vsel %vm7317_vm7, %v5325_v24, %v1347_v30  ;;  %v7915_v55 = vsel %vm7317_vm7, %v1349_v46, %v1350_v61  ;;  %v3710_v37 = vsel %vm7091_vm4, %v3705_v9, %v7845_v35  ;;  %v5655_v30 = vld [vmem:[%s7065_s11 + $0x54] sm:$0xf]  ;;  %v7932_v24 = vld [vmem:[%s7065_s11 + $0x58] sm:$0xf]  ;;  %v7937_v61 = vld [vmem:[%s7065_s11 + $0x90] sm:$0xe] }
  0xd7   : > { %v7928_v12 = vsel %vm7317_vm7, %v5326_v25, %v1354_v6  ;;  %v3724_v50 = vrot.slane %v3722_v8, 4  ;;  %v3727_v52 = vrot.slane %v3725_v43, 5  ;;  %v3737_v46 = vrot.slane %v3735_v38, 4 }
  0xd8   : > { %6325 = vmatmul.mubr.msk.bf16.gmra.mrb[12].mxu0 %vm718_vm3, %v6766_v33  ;;  %v8896_v33 = vcombine.low %v7681_v0, %v7700_v23  ;;  %v6821_v0 = vld [vmem:[%s7065_s11 + $0x8c] sm:$0x1]  ;;  %v3720_v36 = vsel %vm7091_vm4, %v3715_v16, %v3719_v5  ;;  %v3770_v25 = vshrl.u32 %v5655_v30, 16  ;;  %v3773_v8 = vshll.u32 %v5655_v30, 16 }
  0xd9   : > { %6171 = vmatmul.mubr.msk.bf16.gmra.mrb[28].mxu1 %vm718_vm3, %v8895_v62  ;;  %6328 = vmatprep.mubr.msk.bf16.mxu0 %vm718_vm3, %v6767_v48  ;;  %v3731_v48 = vshll.u32 %v7878_v7, 16  ;;  %v1357_v23 = vrot.slane %v6821_v0, 5  ;;  %v5652_v62 = vld [vmem:[%s7065_s11 + $0x48] sm:$0xf]  ;;  %v7921_v0 = vld [vmem:[%s7065_s11 + $0x4c] sm:$0xf]  ;;  %v8898_v38 = vcombine.low %v7685_v29, %v7689_v53  ;;  %v7955_v16 = vcombine.low %v3686_v31, %v3696_v26 }
  0xda   : > { %6176 = vmatprep.mubr.msk.bf16.mxu1 %vm718_vm3, %v8896_v33  ;;  %v7918_v33 = vld [vmem:[%s7065_s11 + $0x44] sm:$0x1]  ;;  %v3746_v27 = vshrl.u32 %v5652_v62, 16  ;;  %v3749_v15 = vshll.u32 %v5652_v62, 16  ;;  %v3755_v6 = vshll.u32 %v7921_v0, 16  ;;  %v3759_v9 = vshrl.u32 %v7921_v0, 16 }
  0xdb   : > { %8897 = vst [vmem:[#allocation14_spill] sm:$0xff] %v7918_v33  ;;  %v7934_v28 = vrot.slane %v3731_v48, 5  ;;  %v7943_v35 = vsel %vm7317_vm7, %v1356_v54, %v1357_v23  ;;  %v3779_v43 = vshll.u32 %v7932_v24, 16  ;;  %v3783_v48 = vshrl.u32 %v7932_v24, 16  ;;  %v5658_v31 = vld [vmem:[%s7065_s11 + $0x60] sm:$0xf] }
  0xdc   : > { %v3741_v5 = vshll.u32 %v7918_v33, 16  ;;  %v5327_v54 = vrot.slane %v7937_v61, 9  ;;  %v8899_v23 = vcombine.low %v7726_v34, %v7742_v4  ;;  %v7966_v29 = vcombine.low %v3710_v37, %v3720_v36  ;;  %v6770_v26 = vld [vmem:[%s7065_s11 + $0x9c] sm:$0xff]   ;;  %v6771_v30 = vld [vmem:[%s7065_s11 + $0xa8] sm:$0xff]  }
  0xdd   : > { %v3728_v53 = vor.u32 %v3727_v52, %v3724_v50  ;;  %v3748_v62 = vrot.slane %v3746_v27, 4  ;;  %v7977_v34 = vrot.slane %v3755_v6, 5  ;;  %v3761_v4 = vrot.slane %v3759_v9, 4  ;;  %v6822_v36 = vld [vmem:[%s8865_s1 + $0x8] sm:$0x3] }
  0xde   : > { %v3772_v27 = vrot.slane %v3770_v25, 4  ;;  %v3775_v37 = vrot.slane %v3773_v8, 5  ;;  %v7986_v50 = vrot.slane %v3779_v43, 5  ;;  %v3785_v52 = vrot.slane %v3783_v48, 4  ;;  %v6823_v6 = vld [vmem:[%s7065_s11 + $0x94] sm:$0xf] }
  0xdf   : > { %v7992_v9 = vld [vmem:[%s7065_s11 + $0x64] sm:$0xf]  ;;  %v3794_v61 = vshrl.u32 %v5658_v31, 16  ;;  %v7994_v22 = vrot.slane %v3728_v53, 4  ;;  %v1368_v25 = vrot.slane %v6825_v18, 5  ;;  %v3762_v43 = vor.u32 %v3761_v4, %v7977_v34 }
  0xe0   : > { %6329 = vmatmul.mubr.msk.bf16.gmra.mrb[16].mxu0 %vm718_vm3, %v6768_v10  ;;  %8900 = vst [vmem:[#allocation15_spill] sm:$0xff] %v7992_v9  ;;  %v3797_v10 = vshll.u32 %v5658_v31, 16  ;;  %v3776_v31 = vor.u32 %v3775_v37, %v3772_v27  ;;  %v3786_v53 = vor.u32 %v3785_v52, %v7986_v50  ;;  %v8901_v18 = vcombine.low %v7733_v19, %v7746_v58  ;;  %v6772_v37 = vld [vmem:[%s7065_s11 + $0xb4] sm:$0xff]  }
  0xe1   : > { %6177 = vmatmul.mubr.msk.bf16.vlgmr.msra.gmra.mrb[0].mxu1 %vm718_vm3, %v8898_v38  ;;  %6332 = vmatprep.mubr.msk.bf16.mxu0 %vm718_vm3, %v6769_v21  ;;  %v3751_v21 = vrot.slane %v3749_v15, 5  ;;  %v7975_v38 = vld [vmem:[%s7065_s11 + $0x50] sm:$0x1]  ;;  %v7984_v15 = vld [vmem:[%s7065_s11 + $0x5c] sm:$0x1]  ;;  %v8902_v27 = vcombine.low %v7751_v2, %v7755_v1  ;;  %v1370_v52 = vrot.slane %v1368_v25, 4 }
  0xe2   : > { %6209 = vmatpush3.bf16.msra.mxu1 %v7722_v49  ;;  %6180 = vmatprep.mubr.msk.bf16.mxu1 %vm718_vm3, %v8899_v23  ;;  %v3738_v49 = vor.u32 %v3737_v46, %v7934_v28  ;;  %v7988_v46 = vrot.slane %v3741_v5, 5  ;;  %v1361_v23 = vrot.slane %v6823_v6, 5  ;;  %v3765_v48 = vshll.u32 %v7975_v38, 16  ;;  %v1237_v5 = vld [vmem:[%s7065_s11 + $0x9c] sm:$0xe] }
  0xe3   : > { %6675 = vmatprep.subr.msk.bf16.mxu1 %vm767_vm0, %v6822_v36  ;;  %v6824_v36 = vld [vmem:[%s7065_s11 + $0x98] sm:$0x1]  ;;  %v3752_v7 = vor.u32 %v3751_v21, %v3748_v62  ;;  %v3789_v6 = vshll.u32 %v7984_v15, 16  ;;  %v3807_v62 = vshrl.u32 %v7992_v9, 16  ;;  %v3799_v4 = vrot.slane %v3797_v10, 5 }
  0xe4   : > { %v1364_v33 = vrot.slane %v6824_v36, 5  ;;  %v3739_v8 = vrot.slane %v3738_v49, 4  ;;  %v3803_v36 = vshll.u32 %v7992_v9, 16  ;;  %v8013_v21 = vsel %vm7317_vm7, %v5327_v54, %v1361_v23  ;;  %v8024_v2 = vld [vmem:[%s7065_s11 + $0x68] sm:$0x1] }
  0xe5   : > { %v3796_v49 = vrot.slane %v3794_v61, 4  ;;  %v3753_v19 = vrot.slane %v3752_v7, 4  ;;  %v5328_v58 = vrot.slane %v1237_v5, 9  ;;  %v3763_v3 = vrot.slane %v3762_v43, 4  ;;  %8903 = vst [vmem:[#allocation16_spill] sm:$0xff] %v8024_v2  ;;  %v6773_v5 = vld [vmem:[%s7065_s11 + $0xc0] sm:$0xff]  }
  0xe6   : > { %v3767_v54 = vrot.slane %v3765_v48, 5  ;;  %v3791_v63 = vrot.slane %v3789_v6, 5  ;;  %v1375_v61 = vrot.slane %v7459_v56, 5  ;;  %v3777_v10 = vrot.slane %v3776_v31, 4  ;;  %v1239_v31 = vld [vmem:[%s7065_s11 + $0xb4] sm:$0xe] }
  0xe7   : > { %v3787_v51 = vrot.slane %v3786_v53, 4  ;;  %v8026_v1 = vrot.slane %v3803_v36, 5  ;;  %v3809_v7 = vrot.slane %v3807_v62, 4  ;;  %v3734_v43 = vsel %vm7091_vm4, %v7994_v22, %v7934_v28  ;;  %v6827_v62 = vld [vmem:[%s7065_s11 + $0xb0] sm:$0x1] }
  0xe8   : > { %6333 = vmatmul.mubr.msk.bf16.gmra.mrb[20].mxu0 %vm718_vm3, %v6770_v26  ;;  %v1363_v26 = vrot.slane %v1361_v23, 4  ;;  %v1238_v23 = vld [vmem:[%s7065_s11 + $0xa8] sm:$0xe]  ;;  %v3744_v48 = vsel %vm7091_vm4, %v3739_v8, %v7988_v46  ;;  %v3800_v6 = vor.u32 %v3799_v4, %v3796_v49  ;;  %v3758_v53 = vsel %vm7091_vm4, %v3753_v19, %v7977_v34  ;;  %v5661_v46 = vld [vmem:[%s7065_s11 + $0x6c] sm:$0xf] }
  0xe9   : > { %6181 = vmatmul.mubr.msk.bf16.gmra.mrb[4].mxu1 %vm718_vm3, %v8901_v18  ;;  %6336 = vmatprep.mubr.msk.bf16.mxu0 %vm718_vm3, %v6771_v30  ;;  %v6826_v18 = vld [vmem:[%s7065_s11 + $0xa4] sm:$0x1]  ;;  %v8046_v36 = vsel %vm7317_vm7, %v5328_v58, %v1368_v25  ;;  %v5329_v28 = vrot.slane %v1238_v23, 9  ;;  %v1377_v8 = vrot.slane %v1375_v61, 4  ;;  %v3813_v49 = vshll.u32 %v8024_v2, 16 }
  0xea   : > { %6184 = vmatprep.mubr.msk.bf16.mxu1 %vm718_vm3, %v8902_v27  ;;  %v1371_v30 = vrot.slane %v6826_v18, 5  ;;  %v8038_v56 = vsel %vm7317_vm7, %v1363_v26, %v1364_v33  ;;  %v3768_v33 = vsel %vm7091_vm4, %v3763_v3, %v3767_v54  ;;  %v1378_v26 = vrot.slane %v6827_v62, 5  ;;  %v5664_v18 = vld [vmem:[%s7065_s11 + $0x78] sm:$0xf]  ;;  %v8101_v54 = vld [vmem:[%s7065_s11 + $0xbc] sm:$0x1] }
  0xeb   : > { %v3782_v34 = vsel %vm7091_vm4, %v3777_v10, %v7986_v50  ;;  %v3792_v25 = vsel %vm7091_vm4, %v3787_v51, %v3791_v63  ;;  %v3810_v4 = vor.u32 %v3809_v7, %v8026_v1  ;;  %v5330_v27 = vrot.slane %v1239_v31, 9  ;;  %v8075_v51 = vld [vmem:[%s7065_s11 + $0x70] sm:$0xf]  ;;  %v8105_v10 = vld [vmem:[%s7065_s11 + $0x7c] sm:$0xf] }
  0xec   : > { %v8050_v22 = vsel %vm7317_vm7, %v1370_v52, %v1371_v30  ;;  %v8905_v3 = vcombine.low %v7768_v45, %v7772_v59  ;;  %v8071_v19 = vrot.slane %v3800_v6, 4  ;;  %v1382_v50 = vrot.slane %v7483_v42, 5  ;;  %8906 = vst [vmem:[#allocation18_spill] sm:$0xff] %v8075_v51  ;;  %8908 = vst [vmem:[#allocation19_spill] sm:$0xff] %v8105_v10  ;;  %v5667_v7 = vld [vmem:[%s7065_s11 + $0x84] sm:$0xf] }
  0xed   : > { %8904 = vst [vmem:[#allocation17_spill] sm:$0xff] %v8050_v22  ;;  %v3818_v63 = vshrl.u32 %v5661_v46, 16  ;;  %v8907_v45 = vcombine.low %v7776_v47, %v7803_v41  ;;  %v8083_v58 = vcombine.low %v3758_v53, %v3768_v33  ;;  %v8089_v42 = vsel %vm7317_vm7, %v5329_v28, %v1375_v61  ;;  %v6774_v61 = vld [vmem:[%s7065_s11 + $0xcc] sm:$0xff]   ;;  %v8117_v31 = vld [vmem:[%s7065_s11 + $0x88] sm:$0xf] }
  0xee   : > { %v8092_v30 = vcombine.low %v3782_v34, %v3792_v25  ;;  %v8096_v47 = vsel %vm7317_vm7, %v1377_v8, %v1378_v26  ;;  %v8098_v41 = vrot.slane %v3813_v49, 5  ;;  %v3827_v6 = vshll.u32 %v8075_v51, 16  ;;  %8909 = vst [vmem:[#allocation20_spill] sm:$0xff] %v8117_v31  ;;  %v5670_v62 = vld [vmem:[%s7065_s11 + $0x90] sm:$0xf] }
  0xef   : > { %v8123_v28 = vrot.slane %v1382_v50, 4  ;;  %v8125_v33 = vrot.slane %v3818_v63, 4  ;;  %v3831_v8 = vshrl.u32 %v8075_v51, 16  ;;  %v3842_v26 = vshrl.u32 %v5664_v18, 16  ;;  %v8132_v25 = vld [vmem:[%s7065_s11 + $0x94] sm:$0xf] }
  0xf0   : > { %6337 = vmatmul.mubr.msk.bf16.gmra.mrb[24].mxu0 %vm718_vm3, %v6772_v37  ;;  %v8069_v37 = vcombine.low %v3734_v43, %v3744_v48  ;;  %v8113_v43 = vsel %vm7317_vm7, %v5330_v27, %v1382_v50  ;;  %v3821_v48 = vshll.u32 %v5661_v46, 16  ;;  %v3845_v49 = vshll.u32 %v5664_v18, 16  ;;  %8910 = vst [vmem:[#allocation21_spill] sm:$0xff] %v8132_v25  ;;  %v8170_v2 = vld [vmem:[%s7065_s11 + $0x8c] sm:$0x1] }
  0xf1   : > { %6185 = vmatmul.mubr.msk.bf16.gmra.mrb[8].mxu1 %vm718_vm3, %v8905_v3  ;;  %6340 = vmatprep.mubr.msk.bf16.mxu0 %vm718_vm3, %v6773_v5  ;;  %v8109_v5 = vrot.slane %v3810_v4, 4  ;;  %v3851_v46 = vshll.u32 %v8105_v10, 16  ;;  %v3855_v34 = vshrl.u32 %v8105_v10, 16  ;;  %v3866_v4 = vshrl.u32 %v5667_v7, 16 }
  0xf2   : > { %6188 = vmatprep.mubr.msk.bf16.mxu1 %vm718_vm3, %v8907_v45  ;;  %v3869_v27 = vshll.u32 %v5667_v7, 16  ;;  %v3875_v3 = vshll.u32 %v8117_v31, 16  ;;  %v3879_v50 = vshrl.u32 %v8117_v31, 16  ;;  %v8142_v45 = vld [vmem:[%s7065_s11 + $0x74] sm:$0x1]  ;;  %v3823_v18 = vrot.slane %v3821_v48, 5 }
  0xf3   : > { %v3890_v52 = vshrl.u32 %v5670_v62, 16  ;;  %v3893_v53 = vshll.u32 %v5670_v62, 16  ;;  %v8911_v7 = vcombine.low %v7787_v60, %v7812_v44  ;;  %v3833_v59 = vrot.slane %v3831_v8, 4  ;;  %v5673_v48 = vld [vmem:[%s7065_s11 + $0x9c] sm:$0xf] }
  0xf4   : > { %v3899_v63 = vshll.u32 %v8132_v25, 16  ;;  %v3903_v23 = vshrl.u32 %v8132_v25, 16  ;;  %v8912_v62 = vcombine.low %v7827_v17, %v7831_v57  ;;  %v8160_v44 = vld [vmem:[%s7065_s11 + $0x80] sm:$0x1]  ;;  %v3844_v60 = vrot.slane %v3842_v26, 4 }
  0xf5   : > { %8913 = vst [vmem:[#allocation22_spill] sm:$0xff] %v8160_v44  ;;  %v3868_v31 = vrot.slane %v3866_v4, 4  ;;  %v3871_v8 = vrot.slane %v3869_v27, 5  ;;  %v8164_v10 = vrot.slane %v3875_v3, 5  ;;  %v3881_v51 = vrot.slane %v3879_v50, 4 }
  0xf6   : > { %v8167_v25 = vld [vmem:[%s7065_s11 + $0xa0] sm:$0xf]  ;;  %v3892_v17 = vrot.slane %v3890_v52, 4  ;;  %v3895_v57 = vrot.slane %v3893_v53, 5  ;;  %v3917_v9 = vshll.u32 %v5673_v48, 16  ;;  %v3824_v26 = vor.u32 %v3823_v18, %v8125_v33 }
  0xf7   : > { %v3861_v27 = vshll.u32 %v8160_v44, 16  ;;  %v8179_v3 = vld [vmem:[%s7065_s11 + $0x98] sm:$0x1]  ;;  %v3923_v50 = vshll.u32 %v8167_v25, 16  ;;  %v3927_v52 = vshrl.u32 %v8167_v25, 16  ;;  %v3872_v22 = vor.u32 %v3871_v8, %v3868_v31 }
  0xf8   : > { %6341 = vmatmul.mubr.msk.bf16.gmra.mrb[28].mxu0 %vm718_vm3, %v6774_v61  ;;  %v8150_v61 = vrot.slane %v3827_v6, 5  ;;  %v3857_v6 = vrot.slane %v3855_v34, 4  ;;  %v3905_v34 = vrot.slane %v3903_v23, 4  ;;  %v3885_v33 = vshll.u32 %v8170_v2, 16 }
  0xf9   : > { %6189 = vmatmul.mubr.msk.bf16.gmra.mrb[12].mxu1 %vm718_vm3, %v8911_v7  ;;  %6346 = vmatprep.mubr.msk.bf16.mxu0 %vm718_vm3, %v7892_v20  ;;  %v3847_v7 = vrot.slane %v3845_v49, 5  ;;  %v8162_v20 = vrot.slane %v3851_v46, 5  ;;  %v3837_v49 = vshll.u32 %v8142_v45, 16  ;;  %v8174_v46 = vrot.slane %v3899_v63, 5 }
  0xfa   : > { %6192 = vmatprep.mubr.msk.bf16.mxu1 %vm718_vm3, %v8912_v62  ;;  %v3914_v62 = vshrl.u32 %v5673_v48, 16  ;;  %v3834_v4 = vor.u32 %v3833_v59, %v8150_v61  ;;  %v3882_v23 = vor.u32 %v3881_v51, %v8164_v10  ;;  %v3896_v59 = vor.u32 %v3895_v57, %v3892_v17  ;;  %v8212_v57 = vld [vmem:[%s7065_s11 + $0xa4] sm:$0x1] }
  0xfb   : > { %v3848_v53 = vor.u32 %v3847_v7, %v3844_v60  ;;  %v3858_v48 = vor.u32 %v3857_v6, %v8162_v20  ;;  %v3919_v18 = vrot.slane %v3917_v9, 5  ;;  %v8914_v44 = vcombine.low %v7839_v11, %v7843_v40 }
  0xfc   : > { %v3916_v63 = vrot.slane %v3914_v62, 4  ;;  %v8915_v31 = vrot.slane %v8101_v54, 5  ;;  %v3839_v51 = vrot.slane %v3837_v49, 5  ;;  %v3906_v60 = vor.u32 %v3905_v34, %v8174_v46  ;;  %v8215_v34 = vld [vmem:[%s7065_s11 + $0xac] sm:$0xf] }
  0xfd   : > { %v3909_v9 = vshll.u32 %v8179_v3, 16  ;;  %v8916_v11 = vcombine.low %v7911_v39, %v7915_v55  ;;  %v3825_v40 = vrot.slane %v3824_v26, 4  ;;  %v8208_v54 = vrot.slane %v3923_v50, 5 }
  0xfe   : > { %v3849_v7 = vrot.slane %v3848_v53, 4  ;;  %v3859_v6 = vrot.slane %v3858_v48, 4  ;;  %v3863_v8 = vrot.slane %v3861_v27, 5  ;;  %v3887_v17 = vrot.slane %v3885_v33, 5  ;;  %v8225_v48 = vld [vmem:[%s7065_s11 + $0xb0] sm:$0x1] }
  0xff   : > { %v3873_v39 = vrot.slane %v3872_v22, 4  ;;  %v3883_v55 = vrot.slane %v3882_v23, 4  ;;  %v3897_v62 = vrot.slane %v3896_v59, 4  ;;  %v3920_v49 = vor.u32 %v3919_v18, %v3916_v63 }
 0x100   : > { %6347 = vmatmul.mubr.msk.bf16.vlgmr.msra.gmra.mrb[0].mxu0 %vm718_vm3, %v7955_v16  ;;  %v8198_v16 = vsel %vm7317_vm7, %v8123_v28, %v8915_v31  ;;  %v3929_v28 = vrot.slane %v3927_v52, 4  ;;  %v3911_v26 = vrot.slane %v3909_v9, 5  ;;  %v3830_v52 = vsel %vm7091_vm4, %v3825_v40, %v8150_v61 }
 0x101   : > { %6193 = vmatmul.mubr.msk.bf16.gmra.mrb[16].mxu1 %vm718_vm3, %v8914_v44  ;;  %6379 = vmatpush3.bf16.msra.mxu0 %v7896_v14  ;;  %v3835_v14 = vrot.slane %v3834_v4, 4  ;;  %v5676_v44 = vld [vmem:[%s7065_s11 + $0xa8] sm:$0xf]  ;;  %v3933_v22 = vshll.u32 %v8212_v57, 16  ;;  %v3854_v33 = vsel %vm7091_vm4, %v3849_v7, %v8162_v20  ;;  %v3864_v23 = vsel %vm7091_vm4, %v3859_v6, %v3863_v8 }
 0x102   : > { %6196 = vmatprep.mubr.msk.bf16.mxu1 %vm718_vm3, %v8916_v11  ;;  %6350 = vmatprep.mubr.msk.bf16.mxu0 %vm718_vm3, %v7966_v29  ;;  %v3907_v29 = vrot.slane %v3906_v60, 4  ;;  %v3938_v4 = vshrl.u32 %v5676_v44, 16  ;;  %v3941_v50 = vshll.u32 %v5676_v44, 16  ;;  %v3930_v53 = vor.u32 %v3929_v28, %v8208_v54  ;;  %v5725_v11 = vld [vmem:[%s7065_s11 + $0x48] sm:$0xe] }
 0x103   : > { %v3840_v27 = vsel %vm7091_vm4, %v3835_v14, %v3839_v51  ;;  %v3947_v59 = vshll.u32 %v8215_v34, 16  ;;  %v3951_v61 = vshrl.u32 %v8215_v34, 16  ;;  %v3878_v63 = vsel %vm7091_vm4, %v3873_v39, %v8164_v10  ;;  %v8290_v39 = vld [vmem:[%s7065_s11 + $0xb8] sm:$0xf] }
 0x104   : > { %v3888_v18 = vsel %vm7091_vm4, %v3883_v55, %v3887_v17  ;;  %v3902_v20 = vsel %vm7091_vm4, %v3897_v62, %v8174_v46  ;;  %v3921_v31 = vrot.slane %v3920_v49, 4  ;;  %v8917_v51 = vcombine.low %v7928_v12, %v7943_v35 }
 0x105   : > { %v3940_v10 = vrot.slane %v3938_v4, 4  ;;  %v3943_v60 = vrot.slane %v3941_v50, 5  ;;  %v3957_v9 = vshll.u32 %v8225_v48, 16  ;;  %v8918_v46 = vcombine.low %v8013_v21, %v8038_v56  ;;  %v5679_v21 = vld [vmem:[%s7065_s11 + $0xb4] sm:$0xf] }
 0x106   : > { %v5346_v12 = vcombine.low %v8089_v42, %v8096_v47  ;;  %v8919_v35 = vsel %vm7091_vm4, %v8109_v5, %v8098_v41  ;;  %v3931_v14 = vrot.slane %v3930_v53, 4  ;;  %v3935_v28 = vrot.slane %v3933_v22, 5  ;;  %v5727_v4 = vld [vmem:[%s7065_s11 + $0x60] sm:$0xe]  ;;  %v5728_v53 = vld [vmem:[%s7065_s11 + $0x6c] sm:$0xe] }
 0x107   : > { %v5347_v56 = vcombine.low %v8113_v43, %v8198_v16  ;;  %v8273_v44 = vcombine.low %v3830_v52, %v3840_v27  ;;  %v8275_v42 = vrot.slane %v3947_v59, 5  ;;  %v3953_v47 = vrot.slane %v3951_v61, 4  ;;  %v8928_v16 = vld [vmem:[#allocation10_spill] sm:$0xff] }
 0x108   : > { %6351 = vmatmul.mubr.msk.bf16.gmra.mrb[4].mxu0 %vm718_vm3, %v8069_v37  ;;  %v3912_v37 = vsel %vm7091_vm4, %v3907_v29, %v3911_v26  ;;  %v8277_v41 = vcombine.low %v3854_v33, %v3864_v23  ;;  %v8279_v5 = vcombine.low %v3878_v63, %v3888_v18  ;;  %v3926_v6 = vsel %vm7091_vm4, %v3921_v31, %v8208_v54  ;;  %v8921_v23 = vld [vmem:[#allocation17_spill] sm:$0xff]  ;;  %v5682_v63 = vld [vmem:[%s7065_s11 + $0xc0] sm:$0xf]  ;;  %v8923_v18 = vld [vmem:[#allocation15_spill] sm:$0xff] }
 0x109   : > { %6197 = vmatmul.mubr.msk.bf16.gmra.mrb[20].mxu1 %vm718_vm3, %v8917_v51  ;;  %6354 = vmatprep.mubr.msk.bf16.mxu0 %vm718_vm3, %v8083_v58  ;;  %v8920_v58 = vsel %vm7091_vm4, %v8071_v19, %v8026_v1  ;;  %v8281_v7 = vcombine.low %v3902_v20, %v3912_v37  ;;  %v5741_v1 = vrot.slane %v5725_v11, 9  ;;  %v5726_v19 = vld [vmem:[%s7065_s11 + $0x54] sm:$0xe]  ;;  %v3944_v8 = vor.u32 %v3943_v60, %v3940_v10 }
 0x10a   : > { %6200 = vmatprep.mubr.msk.bf16.mxu1 %vm718_vm3, %v8918_v46  ;;  %v5695_v40 = vcombine.low %v8920_v58, %v8919_v35  ;;  %v8287_v17 = vrot.slane %v3957_v9, 5  ;;  %v3962_v55 = vshrl.u32 %v5679_v21, 16  ;;  %v3936_v62 = vsel %vm7091_vm4, %v3931_v14, %v3935_v28  ;;  %v8924_v31 = vld [vmem:[#allocation16_spill] sm:$0xff]  ;;  %v8925_v9 = vld [vmem:[#allocation18_spill] sm:$0xff]  ;;  %v8339_v35 = vld [vmem:[%s7065_s11 + $0xbc] sm:$0x1] }
 0x10b   : > { %v3965_v49 = vshll.u32 %v5679_v21, 16  ;;  %v4421_v29 = vrot.slane %v7921_v0, 5  ;;  %v4424_v26 = vrot.slane %v7975_v38, 5  ;;  %v3954_v50 = vor.u32 %v3953_v47, %v8275_v42  ;;  %v8342_v58 = vld [vmem:[%s7065_s11 + $0xc4] sm:$0xf] }
 0x10c   : > { %v5742_v52 = vrot.slane %v5726_v19, 9  ;;  %v4428_v54 = vrot.slane %v7932_v24, 5  ;;  %v4431_v27 = vrot.slane %v7984_v15, 5  ;;  %v3971_v22 = vshll.u32 %v8290_v39, 16  ;;  %v5729_v19 = vld [vmem:[%s7065_s11 + $0x78] sm:$0xe] }
 0x10d   : > { %v3975_v33 = vshrl.u32 %v8290_v39, 16  ;;  %v8307_v0 = vsel %vm7317_vm7, %v5741_v1, %v4421_v29  ;;  %v4423_v38 = vrot.slane %v4421_v29, 4  ;;  %v8922_v59 = vcombine.low %v8046_v36, %v8921_v23  ;;  %v8926_v23 = vld [vmem:[#allocation19_spill] sm:$0xff] }
 0x10e   : > { %v8314_v24 = vcombine.low %v3926_v6, %v3936_v62  ;;  %v8318_v15 = vsel %vm7317_vm7, %v5742_v52, %v4428_v54  ;;  %v5743_v61 = vrot.slane %v5727_v4, 9  ;;  %v4435_v20 = vrot.slane %v8923_v18, 5  ;;  %v6775_v6 = vld [vmem:[%s7065_s11 + $0xc] sm:$0xff]  }
 0x10f   : > { %v8324_v36 = vsel %vm7317_vm7, %v4423_v38, %v4424_v26  ;;  %v4438_v51 = vrot.slane %v8924_v31, 5  ;;  %v5744_v37 = vrot.slane %v5728_v53, 9  ;;  %v4442_v11 = vrot.slane %v8925_v9, 5 }
 0x110   : > { %6355 = vmatmul.mubr.msk.bf16.gmra.mrb[8].mxu0 %vm718_vm3, %v8092_v30  ;;  %v4430_v30 = vrot.slane %v4428_v54, 4  ;;  %v5758_v10 = vcombine.low %v8307_v0, %v8324_v36  ;;  %v4445_v46 = vrot.slane %v8142_v45, 5  ;;  %v8348_v14 = vsel %vm7317_vm7, %v5743_v61, %v4435_v20 }
 0x111   : > { %6201 = vmatmul.mubr.msk.bf16.gmra.mrb[24].mxu1 %vm718_vm3, %v8922_v59  ;;  %6358 = vmatprep.mubr.msk.bf16.mxu0 %vm718_vm3, %v5695_v40  ;;  %v4437_v28 = vrot.slane %v4435_v20, 4  ;;  %v8350_v21 = vrot.slane %v3962_v55, 4  ;;  %v3986_v47 = vshrl.u32 %v5682_v63, 16  ;;  %v8354_v45 = vsel %vm7317_vm7, %v5744_v37, %v4442_v11  ;;  %v5456_v55 = vld [vmem:[%s7065_s11 + $0x78] sm:$0xf]  ;;  %v8927_v59 = vld [vmem:[#allocation22_spill] sm:$0xff] }
 0x112   : > { %6204 = vmatprep.mubr.msk.bf16.mxu1 %vm718_vm3, %v5346_v12  ;;  %v8332_v60 = vsel %vm7317_vm7, %v4430_v30, %v4431_v27  ;;  %v8336_v12 = vrot.slane %v3944_v8, 4  ;;  %v4444_v1 = vrot.slane %v4442_v11, 4  ;;  %v8358_v8 = vrot.slane %v3954_v50, 4 }
 0x113   : > { %v5759_v40 = vcombine.low %v8318_v15, %v8332_v60  ;;  %v8360_v62 = vrot.slane %v3965_v49, 5  ;;  %v3989_v29 = vshll.u32 %v5682_v63, 16  ;;  %v8364_v26 = vsel %vm7317_vm7, %v4437_v28, %v4438_v51  ;;  %v8930_v28 = vld [vmem:[#allocation20_spill] sm:$0xff]  ;;  %v6838_v60 = vld [vmem:[%s7065_s11 + $0xa0] sm:$0xf] }
 0x114   : > { %v8367_v4 = vrot.slane %v3971_v22, 5  ;;  %v8369_v52 = vrot.slane %v3975_v33, 4  ;;  %v5760_v54 = vcombine.low %v8348_v14, %v8364_v26  ;;  %v8375_v27 = vsel %vm7317_vm7, %v4444_v1, %v4445_v46  ;;  %v5730_v33 = vld [vmem:[%s7065_s11 + $0x84] sm:$0xe]  ;;  %v6776_v1 = vld [vmem:[%s7065_s11 + $0x18] sm:$0xff]  }
 0x115   : > { %v3981_v49 = vshll.u32 %v8339_v35, 16  ;;  %v3995_v50 = vshll.u32 %v8342_v58, 16  ;;  %v5761_v53 = vcombine.low %v8354_v45, %v8375_v27  ;;  %v5745_v22 = vrot.slane %v5729_v19, 9  ;;  %v6842_v27 = vld [vmem:[%s7065_s11 + $0xac] sm:$0xf] }
 0x116   : > { %v3988_v38 = vrot.slane %v3986_v47, 4  ;;  %v4452_v30 = vrot.slane %v8927_v59, 5  ;;  %v2308_v61 = vshrl.u32 %v5456_v55, 16  ;;  %v3991_v63 = vrot.slane %v3989_v29, 5  ;;  %v5685_v29 = vld [vmem:[%s7065_s11 + $0xcc] sm:$0xf] }
 0x117   : > { %v3999_v18 = vshrl.u32 %v8342_v58, 16  ;;  %v2311_v43 = vshll.u32 %v5456_v55, 16  ;;  %v5746_v37 = vrot.slane %v5730_v33, 9  ;;  %v3950_v9 = vsel %vm7091_vm4, %v8336_v12, %v8275_v42  ;;  %v8418_v55 = vld [vmem:[%s7065_s11 + $0xd0] sm:$0xf] }
 0x118   : > { %6359 = vmatmul.mubr.msk.bf16.gmra.mrb[12].mxu0 %vm718_vm3, %v8273_v44  ;;  %v4449_v44 = vrot.slane %v8926_v23, 5  ;;  %v2310_v51 = vrot.slane %v2308_v61, 4  ;;  %v3968_v11 = vor.u32 %v8360_v62, %v8350_v21  ;;  %v4456_v47 = vrot.slane %v8930_v28, 5  ;;  %v6777_v21 = vld [vmem:[%s7065_s11 + $0x24] sm:$0xff]  }
 0x119   : > { %6205 = vmatmul.mubr.msk.bf16.gmra.mrb[28].mxu1 %vm718_vm3, %v5347_v56  ;;  %6362 = vmatprep.mubr.msk.bf16.mxu0 %vm718_vm3, %v8277_v41  ;;  %v8929_v56 = vld [vmem:[#allocation11_spill] sm:$0xff]  ;;  %v2313_v46 = vrot.slane %v2311_v43, 5  ;;  %v3960_v19 = vsel %vm7091_vm4, %v8358_v8, %v8287_v17  ;;  %v4459_v12 = vrot.slane %v8170_v2, 5  ;;  %v8426_v62 = vrot.slane %v3995_v50, 5  ;;  %v5731_v8 = vld [vmem:[%s7065_s11 + $0x90] sm:$0xe] }
 0x11a   : > { %6210 = vmatprep.mubr.msk.bf16.mxu1 %vm718_vm3, %v6775_v6  ;;  %v2330_v41 = vsel %vm7091_vm4, %v8929_v56, %v8928_v16  ;;  %v8400_v20 = vsel %vm7317_vm7, %v5745_v22, %v4449_v44  ;;  %v4451_v31 = vrot.slane %v4449_v44, 4  ;;  %v3978_v6 = vor.u32 %v8369_v52, %v8367_v4  ;;  %v8432_v52 = vld [vmem:[%s7065_s11 + $0xc8] sm:$0x1]  ;;  %v8932_v16 = vld [vmem:[#allocation8_spill] sm:$0xff] }
 0x11b   : > { %v4001_v22 = vrot.slane %v3999_v18, 4  ;;  %v2314_v17 = vor.u32 %v2313_v46, %v2310_v51  ;;  %v3983_v23 = vrot.slane %v3981_v49, 5  ;;  %v3992_v44 = vor.u32 %v3991_v63, %v3988_v38  ;;  %v8933_v51 = vld [vmem:[#allocation9_spill] sm:$0xff] }
 0x11c   : > { %v8422_v42 = vsel %vm7317_vm7, %v4451_v31, %v4452_v30  ;;  %v8436_v59 = vsel %vm7317_vm7, %v5746_v37, %v4456_v47  ;;  %v4458_v30 = vrot.slane %v4456_v47, 4  ;;  %v4010_v2 = vshrl.u32 %v5685_v29, 16 }
 0x11d   : > { %v5762_v33 = vcombine.low %v8400_v20, %v8422_v42  ;;  %v4013_v50 = vshll.u32 %v5685_v29, 16  ;;  %v4019_v61 = vshll.u32 %v8418_v55, 16  ;;  %v2315_v18 = vrot.slane %v2314_v17, 4  ;;  %v6778_v29 = vld [vmem:[%s7065_s11 + $0x30] sm:$0xff]  }
 0x11e   : > { %v4023_v49 = vshrl.u32 %v8418_v55, 16  ;;  %v8447_v38 = vsel %vm7317_vm7, %v4458_v30, %v4459_v12  ;;  %v5747_v63 = vrot.slane %v5731_v8, 9  ;;  %v4002_v56 = vor.u32 %v4001_v22, %v8426_v62 }
 0x11f   : > { %v4005_v31 = vshll.u32 %v8432_v52, 16  ;;  %v5763_v37 = vcombine.low %v8436_v59, %v8447_v38  ;;  %v5701_v46 = vcombine.low %v3950_v9, %v3960_v19  ;;  %v3969_v28 = vrot.slane %v3968_v11, 4  ;;  %v5732_v11 = vld [vmem:[%s7065_s11 + $0x9c] sm:$0xe] }
 0x120   : > { %6363 = vmatmul.mubr.msk.bf16.gmra.mrb[16].mxu0 %vm718_vm3, %v8279_v5  ;;  %v8931_v5 = vld [vmem:[#allocation21_spill] sm:$0xff]  ;;  %v3979_v47 = vrot.slane %v3978_v6, 4  ;;  %v3993_v12 = vrot.slane %v3992_v44, 4  ;;  %v4466_v8 = vrot.slane %v8179_v3, 5  ;;  %v4012_v30 = vrot.slane %v4010_v2, 4 }
 0x121   : > { %6211 = vmatmul.mubr.msk.bf16.vlgmr.msra.gmra.mrb[0].mxu1 %vm718_vm3, %v6776_v1  ;;  %6366 = vmatprep.mubr.msk.bf16.mxu0 %vm718_vm3, %v8281_v7  ;;  %v4463_v43 = vrot.slane %v8931_v5, 5  ;;  %v2320_v7 = vsel %vm7091_vm4, %v2315_v18, %v8933_v51  ;;  %v4015_v18 = vrot.slane %v4013_v50, 5  ;;  %v8470_v5 = vrot.slane %v4019_v61, 5  ;;  %v6779_v19 = vld [vmem:[%s7065_s11 + $0x3c] sm:$0xff]  }
 0x122   : > { %6413 = vmatpush3.bf16.msra.mxu1 %v8932_v16  ;;  %6214 = vmatprep.mubr.msk.bf16.mxu1 %vm718_vm3, %v6777_v21  ;;  %v8459_v1 = vcombine.low %v2320_v7, %v2330_v41  ;;  %v8463_v21 = vld [vmem:[%s7065_s11 + $0xd4] sm:$0x1]  ;;  %v4025_v9 = vrot.slane %v4023_v49, 4  ;;  %v4003_v41 = vrot.slane %v4002_v56, 4  ;;  %v4007_v6 = vrot.slane %v4005_v31, 5 }
 0x123   : > { %v8467_v22 = vsel %vm7317_vm7, %v5747_v63, %v4463_v43  ;;  %v4465_v17 = vrot.slane %v4463_v43, 4  ;;  %v3974_v63 = vsel %vm7091_vm4, %v3969_v28, %v8367_v4  ;;  %v3984_v2 = vsel %vm7091_vm4, %v3979_v47, %v3983_v23  ;;  %v6829_v16 = vld [vmem:[%s7065_s11 + $0x1c] sm:$0xf]  ;;  %v5733_v28 = vld [vmem:[%s7065_s11 + $0xa8] sm:$0xe] }
 0x124   : > { %v4029_v50 = vshll.u32 %v8463_v21, 16  ;;  %v5748_v61 = vrot.slane %v5732_v11, 9  ;;  %v4470_v49 = vrot.slane %v8167_v25, 5  ;;  %v3998_v4 = vsel %vm7091_vm4, %v3993_v12, %v8426_v62  ;;  %v5721_v62 = vld [vmem:[%s7065_s11 + $0x18] sm:$0xe]  ;;  %v6780_v47 = vld [vmem:[%s7065_s11 + $0x48] sm:$0xff]  }
 0x125   : > { %v8476_v44 = vsel %vm7317_vm7, %v4465_v17, %v4466_v8  ;;  %v4026_v43 = vor.u32 %v4025_v9, %v8470_v5  ;;  %v4473_v23 = vrot.slane %v8212_v57, 5  ;;  %v4008_v25 = vsel %vm7091_vm4, %v4003_v41, %v4007_v6  ;;  %v6830_v11 = vld [vmem:[%s7065_s11 + $0x20] sm:$0x1] }
 0x126   : > { %v5764_v3 = vcombine.low %v8467_v22, %v8476_v44  ;;  %v4393_v56 = vrot.slane %v6829_v16, 5  ;;  %v8502_v31 = vsel %vm7317_vm7, %v5748_v61, %v4470_v49  ;;  %v4472_v51 = vrot.slane %v4470_v49, 4  ;;  %v5734_v49 = vld [vmem:[%s7065_s11 + $0xb4] sm:$0xe] }
 0x127   : > { %v5702_v7 = vcombine.low %v3974_v63, %v3984_v2  ;;  %v4027_v17 = vrot.slane %v4026_v43, 4  ;;  %v5749_v41 = vrot.slane %v5733_v28, 9  ;;  %v4477_v6 = vrot.slane %v8215_v34, 5  ;;  %v5722_v2 = vld [vmem:[%s7065_s11 + $0x24] sm:$0xe] }
 0x128   : > { %6367 = vmatmul.mubr.msk.bf16.gmra.mrb[20].mxu0 %vm718_vm3, %v8314_v24  ;;  %v4016_v24 = vor.u32 %v4015_v18, %v4012_v30  ;;  %v8507_v57 = vsel %vm7317_vm7, %v4472_v51, %v4473_v23  ;;  %v6781_v30 = vld [vmem:[%s7065_s11 + $0x54] sm:$0xff]   ;;  %v5737_v18 = vrot.slane %v5721_v62, 9  ;;  %v4395_v9 = vrot.slane %v4393_v56, 4  ;;  %v6833_v28 = vld [vmem:[%s7065_s11 + $0x2c] sm:$0x1] }
 0x129   : > { %6215 = vmatmul.mubr.msk.bf16.gmra.mrb[4].mxu1 %vm718_vm3, %v6778_v29  ;;  %6370 = vmatprep.mubr.msk.bf16.mxu0 %vm718_vm3, %v5701_v46  ;;  %v4031_v46 = vrot.slane %v4029_v50, 5  ;;  %v5703_v29 = vcombine.low %v3998_v4, %v4008_v25  ;;  %v5765_v8 = vcombine.low %v8502_v31, %v8507_v57  ;;  %v4480_v63 = vrot.slane %v8225_v48, 5  ;;  %v6831_v50 = vld [vmem:[%s7065_s11 + $0x28] sm:$0xf]  ;;  %v5723_v25 = vld [vmem:[%s7065_s11 + $0x30] sm:$0xe] }
 0x12a   : > { %6218 = vmatprep.mubr.msk.bf16.mxu1 %vm718_vm3, %v6779_v19  ;;  %v4017_v12 = vrot.slane %v4016_v24, 4  ;;  %v4396_v19 = vrot.slane %v6830_v11, 5  ;;  %v4400_v61 = vrot.slane %v6831_v50, 5  ;;  %v8530_v48 = vsel %vm7317_vm7, %v5749_v41, %v4477_v6  ;;  %v6783_v11 = vld [vmem:[%s7065_s11 + $0x6c] sm:$0xff]   ;;  %v5735_v50 = vld [vmem:[%s7065_s11 + $0xc0] sm:$0xe] }
 0x12b   : > { %v4032_v34 = vsel %vm7091_vm4, %v4027_v17, %v4031_v46  ;;  %v4479_v24 = vrot.slane %v4477_v6, 4  ;;  %v4394_v43 = vsel %vm7317_vm7, %v5737_v18, %v4393_v56  ;;  %v5738_v51 = vrot.slane %v5722_v2, 9  ;;  %v8934_v41 = vld [vmem:[#allocation12_spill] sm:$0xff]  ;;  %v6847_v31 = vld [vmem:[%s7065_s11 + $0xc8] sm:$0x1] }
 0x12c   : > { %v4022_v4 = vsel %vm7091_vm4, %v4017_v12, %v8470_v5  ;;  %v4397_v23 = vsel %vm7317_vm7, %v4395_v9, %v4396_v19  ;;  %v6832_v5 = vld [vmem:[%s7065_s11 + $0x34] sm:$0xf]  ;;  %v6782_v12 = vld [vmem:[%s7065_s11 + $0x60] sm:$0xff]   ;;  %v5739_v18 = vrot.slane %v5723_v25, 9  ;;  %v4487_v9 = vrot.slane %v8339_v35, 5 }
 0x12d   : > { %v4407_v16 = vrot.slane %v6832_v5, 5  ;;  %v8541_v62 = vsel %vm7317_vm7, %v4479_v24, %v4480_v63  ;;  %v5704_v46 = vcombine.low %v4022_v4, %v4032_v34  ;;  %v5754_v17 = vcombine.low %v4394_v43, %v4397_v23  ;;  %v5724_v24 = vld [vmem:[%s7065_s11 + $0x3c] sm:$0xe] }
 0x12e   : > { %v5766_v56 = vcombine.low %v8530_v48, %v8541_v62  ;;  %v4410_v6 = vrot.slane %v8934_v41, 5  ;;  %v4401_v35 = vsel %vm7317_vm7, %v5738_v51, %v4400_v61  ;;  %v5751_v5 = vrot.slane %v5735_v50, 9 }
 0x12f   : > { %v4409_v19 = vrot.slane %v4407_v16, 4  ;;  %v4408_v23 = vsel %vm7317_vm7, %v5739_v18, %v4407_v16  ;;  %v4494_v51 = vrot.slane %v8432_v52, 5  ;;  %v2471_v57 = vshll.u32 %v6847_v31, 16 }
 0x130   : > { %6371 = vmatmul.mubr.msk.bf16.gmra.mrb[24].mxu0 %vm718_vm3, %v5702_v7  ;;  %v5750_v7 = vrot.slane %v5734_v49, 9 }
 0x131   : > { %6219 = vmatmul.mubr.msk.bf16.gmra.mrb[8].mxu1 %vm718_vm3, %v6780_v47  ;;  %6374 = vmatprep.mubr.msk.bf16.mxu0 %vm718_vm3, %v5703_v29  ;;  %v4403_v47 = vrot.slane %v6833_v28, 5  ;;  %v4484_v29 = vrot.slane %v8290_v39, 5  ;;  %v8935_v39 = vld [vmem:[#allocation13_spill] sm:$0xff]  ;;  %v4411_v25 = vsel %vm7317_vm7, %v4409_v19, %v4410_v6  ;;  %v5740_v28 = vrot.slane %v5724_v24, 9 }
 0x132   : > { %6222 = vmatprep.mubr.msk.bf16.mxu1 %vm718_vm3, %v6781_v30  ;;  %v4402_v30 = vrot.slane %v4400_v61, 4  ;;  %v4414_v49 = vrot.slane %v8935_v39, 5  ;;  %v4491_v61 = vrot.slane %v8342_v58, 5  ;;  %v6834_v39 = vld [vmem:[%s7065_s11 + $0x70] sm:$0xf]  ;;  %v4498_v24 = vrot.slane %v8418_v55, 5 }
 0x133   : > { %v8553_v63 = vsel %vm7317_vm7, %v5750_v7, %v4484_v29  ;;  %v4486_v2 = vrot.slane %v4484_v29, 4  ;;  %v5453_v7 = vld [vmem:[%s7065_s11 + $0x6c] sm:$0xf]  ;;  %v8936_v29 = vld [vmem:[#allocation14_spill] sm:$0xff] }
 0x134   : > { %v4404_v34 = vsel %vm7317_vm7, %v4402_v30, %v4403_v47  ;;  %v4416_v47 = vrot.slane %v4414_v49, 4  ;;  %v6784_v30 = vld [vmem:[%s7065_s11 + $0x78] sm:$0xff]   ;;  %v8584_v16 = vsel %vm7317_vm7, %v5751_v5, %v4491_v61  ;;  %v4493_v18 = vrot.slane %v4491_v61, 4 }
 0x135   : > { %v8560_v4 = vsel %vm7317_vm7, %v4486_v2, %v4487_v9  ;;  %v5756_v9 = vcombine.low %v4408_v23, %v4411_v25  ;;  %v2284_v19 = vshrl.u32 %v5453_v7, 16  ;;  %v2287_v41 = vshll.u32 %v5453_v7, 16 }
 0x136   : > { %v5767_v43 = vcombine.low %v8553_v63, %v8560_v4  ;;  %v8589_v58 = vsel %vm7317_vm7, %v4493_v18, %v4494_v51  ;;  %v4415_v6 = vsel %vm7317_vm7, %v5740_v28, %v4414_v49  ;;  %v4501_v49 = vrot.slane %v8463_v21, 5  ;;  %v6786_v51 = vld [vmem:[%s7065_s11 + $0x90] sm:$0xff]   ;;  %v6787_v21 = vld [vmem:[%s7065_s11 + $0x9c] sm:$0xff]  }
 0x137   : > { %v5768_v50 = vcombine.low %v8584_v16, %v8589_v58  ;;  %v2286_v23 = vrot.slane %v2284_v19, 4  ;;  %v2289_v25 = vrot.slane %v2287_v41, 5  ;;  %v4500_v7 = vrot.slane %v4498_v24, 4 }
 0x138   : > { %6375 = vmatmul.mubr.msk.bf16.gmra.mrb[28].mxu0 %vm718_vm3, %v5704_v46  ;;  %v5755_v46 = vcombine.low %v4401_v35, %v4404_v34  ;;  %v2293_v35 = vshll.u32 %v6834_v39, 16  ;;  %v2297_v34 = vshrl.u32 %v6834_v39, 16 }
 0x139   : > { %6223 = vmatmul.mubr.msk.bf16.gmra.mrb[12].mxu1 %vm718_vm3, %v6782_v12  ;;  %6380 = vmatprep.mubr.msk.bf16.mxu0 %vm718_vm3, %v5754_v17  ;;  %v4417_v12 = vrot.slane %v8936_v29, 5  ;;  %v5736_v17 = vld [vmem:[%s7065_s11 + $0xcc] sm:$0xe]  ;;  %v8611_v55 = vsel %vm7317_vm7, %v4500_v7, %v4501_v49 }
 0x13a   : > { %6226 = vmatprep.mubr.msk.bf16.mxu1 %vm718_vm3, %v6783_v11  ;;  %v6785_v11 = vld [vmem:[%s7065_s11 + $0x84] sm:$0xff]   ;;  %v5752_v52 = vrot.slane %v5736_v17, 9  ;;  %v2299_v28 = vrot.slane %v2297_v34, 4  ;;  %v6835_v17 = vld [vmem:[%s7065_s11 + $0x74] sm:$0x1] }
 0x13b   : > { %v4418_v2 = vsel %vm7317_vm7, %v4416_v47, %v4417_v12  ;;  %v5459_v47 = vld [vmem:[%s7065_s11 + $0x84] sm:$0xf]  ;;  %v2290_v12 = vor.u32 %v2289_v25, %v2286_v23  ;;  %v6789_v34 = vld [vmem:[%s7065_s11 + $0xb4] sm:$0xff]  }
 0x13c   : > { %v8606_v5 = vsel %vm7317_vm7, %v5752_v52, %v4498_v24  ;;  %v5757_v61 = vcombine.low %v4415_v6, %v4418_v2  ;;  %v2335_v18 = vshll.u32 %v5459_v47, 16  ;;  %v5462_v6 = vld [vmem:[%s7065_s11 + $0x90] sm:$0xf]  ;;  %v6788_v2 = vld [vmem:[%s7065_s11 + $0xa8] sm:$0xff]  }
 0x13d   : > { %v5769_v29 = vcombine.low %v8606_v5, %v8611_v55  ;;  %v2291_v52 = vrot.slane %v2290_v12, 4  ;;  %v2356_v23 = vshrl.u32 %v5462_v6, 16  ;;  %v2359_v25 = vshll.u32 %v5462_v6, 16 }
 0x13e   : > { %v2389_v12 = vshll.u32 %v6838_v60, 16 }
 0x13f   : > { %v2361_v14 = vrot.slane %v2359_v25, 5  ;;  %v6841_v25 = vld [vmem:[%s7065_s11 + $0xa4] sm:$0x1] }
 0x140   : > { %6381 = vmatmul.mubr.msk.bf16.vlgmr.msra.gmra.mrb[0].mxu0 %vm718_vm3, %v5755_v46  ;;  %v2295_v46 = vrot.slane %v2293_v35, 5  ;;  %v5465_v35 = vld [vmem:[%s7065_s11 + $0x9c] sm:$0xf]  ;;  %v8653_v6 = vrot.slane %v2389_v12, 5 }
 0x141   : > { %6227 = vmatmul.mubr.msk.bf16.gmra.mrb[16].mxu1 %vm718_vm3, %v6784_v30  ;;  %6384 = vmatprep.mubr.msk.bf16.mxu0 %vm718_vm3, %v5756_v9  ;;  %v2303_v30 = vshll.u32 %v6835_v17, 16  ;;  %v2332_v9 = vshrl.u32 %v5459_v47, 16  ;;  %v2383_v47 = vshll.u32 %v5465_v35, 16  ;;  %v6839_v17 = vld [vmem:[%s7065_s11 + $0x8c] sm:$0x1] }
 0x142   : > { %6230 = vmatprep.mubr.msk.bf16.mxu1 %vm718_vm3, %v6785_v11  ;;  %v2300_v13 = vor.u32 %v2299_v28, %v2295_v46  ;;  %v6836_v11 = vld [vmem:[%s7065_s11 + $0x88] sm:$0xf]  ;;  %v2296_v7 = vsel %vm7091_vm4, %v2291_v52, %v2295_v46 }
 0x143   : > { %v2341_v19 = vshll.u32 %v6836_v11, 16  ;;  %v2345_v41 = vshrl.u32 %v6836_v11, 16  ;;  %v2305_v0 = vrot.slane %v2303_v30, 5  ;;  %v2334_v36 = vrot.slane %v2332_v9, 4 }
 0x144   : > { %v2301_v39 = vrot.slane %v2300_v13, 4  ;;  %v2351_v30 = vshll.u32 %v6839_v17, 16  ;;  %v2358_v9 = vrot.slane %v2356_v23, 4  ;;  %v2385_v11 = vrot.slane %v2383_v47, 5 }
 0x145   : > { %v8630_v24 = vrot.slane %v2341_v19, 5  ;;  %v2347_v49 = vrot.slane %v2345_v41, 4  ;;  %v6790_v19 = vld [vmem:[%s7065_s11 + $0xc0] sm:$0xff]  }
 0x146   : > { %v2306_v46 = vsel %vm7091_vm4, %v2301_v39, %v2305_v0  ;;  %v5468_v39 = vld [vmem:[%s7065_s11 + $0xa8] sm:$0xf] }
 0x147   : > { %v2348_v13 = vor.u32 %v2347_v49, %v8630_v24  ;;  %v5486_v41 = vcombine.low %v2296_v7, %v2306_v46  ;;  %v2399_v7 = vshll.u32 %v6841_v25, 16  ;;  %v2407_v45 = vshll.u32 %v5468_v39, 16 }
 0x148   : > { %6385 = vmatmul.mubr.msk.bf16.gmra.mrb[4].mxu0 %vm718_vm3, %v5757_v61  ;;  %v6837_v61 = vld [vmem:[%s7065_s11 + $0x94] sm:$0xf] }
 0x149   : > { %6231 = vmatmul.mubr.msk.bf16.gmra.mrb[20].mxu1 %vm718_vm3, %v6786_v51  ;;  %6388 = vmatprep.mubr.msk.bf16.mxu0 %vm718_vm3, %v5758_v10  ;;  %v2337_v10 = vrot.slane %v2335_v18, 5  ;;  %v2365_v51 = vshll.u32 %v6837_v61, 16  ;;  %v2369_v28 = vshrl.u32 %v6837_v61, 16  ;;  %v2349_v0 = vrot.slane %v2348_v13, 4 }
 0x14a   : > { %6234 = vmatprep.mubr.msk.bf16.mxu1 %vm718_vm3, %v6787_v21  ;;  %v2380_v21 = vshrl.u32 %v5465_v35, 16  ;;  %v6840_v35 = vld [vmem:[%s7065_s11 + $0x98] sm:$0x1]  ;;  %v2404_v61 = vshrl.u32 %v5468_v39, 16  ;;  %v5474_v39 = vld [vmem:[%s7065_s11 + $0xc0] sm:$0xf] }
 0x14b   : > { %v2338_v15 = vor.u32 %v2337_v10, %v2334_v36  ;;  %v8650_v26 = vrot.slane %v2365_v51, 5  ;;  %v2353_v36 = vrot.slane %v2351_v30, 5  ;;  %v2362_v10 = vor.u32 %v2361_v14, %v2358_v9  ;;  %v5471_v51 = vld [vmem:[%s7065_s11 + $0xb4] sm:$0xf] }
 0x14c   : > { %v2382_v18 = vrot.slane %v2380_v21, 4  ;;  %v2417_v21 = vshrl.u32 %v6842_v27, 16  ;;  %v2428_v20 = vshrl.u32 %v5471_v51, 16  ;;  %v2431_v42 = vshll.u32 %v5471_v51, 16 }
 0x14d   : > { %v2339_v52 = vrot.slane %v2338_v15, 4  ;;  %v2354_v46 = vsel %vm7091_vm4, %v2349_v0, %v2353_v36  ;;  %v2363_v15 = vrot.slane %v2362_v10, 4  ;;  %v2401_v30 = vrot.slane %v2399_v7, 5 }
 0x14e   : > { %v2386_v23 = vor.u32 %v2385_v11, %v2382_v18  ;;  %v2406_v9 = vrot.slane %v2404_v61, 4  ;;  %v2419_v11 = vrot.slane %v2417_v21, 4  ;;  %v6846_v61 = vld [vmem:[%s7065_s11 + $0xbc] sm:$0x1] }
 0x14f   : > { %v2344_v47 = vsel %vm7091_vm4, %v2339_v52, %v8630_v24  ;;  %v2368_v0 = vsel %vm7091_vm4, %v2363_v15, %v8650_v26  ;;  %v2447_v22 = vshll.u32 %v6846_v61, 16 }
 0x150   : > { %6389 = vmatmul.mubr.msk.bf16.gmra.mrb[8].mxu0 %vm718_vm3, %v5759_v40  ;;  %v2393_v40 = vshrl.u32 %v6838_v60, 16  ;;  %v2387_v17 = vrot.slane %v2386_v23, 4  ;;  %v5488_v24 = vcombine.low %v2344_v47, %v2354_v46 }
 0x151   : > { %6235 = vmatmul.mubr.msk.bf16.gmra.mrb[24].mxu1 %vm718_vm3, %v6788_v2  ;;  %6392 = vmatprep.mubr.msk.bf16.mxu0 %vm718_vm3, %v5760_v54  ;;  %v2371_v54 = vrot.slane %v2369_v28, 4 }
 0x152   : > { %6238 = vmatprep.mubr.msk.bf16.mxu1 %vm718_vm3, %v6789_v34  ;;  %v2395_v2 = vrot.slane %v2393_v40, 4  ;;  %v2375_v34 = vshll.u32 %v6840_v35, 16  ;;  %v2392_v10 = vsel %vm7091_vm4, %v2387_v17, %v8653_v6  ;;  %v2473_v17 = vrot.slane %v2471_v57, 5 }
 0x153   : > { %v2372_v49 = vor.u32 %v2371_v54, %v8650_v26  ;;  %v2409_v54 = vrot.slane %v2407_v45, 5  ;;  %v6844_v26 = vld [vmem:[%s7065_s11 + $0xb0] sm:$0x1] }
 0x154   : > { %v2396_v28 = vor.u32 %v2395_v2, %v8653_v6  ;;  %v2377_v60 = vrot.slane %v2375_v34, 5  ;;  %v2423_v35 = vshll.u32 %v6844_v26, 16  ;;  %v2452_v34 = vshrl.u32 %v5474_v39, 16 }
 0x155   : > { %v2373_v13 = vrot.slane %v2372_v49, 4  ;;  %v2410_v38 = vor.u32 %v2409_v54, %v2406_v9  ;;  %v2455_v6 = vshll.u32 %v5474_v39, 16  ;;  %v6845_v49 = vld [vmem:[%s7065_s11 + $0xc4] sm:$0xf] }
 0x156   : > { %v2397_v14 = vrot.slane %v2396_v28, 4  ;;  %v2461_v23 = vshll.u32 %v6845_v49, 16  ;;  %v2465_v25 = vshrl.u32 %v6845_v49, 16  ;;  %v2425_v45 = vrot.slane %v2423_v35, 5 }
 0x157   : > { %v2378_v36 = vsel %vm7091_vm4, %v2373_v13, %v2377_v60  ;;  %v2411_v51 = vrot.slane %v2410_v38, 4  ;;  %v2449_v60 = vrot.slane %v2447_v22, 5 }
 0x158   : > { %6393 = vmatmul.mubr.msk.bf16.gmra.mrb[12].mxu0 %vm718_vm3, %v5761_v53  ;;  %v2413_v53 = vshll.u32 %v6842_v27, 16  ;;  %v2402_v59 = vsel %vm7091_vm4, %v2397_v14, %v2401_v30  ;;  %v5489_v44 = vcombine.low %v2368_v0, %v2378_v36  ;;  %v2454_v27 = vrot.slane %v2452_v34, 4 }
 0x159   : > { %6239 = vmatmul.mubr.msk.bf16.gmra.mrb[28].mxu1 %vm718_vm3, %v6790_v19  ;;  %6396 = vmatprep.mubr.msk.bf16.mxu0 %vm718_vm3, %v5762_v33  ;;  %v6843_v33 = vld [vmem:[%s7065_s11 + $0xb8] sm:$0xf]  ;;  %v2430_v19 = vrot.slane %v2428_v20, 4  ;;  %v2463_v21 = vrot.slane %v2461_v23, 5  ;;  %v2467_v47 = vrot.slane %v2465_v25, 4  ;;  %s8755_s11 = scalar_lea.vmem [#allocation2], %s5247_s10 }
 0x15a   : > { %6260 = vmatprep.mubr.msk.bf16.mxu1 %vm718_vm3, %v5486_v41  ;;  %v2437_v12 = vshll.u32 %v6843_v33, 16  ;;  %v2441_v40 = vshrl.u32 %v6843_v33, 16  ;;  %v2415_v18 = vrot.slane %v2413_v53, 5  ;;  %v2433_v41 = vrot.slane %v2431_v42, 5  ;;  %s5091_s19 = sshll.u32 %s8755_s11, 4  ;;  %s8783_s19 = int_to_ptr.vmem [resolvable:$true] %s5091_s19 }
 0x15b   : > { %v2457_v53 = vrot.slane %v2455_v6, 5  ;;  %s6848_s28 = scalar_lea.vmem %s8783_s19, 2048  ;;  %p6855_p1 = scmp.lt.s32.totalorder %s8783_s19, %s6853_s30 }
 0x15c   : > { %v2439_v52 = vrot.slane %v2437_v12, 5  ;;  %v2443_v2 = vrot.slane %v2441_v40, 4  ;;  %v2416_v20 = vsel %vm7091_vm4, %v2411_v51, %v2415_v18  ;;  %v2468_v12 = vor.u32 %v2467_v47, %v2463_v21  ;;  %p6849_p12 = scmp.ne.s32.totalorder %s8783_s19, %s6848_s28  ;;  %p6856_p2 = scmp.lt.s32.totalorder %s6854_s4, %s6848_s28 }
 0x15d   : > { %v2458_v33 = vor.u32 %v2457_v53, %v2454_v27 }
 0x15e   : > { %v2444_v7 = vor.u32 %v2443_v2, %v2439_v52  ;;  %v2469_v13 = vrot.slane %v2468_v12, 4  ;;  %p6850_p13 = pnand %p6849_p12, %p7024_p4  ;;  %p6857_p3 = por %p6856_p2, %p6855_p1 }
 0x15f   : > { %v2459_v40 = vrot.slane %v2458_v33, 4 }
 0x160   : > { %6397 = vmatmul.mubr.msk.bf16.gmra.mrb[16].mxu0 %vm718_vm3, %v5763_v37  ;;  %v2420_v37 = vor.u32 %v2419_v11, %v2415_v18  ;;  %v2445_v15 = vrot.slane %v2444_v7, 4  ;;  %v2474_v9 = vsel %vm7091_vm4, %v2469_v13, %v2473_v17  ;;  %p6851_p0 = pneg %p6850_p13 }
 0x161   : > { %6261 = vmatmul.mubr.msk.bf16.vlgmr.msra.gmra.mrb[16].mxu1 %vm718_vm3, %v8459_v1  ;;  %6400 = vmatprep.mubr.msk.bf16.mxu0 %vm718_vm3, %v5764_v3  ;;  %v2434_v1 = vor.u32 %v2433_v41, %v2430_v19  ;;  %v5490_v3 = vcombine.low %v2392_v10, %v2402_v59  ;;  %v2464_v30 = vsel %vm7091_vm4, %v2459_v40, %v2463_v21 }
 0x162   : > { %6264 = vmatprep.mubr.msk.bf16.mxu1 %vm718_vm3, %v5488_v24  ;;  %v2421_v28 = vrot.slane %v2420_v37, 4  ;;  %v2450_v48 = vsel %vm7091_vm4, %v2445_v15, %v2449_v60  ;;  %v5493_v14 = vcombine.low %v2464_v30, %v2474_v9  ;;  %p6858_p5 = pnand %p6857_p3, %p6851_p0 }
 0x163   : > { %v2435_v46 = vrot.slane %v2434_v1, 4 }
 0x164   : > { %v2426_v42 = vsel %vm7091_vm4, %v2421_v28, %v2425_v45 }
 0x165   : > { %v5491_v62 = vcombine.low %v2416_v20, %v2426_v42 }
 0x168   : > { %6401 = vmatmul.mubr.msk.bf16.gmra.mrb[20].mxu0 %vm718_vm3, %v5765_v8  ;;  %v2440_v8 = vsel %vm7091_vm4, %v2435_v46, %v2439_v52 }
 0x169   : > { %6265 = vmatmul.mubr.msk.bf16.gmra.mrb[20].mxu1 %vm718_vm3, %v5489_v44  ;;  %6404 = vmatprep.mubr.msk.bf16.mxu0 %vm718_vm3, %v5766_v56  ;;  %v5492_v56 = vcombine.low %v2440_v8, %v2450_v48 }
 0x16a   : > { %6268 = vmatprep.mubr.msk.bf16.mxu1 %vm718_vm3, %v5490_v3 }
 0x170   : > { %6405 = vmatmul.mubr.msk.bf16.gmra.mrb[24].mxu0 %vm718_vm3, %v5767_v43 }
 0x171   : > { %6269 = vmatmul.mubr.msk.bf16.gmra.mrb[24].mxu1 %vm718_vm3, %v5491_v62  ;;  %6408 = vmatprep.mubr.msk.bf16.mxu0 %vm718_vm3, %v5768_v50 }
 0x172   : > { %6272 = vmatprep.mubr.msk.bf16.mxu1 %vm718_vm3, %v5492_v56 }
 0x178   : > { %6409 = vmatmul.mubr.msk.bf16.gmra.mrb[28].mxu0 %vm718_vm3, %v5769_v29 }
 0x179   : > { %6273 = vmatmul.mubr.msk.bf16.gmra.mrb[28].mxu1 %vm718_vm3, %v5493_v14 }
 0x1f4   : > { %v6212_v63 = vpop.f32.mrb[0].mxu1 }
 0x1f5   : > { %v1884_v4 = vpop.f32.mrb[1].mxu1 }
 0x1f6   : > { %v6213_v43 = vpop.f32.mrb[2].mxu1 }
 0x1f7   : > { %v1887_v16 = vpop.f32.mrb[3].mxu1 }
 0x1fc   : > { %v6216_v58 = vpop.f32.mrb[4].mxu1 }
 0x1fd   : > { %v1900_v50 = vpop.f32.mrb[5].mxu1 }
 0x1fe   : > { %v6217_v54 = vpop.f32.mrb[6].mxu1 }
 0x1ff   : > { %v1903_v18 = vpop.f32.mrb[7].mxu1 }
 0x204   : > { %v6220_v11 = vpop.f32.mrb[8].mxu1 }
 0x205   : > { %v1916_v32 = vpop.f32.mrb[9].mxu1 }
 0x206   : > { %v6221_v24 = vpop.f32.mrb[10].mxu1 }
 0x207   : > { %v8741_v19 = vpop.f32.mrb[11].mxu1 }
 0x20c   : > { %v8743_v41 = vpop.f32.mrb[12].mxu1 }
 0x20d   : > { %v8745_v5 = vpop.f32.mrb[13].mxu1 }
 0x20e   : > { %v8747_v55 = vpop.f32.mrb[14].mxu1 }
 0x20f   : > { %v8749_v29 = vpop.f32.mrb[15].mxu1 }
 0x213   : > { %v6382_v52 = vpop.f32.mrb[0].mxu0 }
 0x214   : > { %v6414_v2 = vadd.f32 %v6382_v52, %v6212_v63  ;;  %v4638_v39 = vpop.f32.mrb[1].mxu0 }
 0x215   : > { %v6415_v0 = vadd.f32 %v4638_v39, %v1884_v4  ;;  %v6383_v36 = vpop.f32.mrb[2].mxu0 }
 0x216   : > { %v6416_v10 = vadd.f32 %v6383_v36, %v6213_v43  ;;  %v4641_v59 = vpop.f32.mrb[3].mxu0  ;;  %v4996_v49 = vmul.f32 %v6414_v2, %v6414_v2 }
 0x217   : > { %v6417_v38 = vadd.f32 %v4641_v59, %v1887_v16  ;;  %v4994_v26 = vmul.f32 %v6415_v0, %v6415_v0 }
 0x218   : > { %v5866_v37 = vpack.c.bf16 %v6416_v10, %v6414_v2  ;;  %v4997_v22 = vmul.f32 %v6416_v10, %v6416_v10 }
 0x219   : > { %v5861_v35 = vpack.c.bf16 %v6417_v38, %v6415_v0  ;;  %v4957_v34 = vadd.f32 %v6417_v38, %v6415_v0  ;;  %v4995_v6 = vmul.f32 %v6417_v38, %v6417_v38 }
 0x21a   : > { %5938 = vst [vmem:[%s8755_s11 + $0x8] sm:$0xff] %v5866_v37  }
 0x21b   : > { %5862 = vst [vmem:[%s8755_s11] sm:$0xff] %v5861_v35   ;;  %v4958_v23 = vadd.f32 %v6414_v2, %v4957_v34  ;;  %v5026_v25 = vadd.f32 %v4995_v6, %v4994_v26  ;;  %v6386_v1 = vpop.f32.mrb[4].mxu0 }
 0x21c   : > { %v6418_v7 = vadd.f32 %v6386_v1, %v6216_v58  ;;  %v4654_v61 = vpop.f32.mrb[5].mxu0 }
 0x21d   : > { %v5027_v44 = vadd.f32 %v5026_v25, %v4996_v49  ;;  %v6419_v3 = vadd.f32 %v4654_v61, %v1900_v50  ;;  %v4959_v51 = vadd.f32 %v6416_v10, %v4958_v23  ;;  %v6387_v28 = vpop.f32.mrb[6].mxu0 }
 0x21e   : > { %v6420_v45 = vadd.f32 %v6387_v28, %v6217_v54  ;;  %v4657_v27 = vpop.f32.mrb[7].mxu0  ;;  %v5000_v12 = vmul.f32 %v6418_v7, %v6418_v7 }
 0x21f   : > { %v4960_v53 = vadd.f32 %v6419_v3, %v4959_v51  ;;  %v4998_v21 = vmul.f32 %v6419_v3, %v6419_v3  ;;  %v5028_v47 = vadd.f32 %v5027_v44, %v4997_v22  ;;  %v6421_v46 = vadd.f32 %v4657_v27, %v1903_v18 }
 0x220   : > { %v5876_v15 = vpack.c.bf16 %v6420_v45, %v6418_v7  ;;  %v5001_v56 = vmul.f32 %v6420_v45, %v6420_v45 }
 0x221   : > { %v5029_v60 = vadd.f32 %v5028_v47, %v4998_v21  ;;  %v5871_v20 = vpack.c.bf16 %v6421_v46, %v6419_v3  ;;  %v4961_v42 = vadd.f32 %v6421_v46, %v4960_v53  ;;  %v4999_v33 = vmul.f32 %v6421_v46, %v6421_v46 }
 0x222   : > { %5940 = vst [vmem:[%s8755_s11 + $0x18] sm:$0xff] %v5876_v15  }
 0x223   : > { %5939 = vst [vmem:[%s8755_s11 + $0x10] sm:$0xff] %v5871_v20   ;;  %v4962_v31 = vadd.f32 %v6418_v7, %v4961_v42  ;;  %v5030_v57 = vadd.f32 %v5029_v60, %v4999_v33  ;;  %v6390_v8 = vpop.f32.mrb[8].mxu0 }
 0x224   : > { %v6422_v48 = vadd.f32 %v6390_v8, %v6220_v11  ;;  %v4670_v62 = vpop.f32.mrb[9].mxu0 }
 0x225   : > { %v5031_v40 = vadd.f32 %v5030_v57, %v5000_v12  ;;  %v6423_v13 = vadd.f32 %v4670_v62, %v1916_v32  ;;  %v4963_v17 = vadd.f32 %v6420_v45, %v4962_v31  ;;  %v6391_v30 = vpop.f32.mrb[10].mxu0 }
 0x226   : > { %v6424_v9 = vadd.f32 %v6391_v30, %v6221_v24  ;;  %v4673_v14 = vpop.f32.mrb[11].mxu0  ;;  %v5004_v52 = vmul.f32 %v6422_v48, %v6422_v48 }
 0x227   : > { %v4964_v63 = vadd.f32 %v6423_v13, %v4963_v17  ;;  %v5002_v4 = vmul.f32 %v6423_v13, %v6423_v13  ;;  %v5032_v43 = vadd.f32 %v5031_v40, %v5001_v56  ;;  %v6425_v16 = vadd.f32 %v4673_v14, %v8741_v19 }
 0x228   : > { %v5886_v58 = vpack.c.bf16 %v6424_v9, %v6422_v48  ;;  %v5005_v36 = vmul.f32 %v6424_v9, %v6424_v9 }
 0x229   : > { %v5033_v50 = vadd.f32 %v5032_v43, %v5002_v4  ;;  %v5881_v54 = vpack.c.bf16 %v6425_v16, %v6423_v13  ;;  %v4965_v18 = vadd.f32 %v6425_v16, %v4964_v63  ;;  %v5003_v11 = vmul.f32 %v6425_v16, %v6425_v16 }
 0x22a   : > { %5942 = vst [vmem:[%s8755_s11 + $0x28] sm:$0xff] %v5886_v58  }
 0x22b   : > { %5941 = vst [vmem:[%s8755_s11 + $0x20] sm:$0xff] %v5881_v54   ;;  %v4966_v2 = vadd.f32 %v6422_v48, %v4965_v18  ;;  %v5034_v32 = vadd.f32 %v5033_v50, %v5003_v11  ;;  %v6394_v39 = vpop.f32.mrb[12].mxu0 }
 0x22c   : > { %v6426_v0 = vadd.f32 %v6394_v39, %v8743_v41  ;;  %v4686_v24 = vpop.f32.mrb[13].mxu0 }
 0x22d   : > { %v5035_v10 = vadd.f32 %v5034_v32, %v5004_v52  ;;  %v6427_v59 = vadd.f32 %v4686_v24, %v8745_v5  ;;  %v4967_v19 = vadd.f32 %v6424_v9, %v4966_v2  ;;  %v6395_v38 = vpop.f32.mrb[14].mxu0 }
 0x22e   : > { %v6428_v37 = vadd.f32 %v6395_v38, %v8747_v55  ;;  %v4689_v26 = vpop.f32.mrb[15].mxu0  ;;  %v5008_v61 = vmul.f32 %v6426_v0, %v6426_v0 }
 0x22f   : > { %v4968_v35 = vadd.f32 %v6427_v59, %v4967_v19  ;;  %v5006_v34 = vmul.f32 %v6427_v59, %v6427_v59  ;;  %v5036_v6 = vadd.f32 %v5035_v10, %v5005_v36  ;;  %v6429_v49 = vadd.f32 %v4689_v26, %v8749_v29 }
 0x230   : > { %v5896_v23 = vpack.c.bf16 %v6428_v37, %v6426_v0  ;;  %v5009_v55 = vmul.f32 %v6428_v37, %v6428_v37 }
 0x231   : > { %v5037_v25 = vadd.f32 %v5036_v6, %v5006_v34  ;;  %v5891_v41 = vpack.c.bf16 %v6429_v49, %v6427_v59  ;;  %v4969_v1 = vadd.f32 %v6429_v49, %v4968_v35  ;;  %v5007_v7 = vmul.f32 %v6429_v49, %v6429_v49 }
 0x232   : > { %5944 = vst [vmem:[%s8755_s11 + $0x38] sm:$0xff] %v5896_v23  }
 0x233   : > { %5943 = vst [vmem:[%s8755_s11 + $0x30] sm:$0xff] %v5891_v41   ;;  %v4970_v5 = vadd.f32 %v6426_v0, %v4969_v1  ;;  %v5038_v22 = vadd.f32 %v5037_v25, %v5007_v7  ;;  %v6398_v44 = vpop.f32.mrb[16].mxu0 }
 0x234   : > { %v6262_v3 = vpop.f32.mrb[16].mxu1  ;;  %v4702_v51 = vpop.f32.mrb[17].mxu0 }
 0x235   : > { %v5039_v28 = vadd.f32 %v5038_v22, %v5008_v61  ;;  %v6430_v45 = vadd.f32 %v6398_v44, %v6262_v3  ;;  %v2674_v27 = vpop.f32.mrb[17].mxu1  ;;  %v4971_v53 = vadd.f32 %v6428_v37, %v4970_v5  ;;  %v6399_v29 = vpop.f32.mrb[18].mxu0 }
 0x236   : > { %v6431_v21 = vadd.f32 %v4702_v51, %v2674_v27  ;;  %v6263_v47 = vpop.f32.mrb[18].mxu1  ;;  %v4705_v46 = vpop.f32.mrb[19].mxu0 }
 0x237   : > { %v5040_v15 = vadd.f32 %v5039_v28, %v5009_v55  ;;  %v6432_v60 = vadd.f32 %v6399_v29, %v6263_v47  ;;  %v2677_v20 = vpop.f32.mrb[19].mxu1  ;;  %v5012_v40 = vmul.f32 %v6430_v45, %v6430_v45 }
 0x238   : > { %v4972_v42 = vadd.f32 %v6431_v21, %v4971_v53  ;;  %v5010_v33 = vmul.f32 %v6431_v21, %v6431_v21  ;;  %v6433_v12 = vadd.f32 %v4705_v46, %v2677_v20 }
 0x239   : > { %v5906_v31 = vpack.c.bf16 %v6432_v60, %v6430_v45  ;;  %v5013_v43 = vmul.f32 %v6432_v60, %v6432_v60 }
 0x23a   : > { %v5041_v57 = vadd.f32 %v5040_v15, %v5010_v33  ;;  %v5901_v8 = vpack.c.bf16 %v6433_v12, %v6431_v21  ;;  %v4973_v48 = vadd.f32 %v6433_v12, %v4972_v42  ;;  %v5011_v62 = vmul.f32 %v6433_v12, %v6433_v12 }
 0x23b   : > { %5946 = vst [vmem:[%s8755_s11 + $0x48] sm:$0xff] %v5906_v31   ;;  %v6402_v56 = vpop.f32.mrb[20].mxu0 }
 0x23c   : > { %5945 = vst [vmem:[%s8755_s11 + $0x40] sm:$0xff] %v5901_v8   ;;  %v4974_v13 = vadd.f32 %v6430_v45, %v4973_v48  ;;  %v5042_v17 = vadd.f32 %v5041_v57, %v5011_v62  ;;  %v6266_v30 = vpop.f32.mrb[20].mxu1  ;;  %v4718_v9 = vpop.f32.mrb[21].mxu0 }
 0x23d   : > { %v6434_v14 = vadd.f32 %v6402_v56, %v6266_v30  ;;  %v2690_v63 = vpop.f32.mrb[21].mxu1  ;;  %v6403_v4 = vpop.f32.mrb[22].mxu0 }
 0x23e   : > { %v5043_v16 = vadd.f32 %v5042_v17, %v5012_v40  ;;  %v6435_v58 = vadd.f32 %v4718_v9, %v2690_v63  ;;  %v4975_v50 = vadd.f32 %v6432_v60, %v4974_v13  ;;  %v6267_v54 = vpop.f32.mrb[22].mxu1  ;;  %v4721_v18 = vpop.f32.mrb[23].mxu0 }
 0x23f   : > { %v6436_v11 = vadd.f32 %v6403_v4, %v6267_v54  ;;  %v2693_v52 = vpop.f32.mrb[23].mxu1  ;;  %v5016_v37 = vmul.f32 %v6434_v14, %v6434_v14 }
 0x240   : > { %v4976_v2 = vadd.f32 %v6435_v58, %v4975_v50  ;;  %v5014_v32 = vmul.f32 %v6435_v58, %v6435_v58  ;;  %v5044_v39 = vadd.f32 %v5043_v16, %v5013_v43  ;;  %v6437_v0 = vadd.f32 %v4721_v18, %v2693_v52 }
 0x241   : > { %v5916_v24 = vpack.c.bf16 %v6436_v11, %v6434_v14  ;;  %v5017_v41 = vmul.f32 %v6436_v11, %v6436_v11 }
 0x242   : > { %v5045_v36 = vadd.f32 %v5044_v39, %v5014_v32  ;;  %v5911_v10 = vpack.c.bf16 %v6437_v0, %v6435_v58  ;;  %v4977_v59 = vadd.f32 %v6437_v0, %v4976_v2  ;;  %v5015_v19 = vmul.f32 %v6437_v0, %v6437_v0 }
 0x243   : > { %5948 = vst [vmem:[%s8755_s11 + $0x58] sm:$0xff] %v5916_v24   ;;  %v6406_v38 = vpop.f32.mrb[24].mxu0 }
 0x244   : > { %5947 = vst [vmem:[%s8755_s11 + $0x50] sm:$0xff] %v5911_v10   ;;  %v4978_v26 = vadd.f32 %v6434_v14, %v4977_v59  ;;  %v5046_v35 = vadd.f32 %v5045_v36, %v5015_v19  ;;  %v6270_v34 = vpop.f32.mrb[24].mxu1  ;;  %v4734_v6 = vpop.f32.mrb[25].mxu0 }
 0x245   : > { %v6438_v49 = vadd.f32 %v6406_v38, %v6270_v34  ;;  %v2706_v23 = vpop.f32.mrb[25].mxu1  ;;  %v6407_v25 = vpop.f32.mrb[26].mxu0 }
 0x246   : > { %v5047_v1 = vadd.f32 %v5046_v35, %v5016_v37  ;;  %v6439_v7 = vadd.f32 %v4734_v6, %v2706_v23  ;;  %v4979_v61 = vadd.f32 %v6436_v11, %v4978_v26  ;;  %v6271_v5 = vpop.f32.mrb[26].mxu1  ;;  %v4737_v22 = vpop.f32.mrb[27].mxu0 }
 0x247   : > { %v6440_v44 = vadd.f32 %v6407_v25, %v6271_v5  ;;  %v2709_v3 = vpop.f32.mrb[27].mxu1  ;;  %v5020_v15 = vmul.f32 %v6438_v49, %v6438_v49 }
 0x248   : > { %v4980_v51 = vadd.f32 %v6439_v7, %v4979_v61  ;;  %v5018_v55 = vmul.f32 %v6439_v7, %v6439_v7  ;;  %v5048_v28 = vadd.f32 %v5047_v1, %v5017_v41  ;;  %v6441_v45 = vadd.f32 %v4737_v22, %v2709_v3 }
 0x249   : > { %v5926_v27 = vpack.c.bf16 %v6440_v44, %v6438_v49  ;;  %v5021_v8 = vmul.f32 %v6440_v44, %v6440_v44 }
 0x24a   : > { %v5049_v53 = vadd.f32 %v5048_v28, %v5018_v55  ;;  %v5921_v29 = vpack.c.bf16 %v6441_v45, %v6439_v7  ;;  %v4981_v21 = vadd.f32 %v6441_v45, %v4980_v51  ;;  %v5019_v47 = vmul.f32 %v6441_v45, %v6441_v45 }
 0x24b   : > { %5950 = vst [vmem:[%s8755_s11 + $0x68] sm:$0xff] %v5926_v27   ;;  %v6410_v46 = vpop.f32.mrb[28].mxu0 }
 0x24c   : > { %5949 = vst [vmem:[%s8755_s11 + $0x60] sm:$0xff] %v5921_v29   ;;  %v4982_v60 = vadd.f32 %v6438_v49, %v4981_v21  ;;  %v5050_v20 = vadd.f32 %v5049_v53, %v5019_v47  ;;  %v6274_v42 = vpop.f32.mrb[28].mxu1  ;;  %v4750_v33 = vpop.f32.mrb[29].mxu0 }
 0x24d   : > { %v6442_v12 = vadd.f32 %v6410_v46, %v6274_v42  ;;  %v2722_v31 = vpop.f32.mrb[29].mxu1  ;;  %v6411_v57 = vpop.f32.mrb[30].mxu0 }
 0x24e   : > { %v5051_v48 = vadd.f32 %v5050_v20, %v5020_v15  ;;  %v6443_v62 = vadd.f32 %v4750_v33, %v2722_v31  ;;  %v4983_v56 = vadd.f32 %v6440_v44, %v4982_v60  ;;  %v6275_v40 = vpop.f32.mrb[30].mxu1  ;;  %v4753_v13 = vpop.f32.mrb[31].mxu0 }
 0x24f   : > { %v6444_v17 = vadd.f32 %v6411_v57, %v6275_v40  ;;  %v2725_v30 = vpop.f32.mrb[31].mxu1  ;;  %v5024_v18 = vmul.f32 %v6442_v12, %v6442_v12 }
 0x250   : > { %v4984_v9 = vadd.f32 %v6443_v62, %v4983_v56  ;;  %v5022_v14 = vmul.f32 %v6443_v62, %v6443_v62  ;;  %v5052_v63 = vadd.f32 %v5051_v48, %v5021_v8  ;;  %v6445_v4 = vadd.f32 %v4753_v13, %v2725_v30 }
 0x251   : > { %v5936_v43 = vpack.c.bf16 %v6444_v17, %v6442_v12 }
 0x252   : > { %v5053_v16 = vadd.f32 %v5052_v63, %v5022_v14  ;;  %v5931_v58 = vpack.c.bf16 %v6445_v4, %v6443_v62  ;;  %v4985_v50 = vadd.f32 %v6445_v4, %v4984_v9  ;;  %v5023_v54 = vmul.f32 %v6445_v4, %v6445_v4 }
 0x253   : > { %5952 = vst [vmem:[%s8755_s11 + $0x78] sm:$0xff] %v5936_v43  }
 0x254   : > { %5951 = vst [vmem:[%s8755_s11 + $0x70] sm:$0xff] %v5931_v58   ;;  %v4986_v11 = vadd.f32 %v6442_v12, %v4985_v50  ;;  %v5054_v52 = vadd.f32 %v5053_v16, %v5023_v54 }
 0x255   : > { %6861 = shalt.err (!%p6858_p5)
}
 0x256   : > { %s6862_s5 = scalar_lea.hbm %s8781_s26, 2048  ;;  %s6866_s8 = scalar_lea.hbm %s8866_s2, 4096 }
 0x257   : > { %p6863_p6 = scmp.ne.s32.totalorder %s8781_s26, %s6862_s5  ;;  %p6867_p10 = scmp.lt.u32.totalorder %s8781_s26, %s8866_s2 }
 0x258   : > { %p6868_p11 = scmp.lt.u32.totalorder %s6866_s8, %s6862_s5  ;;  %p6870_p13 = scmp.lt.u32.totalorder %s6862_s5, %s8781_s26 }
 0x259   : > { %p6864_p7 = pnand %p6863_p6, %p7024_p4 }
 0x25a   : > { %p6869_p12 = por %p6868_p11, %p6867_p10 }
 0x25b   : > { %p6865_p9 = pneg %p6864_p7 }
 0x25c   : > { %p6871_p0 = por %p6870_p13, %p6869_p12 }
 0x25e   : > { %p6872_p1 = pnand %p6871_p0, %p6865_p9 }
 0x260   : > { %6875 = shalt.err (!%p6872_p1)
}
 0x261   : > { %s6961_s18 = smov 64   ;;  %s6962_s21 = smov 4   ;;  %v5025_v2 = vmul.f32 %v6444_v17, %v6444_v17  ;;  %v4987_v32 = vadd.f32 %v6444_v17, %v4986_v11  ;;  %v5055_v39 = vadd.f32 %v5054_v52, %v5024_v18  ;;  %v5063_v59 = vlaneseq }
 0x262   : > { %6681 = dma.vmem_to_hbm [thread:$0]  (%p7024_p4), %s8783_s19, 2048, %s8781_s26, %s5071_s27, %s6961_s18, %s6961_s18, %s6962_s21  }
 0x263   : > { %v4988_v0 = vrot.slane %v4987_v32, 4  ;;  %v5056_v24 = vadd.f32 %v5055_v39, %v5025_v2  ;;  %s5248_s23 = sshll.u32 %s8752_s9, 3  ;;  %v5064_v35 = vshrl.u32 %v5063_v59, 7  ;;  %s5822_s19 = sshll.u32 %s6950_s15, 7 }
 0x264   : > { %s214_s26 = scalar_lea.vmem [#allocation4], %s5248_s23  ;;  %s8816_s30 = scalar_lea.hbm %s8867_s3, %s5822_s19 }
 0x265   : > { %v4989_v36 = vadd.f32 %v4988_v0, %v4987_v32  ;;  %v5057_v10 = vrot.slane %v5056_v24, 4  ;;  %vm5066_vm8 = vcmp.eq.s32.totalorder %v5064_v35, 1  ;;  %s5109_s27 = sshll.u32 %s214_s26, 4  ;;  %vm5065_vm9 = vcmp.eq.s32.totalorder %v5064_v35, 0  ;;  %s5076_s4 = scalar_lea.sflag [#allocation5], %s8752_s9  ;;  %s8818_s27 = int_to_ptr.vmem [resolvable:$true] %s5109_s27 }
 0x266   : > { %s6876_s15 = scalar_lea.vmem %s8818_s27, 128  ;;  %s6963_s5 = smov [#allocation4]  }
 0x267   : > { %v4990_v19 = vrot.slane %v4989_v36, 2  ;;  %v5058_v38 = vadd.f32 %v5057_v10, %v5056_v24  ;;  %p6877_p2 = scmp.ne.s32.totalorder %s8818_s27, %s6876_s15  ;;  %s6880_s6 = sshll.u32 %s6963_s5, 4  ;;  %s6881_s6 = int_to_ptr.vmem [resolvable:$false] %s6880_s6 }
 0x268   : > { %s6882_s7 = scalar_lea.vmem %s6881_s6, 256  ;;  %p6883_p6 = scmp.lt.s32.totalorder %s8818_s27, %s6881_s6 }
 0x269   : > { %v4991_v37 = vadd.f32 %v4990_v19, %v4989_v36  ;;  %v5059_v26 = vrot.slane %v5058_v38, 2  ;;  %p6878_p3 = pnand %p6877_p2, %p7024_p4  ;;  %p6884_p7 = scmp.lt.s32.totalorder %s6882_s7, %s6876_s15 }
 0x26b   : > { %v5060_v34 = vadd.f32 %v5059_v26, %v5058_v38  ;;  %v4992_v6 = vrot.slane %v4991_v37, 1  ;;  %p6879_p5 = pneg %p6878_p3  ;;  %p6885_p9 = por %p6884_p7, %p6883_p6 }
 0x26d   : > { %v5061_v49 = vrot.slane %v5060_v34, 1  ;;  %v4993_v25 = vadd.f32 %v4992_v6, %v4991_v37  ;;  %p6886_p10 = pnand %p6885_p9, %p6879_p5 }
 0x26f   : > { %v5062_v23 = vadd.f32 %v5061_v49, %v5060_v34 }
 0x271   : > { %v5067_v41 = vsel %vm5066_vm8, %v5062_v23, 0.0 }
 0x272   : > { %v5068_v1 = vsel %vm5065_vm9, %v4993_v25, %v5067_v41 }
 0x273   : > { %5069 = vst [vmem:[%s214_s26] sm:$0xff] %v5068_v1 }
 0x274   : > { %6889 = shalt.err (!%p6886_p10)
}
 0x275   : > { %s6890_s9 = scalar_lea.hbm %s8816_s30, 128  ;;  %s6894_s11 = scalar_lea.hbm %s8867_s3, 256 }
 0x276   : > { %p6891_p11 = scmp.ne.s32.totalorder %s8816_s30, %s6890_s9  ;;  %p6895_p0 = scmp.lt.u32.totalorder %s8816_s30, %s8867_s3 }
 0x277   : > { %p6896_p1 = scmp.lt.u32.totalorder %s6894_s11, %s6890_s9  ;;  %p6898_p3 = scmp.lt.u32.totalorder %s6890_s9, %s8816_s30 }
 0x278   : > { %p6892_p12 = pnand %p6891_p11, %p7024_p4 }
 0x279   : > { %p6897_p2 = por %p6896_p1, %p6895_p0 }
 0x27a   : > { %p6893_p13 = pneg %p6892_p12 }
 0x27b   : > { %p6899_p5 = por %p6898_p3, %p6897_p2 }
 0x27d   : > { %p6900_p6 = pnand %p6899_p5, %p6893_p13 }
 0x27f   : > { %6903 = shalt.err (!%p6900_p6)
}
 0x280   : > { %6682 = dma.vmem_to_hbm [thread:$0]  (%p7024_p4), %s8818_s27, 128, %s8816_s30, %s5076_s4  }
 0x281 PF: > { %p6692_p7 = scmp.ge.s32.totalorder %s6958_s17, 2  ;;  %s5121_s23 = sand.u32 1, %s6938_s12  }
 0x282   : > { %s5122_s19 = scalar_lea.sflag [#allocation3], %s5121_s23 }
 0x283   : > { %p6686_p9 = pnand %p6692_p7, %p7031_p8 }
 0x285   : > { %6929 = dma.done.wait (!%p6686_p9), %s5122_s19, 2048  }
 0x286   : > { %6931 = vsyncadd (!%p6686_p9), %s5122_s19, 4294965248  ;;  %s5131_s26 = scalar_lea.sflag [#allocation5], %s5121_s23 }
 0x287   : > { %6933 = dma.done.wait (!%p6686_p9), %s5131_s26, 128  }
 0x288   : > { %6935 = vsyncadd (!%p6686_p9), %s5131_s26, 4294967168  ;;  %s20_s17 = sadd.s32 1, %s6958_s17   ;;  %s8937_s12 = smov %s6942_s13 }
 0x289   : > { %p17_p10 = scmp.ge.s32.totalorder %s20_s17, 4   ;;  %s8938_s13 = smov %s6946_s14 }
 0x28a   : > { %s8939_s14 = smov %s7037_s25  ;;  %s8940_s15 = smov %s6954_s16 }
 0x28b   : > { %s8941_s16 = smov %s8943_s20  ;;  %19 = sbr.rel (!%p17_p10) target bundleno = 6 (0x6), region = 94 }
 0x292   :  { %5136 = vsyncpa [#allocation3], 1 }
 0x293   :  { %5138 = vsyncpa [#allocation3 + $0x1], 1 }
 0x294   :  { %5139 = vsyncpa [#allocation5], 1 }
 0x295   :  { %5141 = vsyncpa [#allocation5 + $0x1], 1 }

</bundles_post_ra>
